<compile_context>
chip_gen: v6e
topology: v6e:2x2x1
jax: 0.10.0
libtpu: 0.0.40
codegen_flags: <defaults>
</compile_context>

<pallas_src>
import functools

import jax
import jax.numpy as jnp
from jax.experimental import pallas as pl
from jax.experimental.pallas import tpu as pltpu

SIGMAS = (0.3, 0.5, 0.5, 0.5, 0.5, 0.5)          # noise sigma before each Linear
DIMS = (28 * 28, 1000, 500, 250, 250, 250, 10)   # layer widths
N_LAYERS = 6                                     # 5 head linears + 1 tail linear


def _pad_to(n, m):
    return ((n + m - 1) // m) * m


PAD_DIMS = tuple(_pad_to(d, 128) for d in DIMS)  # (896, 1024, 512, 256, 256, 256, 128)

# DMA plan: 4 copies.
#   slot 0: w0 (896 x 1024)        slot 1: w1 (1024 x 512)
#   slot 2: [w2; w3; w4] packed row-wise ((512+256+256)=1024 x 256)
#   slot 3: w5 (256 x 128)
_N_DMAS = 4
_LAYER_SRC = (                                    # (dma slot, row offset in slot buf)
    (0, 0),
    (1, 0),
    (2, 0),
    (2, PAD_DIMS[2]),
    (2, PAD_DIMS[2] + PAD_DIMS[3]),
    (3, 0),
)
_DMA_SHAPES = (
    (PAD_DIMS[0], PAD_DIMS[1]),
    (PAD_DIMS[1], PAD_DIMS[2]),
    (PAD_DIMS[2] + PAD_DIMS[3] + PAD_DIMS[4], PAD_DIMS[3]),
    (PAD_DIMS[5], PAD_DIMS[6]),
)


def _discriminator_kernel(*refs):
    """refs = (x, noise_0..5, w_hbm_0..3 (int8, HBM), scale_0..5 ([1,Dout_pad] f32),
               b_0..5 ([1,Dout_pad] f32), feat_out, score_out,
               w_vmem_0..3 (int8 scratch), dma_sems)."""
    idx = 0
    x_ref = refs[idx]; idx += 1
    noise_refs = refs[idx:idx + N_LAYERS]; idx += N_LAYERS
    w_hbm_refs = refs[idx:idx + _N_DMAS]; idx += _N_DMAS
    scale_refs = refs[idx:idx + N_LAYERS]; idx += N_LAYERS
    b_refs = refs[idx:idx + N_LAYERS]; idx += N_LAYERS
    feat_ref = refs[idx]; idx += 1
    score_ref = refs[idx]; idx += 1
    w_vmem_refs = refs[idx:idx + _N_DMAS]; idx += _N_DMAS
    sem = refs[idx]

    # Kick off all weight DMAs immediately (biggest first); each layer waits only for
    # its own slot, so layer-i compute overlaps the copies of later-layer weights.
    copies = [
        pltpu.make_async_copy(w_hbm_refs[i], w_vmem_refs[i], sem.at[i])
        for i in range(_N_DMAS)
    ]
    for cp in copies:
        cp.start()

    waited = [False] * _N_DMAS
    h = x_ref[...]                                           # f32 [Bp, 896]
    for i in range(N_LAYERS):
        # GaussianNoiseLayer (always active, see note above) — f32 elementwise.
        h = h + SIGMAS[i] * noise_refs[i][...]
        slot, roff = _LAYER_SRC[i]
        if not waited[slot]:
            copies[slot].wait()
            waited[slot] = True
        nrows = PAD_DIMS[i]
        # int8 -> bf16 is exact for |q| <= 127; per-column scale is folded into the
        # f32 epilogue so the MXU runs a plain bf16 x bf16 -> f32 matmul.
        w_q = w_vmem_refs[slot][roff:roff + nrows, :]
        acc = jnp.dot(h.astype(jnp.bfloat16), w_q.astype(jnp.bfloat16),
                      preferred_element_type=jnp.float32)
        h = acc * scale_refs[i][...] + b_refs[i][...]
        if i < N_LAYERS - 1:          # ReLU after every head linear, not the tail
            h = jnp.maximum(h, 0.0)
        if i == N_LAYERS - 2:         # output of network_head == features
            feat_ref[...] = h.astype(feat_ref.dtype)
    score_ref[...] = h.astype(score_ref.dtype)


def _zero_index_map(_, *, ndim):
    return (0,) * ndim


def _vmem_spec(shape):
    return pl.BlockSpec(shape, functools.partial(_zero_index_map, ndim=len(shape)))


def _pad2(a, rows, cols):
    a = a if a.ndim == 2 else a.reshape((1, -1))
    a = a.astype(jnp.float32)
    return jnp.pad(a, ((0, rows - a.shape[0]), (0, cols - a.shape[1])))


def _quantize_weights(weights_t):
    """Pad each [Din, Dout] f32 weight to PAD_DIMS and symmetric-quantize per output
    column.  Returns (int8 [Din_pad, Dout_pad] list, f32 [1, Dout_pad] scale list).
    Zero-padded rows/cols quantize to 0 and padded columns get scale 1, so padding
    stays exact."""
    wqs, scales = [], []
    for i in range(N_LAYERS):
        w = _pad2(weights_t[i], PAD_DIMS[i], PAD_DIMS[i + 1])
        amax = jnp.max(jnp.abs(w), axis=0, keepdims=True)
        s = jnp.where(amax > 0.0, amax / 127.0, 1.0)
        wq = jnp.clip(jnp.round(w / s), -127.0, 127.0).astype(jnp.int8)
        wqs.append(wq)
        scales.append(s.astype(jnp.float32))
    return wqs, scales


def discriminator_forward(x, noises, weights_t, biases):
    """x: [B, 784]; noises[i]: [B, DIMS[i]]; weights_t[i]: [DIMS[i], DIMS[i+1]] (f32);
    biases[i]: [DIMS[i+1]] or [1, DIMS[i+1]]. Returns (features [B,250], score [B,10])."""
    B = x.shape[0]
    Bp = _pad_to(max(B, 1), 16)      # bf16 LHS packs 16 sublanes per vreg

    x_p = _pad2(x, Bp, PAD_DIMS[0])
    noises_p = [_pad2(noises[i], Bp, PAD_DIMS[i]) for i in range(N_LAYERS)]
    biases_p = [_pad2(biases[i], 1, PAD_DIMS[i + 1]) for i in range(N_LAYERS)]

    wqs, scales = _quantize_weights(weights_t)
    # 4 HBM weight buffers: w0, w1, [w2;w3;w4] packed row-wise, w5.
    w_dma = [wqs[0], wqs[1], jnp.concatenate([wqs[2], wqs[3], wqs[4]], axis=0), wqs[5]]

    inputs = [x_p] + noises_p + w_dma + scales + biases_p

    in_specs = (
        [_vmem_spec(x_p.shape)]
        + [_vmem_spec(a.shape) for a in noises_p]
        + [pl.BlockSpec(memory_space=pl.ANY)] * _N_DMAS      # int8 weights stay in HBM
        + [_vmem_spec(a.shape) for a in scales]
        + [_vmem_spec(a.shape) for a in biases_p]
    )
    out_shape = (
        jax.ShapeDtypeStruct((Bp, PAD_DIMS[-2]), jnp.float32),   # features (padded)
        jax.ShapeDtypeStruct((Bp, PAD_DIMS[-1]), jnp.float32),   # score (padded)
    )
    out_specs = (_vmem_spec((Bp, PAD_DIMS[-2])), _vmem_spec((Bp, PAD_DIMS[-1])))

    scratch_shapes = (
        [pltpu.VMEM(shape, jnp.int8) for shape in _DMA_SHAPES]
        + [pltpu.SemaphoreType.DMA((_N_DMAS,))]
    )

    feat_p, score_p = pl.pallas_call(
        _discriminator_kernel,
        grid=(1,),
        in_specs=in_specs,
        out_specs=out_specs,
        out_shape=out_shape,
        scratch_shapes=scratch_shapes,
        compiler_params=pltpu.CompilerParams(
            dimension_semantics=("arbitrary",),
            vmem_limit_bytes=32 << 20,       # valid on v5e/v6e/v7x; footprint ~2.5 MiB
        ),
    )(*inputs)

    return feat_p[:B, :DIMS[-2]], score_p[:B, :DIMS[-1]]


def _make_params(key):
    """Deterministic weight_norm(Linear) params: W = g * v / ||v||_row (f32, unpadded)."""
    weights_t, biases = [], []
    for i in range(N_LAYERS):
        d_in, d_out = DIMS[i], DIMS[i + 1]
        key, kv, kb, kg = jax.random.split(key, 4)
        bound = 1.0 / jnp.sqrt(d_in)
        v = jax.random.uniform(kv, (d_out, d_in), jnp.float32, -bound, bound)
        b = jax.random.uniform(kb, (d_out,), jnp.float32, -bound, bound)
        # g initialized like PyTorch (row norms of v), slightly perturbed so the
        # weight-norm reparametrization is actually exercised.
        g = jnp.linalg.norm(v, axis=1) * (1.0 + 0.1 * jax.random.normal(kg, (d_out,)))
        w = v * (g / jnp.linalg.norm(v, axis=1))[:, None]        # [d_out, d_in]
        weights_t.append(jnp.asarray(w.T))                       # [d_in, d_out]
        biases.append(b.reshape(1, d_out))
    return weights_t, biases


def _reference(x, noises, weights_t, biases):
    """Pure-JAX reference with identical int8-weight / bf16-matmul / f32-epilogue
    numerics (same quantization helper as the kernel wrapper)."""
    B = x.shape[0]
    Bp = _pad_to(max(B, 1), 16)
    wqs, scales = _quantize_weights(weights_t)
    h = _pad2(x, Bp, PAD_DIMS[0])
    feat = None
    for i in range(N_LAYERS):
        h = h + SIGMAS[i] * _pad2(noises[i], Bp, PAD_DIMS[i])
        acc = jnp.dot(h.astype(jnp.bfloat16), wqs[i].astype(jnp.bfloat16),
                      preferred_element_type=jnp.float32)
        h = acc * scales[i] + _pad2(biases[i], 1, PAD_DIMS[i + 1])
        if i < N_LAYERS - 1:
            h = jnp.maximum(h, 0.0)
        if i == N_LAYERS - 2:
            feat = h
    return feat[:B, :DIMS[-2]], h[:B, :DIMS[-1]]


if __name__ == "__main__":
    key = jax.random.PRNGKey(0)
    key, kx = jax.random.split(key)
    B = 8
    x = jax.random.normal(kx, (B, DIMS[0]), jnp.float32)

    weights_t, biases = _make_params(jax.random.PRNGKey(1))

    noise_keys = jax.random.split(jax.random.PRNGKey(2), N_LAYERS)
    noises = [jax.random.normal(noise_keys[i], (B, DIMS[i]), jnp.float32)
              for i in range(N_LAYERS)]

    features, score = discriminator_forward(x, noises, weights_t, biases)
    features = jax.block_until_ready(features)
    score = jax.block_until_ready(score)

    ref_feat, ref_score = _reference(x, noises, weights_t, biases)
    assert features.shape == (B, 250) and score.shape == (B, 10)
    assert jnp.allclose(features, ref_feat, atol=1e-2, rtol=1e-2)
    assert jnp.allclose(score, ref_score, atol=1e-2, rtol=1e-2)

    print("KERNEL_OK")
</pallas_src>

<mosaic_0001>
module attributes {stable_mosaic.version = 11 : i64} {
  func.func @_discriminator_kernel(%arg0: i32, %arg1: memref<16x896xf32, #tpu.memory_space<vmem>>, %arg2: memref<16x896xf32, #tpu.memory_space<vmem>>, %arg3: memref<16x1024xf32, #tpu.memory_space<vmem>>, %arg4: memref<16x512xf32, #tpu.memory_space<vmem>>, %arg5: memref<16x256xf32, #tpu.memory_space<vmem>>, %arg6: memref<16x256xf32, #tpu.memory_space<vmem>>, %arg7: memref<16x256xf32, #tpu.memory_space<vmem>>, %arg8: memref<896x1024xi8, #tpu.memory_space<any>>, %arg9: memref<1024x512xi8, #tpu.memory_space<any>>, %arg10: memref<1024x256xi8, #tpu.memory_space<any>>, %arg11: memref<256x128xi8, #tpu.memory_space<any>>, %arg12: memref<1x1024xf32, #tpu.memory_space<vmem>>, %arg13: memref<1x512xf32, #tpu.memory_space<vmem>>, %arg14: memref<1x256xf32, #tpu.memory_space<vmem>>, %arg15: memref<1x256xf32, #tpu.memory_space<vmem>>, %arg16: memref<1x256xf32, #tpu.memory_space<vmem>>, %arg17: memref<1x128xf32, #tpu.memory_space<vmem>>, %arg18: memref<1x1024xf32, #tpu.memory_space<vmem>>, %arg19: memref<1x512xf32, #tpu.memory_space<vmem>>, %arg20: memref<1x256xf32, #tpu.memory_space<vmem>>, %arg21: memref<1x256xf32, #tpu.memory_space<vmem>>, %arg22: memref<1x256xf32, #tpu.memory_space<vmem>>, %arg23: memref<1x128xf32, #tpu.memory_space<vmem>>, %arg24: memref<16x256xf32, #tpu.memory_space<vmem>>, %arg25: memref<16x128xf32, #tpu.memory_space<vmem>>, %arg26: memref<896x1024xi8, #tpu.memory_space<vmem>>, %arg27: memref<1024x512xi8, #tpu.memory_space<vmem>>, %arg28: memref<1024x256xi8, #tpu.memory_space<vmem>>, %arg29: memref<256x128xi8, #tpu.memory_space<vmem>>, %arg30: memref<4x!tpu.dma_semaphore, #tpu.memory_space<semaphore_mem>>) attributes {dimension_semantics = [#tpu.dimension_semantics<arbitrary>], iteration_bounds = array<i64: 1>, scalar_prefetch = 0 : i64, scratch_operands = 5 : i64, tpu.core_type = #tpu.core_type<tc>, window_params = [{pipeline_mode = #tpu.pipeline_mode<synchronous>, transform_indices = @transform_0, window_bounds = array<i64: 16, 896>}, {pipeline_mode = #tpu.pipeline_mode<synchronous>, transform_indices = @transform_1, window_bounds = array<i64: 16, 896>}, {pipeline_mode = #tpu.pipeline_mode<synchronous>, transform_indices = @transform_2, window_bounds = array<i64: 16, 1024>}, {pipeline_mode = #tpu.pipeline_mode<synchronous>, transform_indices = @transform_3, window_bounds = array<i64: 16, 512>}, {pipeline_mode = #tpu.pipeline_mode<synchronous>, transform_indices = @transform_4, window_bounds = array<i64: 16, 256>}, {pipeline_mode = #tpu.pipeline_mode<synchronous>, transform_indices = @transform_5, window_bounds = array<i64: 16, 256>}, {pipeline_mode = #tpu.pipeline_mode<synchronous>, transform_indices = @transform_6, window_bounds = array<i64: 16, 256>}, {}, {}, {}, {}, {pipeline_mode = #tpu.pipeline_mode<synchronous>, transform_indices = @transform_11, window_bounds = array<i64: 1, 1024>}, {pipeline_mode = #tpu.pipeline_mode<synchronous>, transform_indices = @transform_12, window_bounds = array<i64: 1, 512>}, {pipeline_mode = #tpu.pipeline_mode<synchronous>, transform_indices = @transform_13, window_bounds = array<i64: 1, 256>}, {pipeline_mode = #tpu.pipeline_mode<synchronous>, transform_indices = @transform_14, window_bounds = array<i64: 1, 256>}, {pipeline_mode = #tpu.pipeline_mode<synchronous>, transform_indices = @transform_15, window_bounds = array<i64: 1, 256>}, {pipeline_mode = #tpu.pipeline_mode<synchronous>, transform_indices = @transform_16, window_bounds = array<i64: 1, 128>}, {pipeline_mode = #tpu.pipeline_mode<synchronous>, transform_indices = @transform_17, window_bounds = array<i64: 1, 1024>}, {pipeline_mode = #tpu.pipeline_mode<synchronous>, transform_indices = @transform_18, window_bounds = array<i64: 1, 512>}, {pipeline_mode = #tpu.pipeline_mode<synchronous>, transform_indices = @transform_19, window_bounds = array<i64: 1, 256>}, {pipeline_mode = #tpu.pipeline_mode<synchronous>, transform_indices = @transform_20, window_bounds = array<i64: 1, 256>}, {pipeline_mode = #tpu.pipeline_mode<synchronous>, transform_indices = @transform_21, window_bounds = array<i64: 1, 256>}, {pipeline_mode = #tpu.pipeline_mode<synchronous>, transform_indices = @transform_22, window_bounds = array<i64: 1, 128>}, {pipeline_mode = #tpu.pipeline_mode<synchronous>, transform_indices = @transform_23, window_bounds = array<i64: 16, 256>}, {pipeline_mode = #tpu.pipeline_mode<synchronous>, transform_indices = @transform_24, window_bounds = array<i64: 16, 128>}]} {
    %c0_i32 = arith.constant 0 : i32
    %0 = tpu.memref_slice %arg30[%c0_i32] : memref<4x!tpu.dma_semaphore, #tpu.memory_space<semaphore_mem>> -> memref<1x!tpu.dma_semaphore, #tpu.memory_space<semaphore_mem>>
    %1 = tpu.memref_squeeze %0 : memref<1x!tpu.dma_semaphore, #tpu.memory_space<semaphore_mem>> -> memref<!tpu.dma_semaphore, #tpu.memory_space<semaphore_mem>>
    tpu.enqueue_dma source(%arg8 : memref<896x1024xi8, #tpu.memory_space<any>>) target(%arg26 : memref<896x1024xi8, #tpu.memory_space<vmem>>) target_semaphore(%1 : memref<!tpu.dma_semaphore, #tpu.memory_space<semaphore_mem>>)
    %c1_i32 = arith.constant 1 : i32
    %2 = tpu.memref_slice %arg30[%c1_i32] : memref<4x!tpu.dma_semaphore, #tpu.memory_space<semaphore_mem>> -> memref<1x!tpu.dma_semaphore, #tpu.memory_space<semaphore_mem>>
    %3 = tpu.memref_squeeze %2 : memref<1x!tpu.dma_semaphore, #tpu.memory_space<semaphore_mem>> -> memref<!tpu.dma_semaphore, #tpu.memory_space<semaphore_mem>>
    tpu.enqueue_dma source(%arg9 : memref<1024x512xi8, #tpu.memory_space<any>>) target(%arg27 : memref<1024x512xi8, #tpu.memory_space<vmem>>) target_semaphore(%3 : memref<!tpu.dma_semaphore, #tpu.memory_space<semaphore_mem>>)
    %c2_i32 = arith.constant 2 : i32
    %4 = tpu.memref_slice %arg30[%c2_i32] : memref<4x!tpu.dma_semaphore, #tpu.memory_space<semaphore_mem>> -> memref<1x!tpu.dma_semaphore, #tpu.memory_space<semaphore_mem>>
    %5 = tpu.memref_squeeze %4 : memref<1x!tpu.dma_semaphore, #tpu.memory_space<semaphore_mem>> -> memref<!tpu.dma_semaphore, #tpu.memory_space<semaphore_mem>>
    tpu.enqueue_dma source(%arg10 : memref<1024x256xi8, #tpu.memory_space<any>>) target(%arg28 : memref<1024x256xi8, #tpu.memory_space<vmem>>) target_semaphore(%5 : memref<!tpu.dma_semaphore, #tpu.memory_space<semaphore_mem>>)
    %c3_i32 = arith.constant 3 : i32
    %6 = tpu.memref_slice %arg30[%c3_i32] : memref<4x!tpu.dma_semaphore, #tpu.memory_space<semaphore_mem>> -> memref<1x!tpu.dma_semaphore, #tpu.memory_space<semaphore_mem>>
    %7 = tpu.memref_squeeze %6 : memref<1x!tpu.dma_semaphore, #tpu.memory_space<semaphore_mem>> -> memref<!tpu.dma_semaphore, #tpu.memory_space<semaphore_mem>>
    tpu.enqueue_dma source(%arg11 : memref<256x128xi8, #tpu.memory_space<any>>) target(%arg29 : memref<256x128xi8, #tpu.memory_space<vmem>>) target_semaphore(%7 : memref<!tpu.dma_semaphore, #tpu.memory_space<semaphore_mem>>)
    %c0 = arith.constant 0 : index
    %c0_0 = arith.constant 0 : index
    %8 = vector.load %arg1[%c0, %c0_0] : memref<16x896xf32, #tpu.memory_space<vmem>>, vector<16x896xf32>
    %c0_1 = arith.constant 0 : index
    %c0_2 = arith.constant 0 : index
    %9 = vector.load %arg2[%c0_1, %c0_2] : memref<16x896xf32, #tpu.memory_space<vmem>>, vector<16x896xf32>
    %cst = arith.constant 3.000000e-01 : f32
    %10 = vector.broadcast %cst : f32 to vector<16x896xf32>
    %11 = arith.mulf %10, %9 : vector<16x896xf32>
    %12 = arith.addf %8, %11 : vector<16x896xf32>
    %c0_i32_3 = arith.constant 0 : i32
    %13 = tpu.memref_slice %arg30[%c0_i32_3] : memref<4x!tpu.dma_semaphore, #tpu.memory_space<semaphore_mem>> -> memref<1x!tpu.dma_semaphore, #tpu.memory_space<semaphore_mem>>
    %14 = tpu.memref_squeeze %13 : memref<1x!tpu.dma_semaphore, #tpu.memory_space<semaphore_mem>> -> memref<!tpu.dma_semaphore, #tpu.memory_space<semaphore_mem>>
    tpu.wait_dma2 semaphore(%14 : memref<!tpu.dma_semaphore, #tpu.memory_space<semaphore_mem>>) src(%arg8 : memref<896x1024xi8, #tpu.memory_space<any>>) dst(%arg26 : memref<896x1024xi8, #tpu.memory_space<vmem>>)
    %c0_4 = arith.constant 0 : index
    %c0_5 = arith.constant 0 : index
    %15 = vector.load %arg26[%c0_4, %c0_5] : memref<896x1024xi8, #tpu.memory_space<vmem>>, vector<896x1024xi8>
    %16 = arith.truncf %12 : vector<16x896xf32> to vector<16x896xbf16>
    %17 = arith.sitofp %15 : vector<896x1024xi8> to vector<896x1024xbf16>
    %cst_6 = arith.constant dense<0.000000e+00> : vector<16x1024xf32>
    %18 = tpu.matmul %16, %17, %cst_6 {dimension_numbers = #tpu.dot_dimension_numbers<[1], [0], [0], [1], [0, 0, 1, 1], [], []>} : vector<16x896xbf16>, vector<896x1024xbf16>, vector<16x1024xf32> -> vector<16x1024xf32>
    %c0_7 = arith.constant 0 : index
    %c0_8 = arith.constant 0 : index
    %19 = vector.load %arg12[%c0_7, %c0_8] : memref<1x1024xf32, #tpu.memory_space<vmem>>, vector<1x1024xf32>
    %20 = vector.broadcast %19 : vector<1x1024xf32> to vector<16x1024xf32>
    %21 = arith.mulf %18, %20 : vector<16x1024xf32>
    %c0_9 = arith.constant 0 : index
    %c0_10 = arith.constant 0 : index
    %22 = vector.load %arg18[%c0_9, %c0_10] : memref<1x1024xf32, #tpu.memory_space<vmem>>, vector<1x1024xf32>
    %23 = vector.broadcast %22 : vector<1x1024xf32> to vector<16x1024xf32>
    %24 = arith.addf %21, %23 : vector<16x1024xf32>
    %cst_11 = arith.constant 0.000000e+00 : f32
    %25 = vector.broadcast %cst_11 : f32 to vector<16x1024xf32>
    %26 = arith.maximumf %24, %25 : vector<16x1024xf32>
    %c0_12 = arith.constant 0 : index
    %c0_13 = arith.constant 0 : index
    %27 = vector.load %arg3[%c0_12, %c0_13] : memref<16x1024xf32, #tpu.memory_space<vmem>>, vector<16x1024xf32>
    %cst_14 = arith.constant 5.000000e-01 : f32
    %28 = vector.broadcast %cst_14 : f32 to vector<16x1024xf32>
    %29 = arith.mulf %28, %27 : vector<16x1024xf32>
    %30 = arith.addf %26, %29 : vector<16x1024xf32>
    %c1_i32_15 = arith.constant 1 : i32
    %31 = tpu.memref_slice %arg30[%c1_i32_15] : memref<4x!tpu.dma_semaphore, #tpu.memory_space<semaphore_mem>> -> memref<1x!tpu.dma_semaphore, #tpu.memory_space<semaphore_mem>>
    %32 = tpu.memref_squeeze %31 : memref<1x!tpu.dma_semaphore, #tpu.memory_space<semaphore_mem>> -> memref<!tpu.dma_semaphore, #tpu.memory_space<semaphore_mem>>
    tpu.wait_dma2 semaphore(%32 : memref<!tpu.dma_semaphore, #tpu.memory_space<semaphore_mem>>) src(%arg9 : memref<1024x512xi8, #tpu.memory_space<any>>) dst(%arg27 : memref<1024x512xi8, #tpu.memory_space<vmem>>)
    %c0_16 = arith.constant 0 : index
    %c0_17 = arith.constant 0 : index
    %33 = vector.load %arg27[%c0_16, %c0_17] : memref<1024x512xi8, #tpu.memory_space<vmem>>, vector<1024x512xi8>
    %34 = arith.truncf %30 : vector<16x1024xf32> to vector<16x1024xbf16>
    %35 = arith.sitofp %33 : vector<1024x512xi8> to vector<1024x512xbf16>
    %cst_18 = arith.constant dense<0.000000e+00> : vector<16x512xf32>
    %36 = tpu.matmul %34, %35, %cst_18 {dimension_numbers = #tpu.dot_dimension_numbers<[1], [0], [0], [1], [0, 0, 1, 1], [], []>} : vector<16x1024xbf16>, vector<1024x512xbf16>, vector<16x512xf32> -> vector<16x512xf32>
    %c0_19 = arith.constant 0 : index
    %c0_20 = arith.constant 0 : index
    %37 = vector.load %arg13[%c0_19, %c0_20] : memref<1x512xf32, #tpu.memory_space<vmem>>, vector<1x512xf32>
    %38 = vector.broadcast %37 : vector<1x512xf32> to vector<16x512xf32>
    %39 = arith.mulf %36, %38 : vector<16x512xf32>
    %c0_21 = arith.constant 0 : index
    %c0_22 = arith.constant 0 : index
    %40 = vector.load %arg19[%c0_21, %c0_22] : memref<1x512xf32, #tpu.memory_space<vmem>>, vector<1x512xf32>
    %41 = vector.broadcast %40 : vector<1x512xf32> to vector<16x512xf32>
    %42 = arith.addf %39, %41 : vector<16x512xf32>
    %cst_23 = arith.constant 0.000000e+00 : f32
    %43 = vector.broadcast %cst_23 : f32 to vector<16x512xf32>
    %44 = arith.maximumf %42, %43 : vector<16x512xf32>
    %c0_24 = arith.constant 0 : index
    %c0_25 = arith.constant 0 : index
    %45 = vector.load %arg4[%c0_24, %c0_25] : memref<16x512xf32, #tpu.memory_space<vmem>>, vector<16x512xf32>
    %cst_26 = arith.constant 5.000000e-01 : f32
    %46 = vector.broadcast %cst_26 : f32 to vector<16x512xf32>
    %47 = arith.mulf %46, %45 : vector<16x512xf32>
    %48 = arith.addf %44, %47 : vector<16x512xf32>
    %c2_i32_27 = arith.constant 2 : i32
    %49 = tpu.memref_slice %arg30[%c2_i32_27] : memref<4x!tpu.dma_semaphore, #tpu.memory_space<semaphore_mem>> -> memref<1x!tpu.dma_semaphore, #tpu.memory_space<semaphore_mem>>
    %50 = tpu.memref_squeeze %49 : memref<1x!tpu.dma_semaphore, #tpu.memory_space<semaphore_mem>> -> memref<!tpu.dma_semaphore, #tpu.memory_space<semaphore_mem>>
    tpu.wait_dma2 semaphore(%50 : memref<!tpu.dma_semaphore, #tpu.memory_space<semaphore_mem>>) src(%arg10 : memref<1024x256xi8, #tpu.memory_space<any>>) dst(%arg28 : memref<1024x256xi8, #tpu.memory_space<vmem>>)
    %c0_28 = arith.constant 0 : index
    %c0_29 = arith.constant 0 : index
    %51 = vector.load %arg28[%c0_28, %c0_29] : memref<1024x256xi8, #tpu.memory_space<vmem>>, vector<512x256xi8>
    %52 = arith.truncf %48 : vector<16x512xf32> to vector<16x512xbf16>
    %53 = arith.sitofp %51 : vector<512x256xi8> to vector<512x256xbf16>
    %cst_30 = arith.constant dense<0.000000e+00> : vector<16x256xf32>
    %54 = tpu.matmul %52, %53, %cst_30 {dimension_numbers = #tpu.dot_dimension_numbers<[1], [0], [0], [1], [0, 0, 1, 1], [], []>} : vector<16x512xbf16>, vector<512x256xbf16>, vector<16x256xf32> -> vector<16x256xf32>
    %c0_31 = arith.constant 0 : index
    %c0_32 = arith.constant 0 : index
    %55 = vector.load %arg14[%c0_31, %c0_32] : memref<1x256xf32, #tpu.memory_space<vmem>>, vector<1x256xf32>
    %56 = vector.broadcast %55 : vector<1x256xf32> to vector<16x256xf32>
    %57 = arith.mulf %54, %56 : vector<16x256xf32>
    %c0_33 = arith.constant 0 : index
    %c0_34 = arith.constant 0 : index
    %58 = vector.load %arg20[%c0_33, %c0_34] : memref<1x256xf32, #tpu.memory_space<vmem>>, vector<1x256xf32>
    %59 = vector.broadcast %58 : vector<1x256xf32> to vector<16x256xf32>
    %60 = arith.addf %57, %59 : vector<16x256xf32>
    %cst_35 = arith.constant 0.000000e+00 : f32
    %61 = vector.broadcast %cst_35 : f32 to vector<16x256xf32>
    %62 = arith.maximumf %60, %61 : vector<16x256xf32>
    %c0_36 = arith.constant 0 : index
    %c0_37 = arith.constant 0 : index
    %63 = vector.load %arg5[%c0_36, %c0_37] : memref<16x256xf32, #tpu.memory_space<vmem>>, vector<16x256xf32>
    %cst_38 = arith.constant 5.000000e-01 : f32
    %64 = vector.broadcast %cst_38 : f32 to vector<16x256xf32>
    %65 = arith.mulf %64, %63 : vector<16x256xf32>
    %66 = arith.addf %62, %65 : vector<16x256xf32>
    %c512 = arith.constant 512 : index
    %c0_39 = arith.constant 0 : index
    %67 = vector.load %arg28[%c512, %c0_39] : memref<1024x256xi8, #tpu.memory_space<vmem>>, vector<256x256xi8>
    %68 = arith.truncf %66 : vector<16x256xf32> to vector<16x256xbf16>
    %69 = arith.sitofp %67 : vector<256x256xi8> to vector<256x256xbf16>
    %cst_40 = arith.constant dense<0.000000e+00> : vector<16x256xf32>
    %70 = tpu.matmul %68, %69, %cst_40 {dimension_numbers = #tpu.dot_dimension_numbers<[1], [0], [0], [1], [0, 0, 1, 1], [], []>} : vector<16x256xbf16>, vector<256x256xbf16>, vector<16x256xf32> -> vector<16x256xf32>
    %c0_41 = arith.constant 0 : index
    %c0_42 = arith.constant 0 : index
    %71 = vector.load %arg15[%c0_41, %c0_42] : memref<1x256xf32, #tpu.memory_space<vmem>>, vector<1x256xf32>
    %72 = vector.broadcast %71 : vector<1x256xf32> to vector<16x256xf32>
    %73 = arith.mulf %70, %72 : vector<16x256xf32>
    %c0_43 = arith.constant 0 : index
    %c0_44 = arith.constant 0 : index
    %74 = vector.load %arg21[%c0_43, %c0_44] : memref<1x256xf32, #tpu.memory_space<vmem>>, vector<1x256xf32>
    %75 = vector.broadcast %74 : vector<1x256xf32> to vector<16x256xf32>
    %76 = arith.addf %73, %75 : vector<16x256xf32>
    %cst_45 = arith.constant 0.000000e+00 : f32
    %77 = vector.broadcast %cst_45 : f32 to vector<16x256xf32>
    %78 = arith.maximumf %76, %77 : vector<16x256xf32>
    %c0_46 = arith.constant 0 : index
    %c0_47 = arith.constant 0 : index
    %79 = vector.load %arg6[%c0_46, %c0_47] : memref<16x256xf32, #tpu.memory_space<vmem>>, vector<16x256xf32>
    %cst_48 = arith.constant 5.000000e-01 : f32
    %80 = vector.broadcast %cst_48 : f32 to vector<16x256xf32>
    %81 = arith.mulf %80, %79 : vector<16x256xf32>
    %82 = arith.addf %78, %81 : vector<16x256xf32>
    %c768 = arith.constant 768 : index
    %c0_49 = arith.constant 0 : index
    %83 = vector.load %arg28[%c768, %c0_49] : memref<1024x256xi8, #tpu.memory_space<vmem>>, vector<256x256xi8>
    %84 = arith.truncf %82 : vector<16x256xf32> to vector<16x256xbf16>
    %85 = arith.sitofp %83 : vector<256x256xi8> to vector<256x256xbf16>
    %cst_50 = arith.constant dense<0.000000e+00> : vector<16x256xf32>
    %86 = tpu.matmul %84, %85, %cst_50 {dimension_numbers = #tpu.dot_dimension_numbers<[1], [0], [0], [1], [0, 0, 1, 1], [], []>} : vector<16x256xbf16>, vector<256x256xbf16>, vector<16x256xf32> -> vector<16x256xf32>
    %c0_51 = arith.constant 0 : index
    %c0_52 = arith.constant 0 : index
    %87 = vector.load %arg16[%c0_51, %c0_52] : memref<1x256xf32, #tpu.memory_space<vmem>>, vector<1x256xf32>
    %88 = vector.broadcast %87 : vector<1x256xf32> to vector<16x256xf32>
    %89 = arith.mulf %86, %88 : vector<16x256xf32>
    %c0_53 = arith.constant 0 : index
    %c0_54 = arith.constant 0 : index
    %90 = vector.load %arg22[%c0_53, %c0_54] : memref<1x256xf32, #tpu.memory_space<vmem>>, vector<1x256xf32>
    %91 = vector.broadcast %90 : vector<1x256xf32> to vector<16x256xf32>
    %92 = arith.addf %89, %91 : vector<16x256xf32>
    %cst_55 = arith.constant 0.000000e+00 : f32
    %93 = vector.broadcast %cst_55 : f32 to vector<16x256xf32>
    %94 = arith.maximumf %92, %93 : vector<16x256xf32>
    %c0_56 = arith.constant 0 : index
    %c0_57 = arith.constant 0 : index
    %95 = vector.load %arg24[%c0_56, %c0_57] : memref<16x256xf32, #tpu.memory_space<vmem>>, vector<16x256xf32>
    tpu.vector_store %arg24[%c0_56, %c0_57], %94 {strides = array<i32>} : memref<16x256xf32, #tpu.memory_space<vmem>>, vector<16x256xf32>,
    %c0_58 = arith.constant 0 : index
    %c0_59 = arith.constant 0 : index
    %96 = vector.load %arg7[%c0_58, %c0_59] : memref<16x256xf32, #tpu.memory_space<vmem>>, vector<16x256xf32>
    %cst_60 = arith.constant 5.000000e-01 : f32
    %97 = vector.broadcast %cst_60 : f32 to vector<16x256xf32>
    %98 = arith.mulf %97, %96 : vector<16x256xf32>
    %99 = arith.addf %94, %98 : vector<16x256xf32>
    %c3_i32_61 = arith.constant 3 : i32
    %100 = tpu.memref_slice %arg30[%c3_i32_61] : memref<4x!tpu.dma_semaphore, #tpu.memory_space<semaphore_mem>> -> memref<1x!tpu.dma_semaphore, #tpu.memory_space<semaphore_mem>>
    %101 = tpu.memref_squeeze %100 : memref<1x!tpu.dma_semaphore, #tpu.memory_space<semaphore_mem>> -> memref<!tpu.dma_semaphore, #tpu.memory_space<semaphore_mem>>
    tpu.wait_dma2 semaphore(%101 : memref<!tpu.dma_semaphore, #tpu.memory_space<semaphore_mem>>) src(%arg11 : memref<256x128xi8, #tpu.memory_space<any>>) dst(%arg29 : memref<256x128xi8, #tpu.memory_space<vmem>>)
    %c0_62 = arith.constant 0 : index
    %c0_63 = arith.constant 0 : index
    %102 = vector.load %arg29[%c0_62, %c0_63] : memref<256x128xi8, #tpu.memory_space<vmem>>, vector<256x128xi8>
    %103 = arith.truncf %99 : vector<16x256xf32> to vector<16x256xbf16>
    %104 = arith.sitofp %102 : vector<256x128xi8> to vector<256x128xbf16>
    %cst_64 = arith.constant dense<0.000000e+00> : vector<16x128xf32>
    %105 = tpu.matmul %103, %104, %cst_64 {dimension_numbers = #tpu.dot_dimension_numbers<[1], [0], [0], [1], [0, 0, 1, 1], [], []>} : vector<16x256xbf16>, vector<256x128xbf16>, vector<16x128xf32> -> vector<16x128xf32>
    %c0_65 = arith.constant 0 : index
    %c0_66 = arith.constant 0 : index
    %106 = vector.load %arg17[%c0_65, %c0_66] : memref<1x128xf32, #tpu.memory_space<vmem>>, vector<1x128xf32>
    %107 = vector.broadcast %106 : vector<1x128xf32> to vector<16x128xf32>
    %108 = arith.mulf %105, %107 : vector<16x128xf32>
    %c0_67 = arith.constant 0 : index
    %c0_68 = arith.constant 0 : index
    %109 = vector.load %arg23[%c0_67, %c0_68] : memref<1x128xf32, #tpu.memory_space<vmem>>, vector<1x128xf32>
    %110 = vector.broadcast %109 : vector<1x128xf32> to vector<16x128xf32>
    %111 = arith.addf %108, %110 : vector<16x128xf32>
    %c0_69 = arith.constant 0 : index
    %c0_70 = arith.constant 0 : index
    %112 = vector.load %arg25[%c0_69, %c0_70] : memref<16x128xf32, #tpu.memory_space<vmem>>, vector<16x128xf32>
    tpu.vector_store %arg25[%c0_69, %c0_70], %111 {strides = array<i32>} : memref<16x128xf32, #tpu.memory_space<vmem>>, vector<16x128xf32>,
    return
  }
  func.func @transform_0(%arg0: i32) -> (i32, i32) {
    %c0_i32 = arith.constant 0 : i32
    %c0_i32_0 = arith.constant 0 : i32
    %c0_i32_1 = arith.constant 0 : i32
    return %c0_i32, %c0_i32_0 : i32, i32
  }
  func.func @transform_1(%arg0: i32) -> (i32, i32) {
    %c0_i32 = arith.constant 0 : i32
    %c0_i32_0 = arith.constant 0 : i32
    %c0_i32_1 = arith.constant 0 : i32
    return %c0_i32, %c0_i32_0 : i32, i32
  }
  func.func @transform_2(%arg0: i32) -> (i32, i32) {
    %c0_i32 = arith.constant 0 : i32
    %c0_i32_0 = arith.constant 0 : i32
    %c0_i32_1 = arith.constant 0 : i32
    return %c0_i32, %c0_i32_0 : i32, i32
  }
  func.func @transform_3(%arg0: i32) -> (i32, i32) {
    %c0_i32 = arith.constant 0 : i32
    %c0_i32_0 = arith.constant 0 : i32
    %c0_i32_1 = arith.constant 0 : i32
    return %c0_i32, %c0_i32_0 : i32, i32
  }
  func.func @transform_4(%arg0: i32) -> (i32, i32) {
    %c0_i32 = arith.constant 0 : i32
    %c0_i32_0 = arith.constant 0 : i32
    %c0_i32_1 = arith.constant 0 : i32
    return %c0_i32, %c0_i32_0 : i32, i32
  }
  func.func @transform_5(%arg0: i32) -> (i32, i32) {
    %c0_i32 = arith.constant 0 : i32
    %c0_i32_0 = arith.constant 0 : i32
    %c0_i32_1 = arith.constant 0 : i32
    return %c0_i32, %c0_i32_0 : i32, i32
  }
  func.func @transform_6(%arg0: i32) -> (i32, i32) {
    %c0_i32 = arith.constant 0 : i32
    %c0_i32_0 = arith.constant 0 : i32
    %c0_i32_1 = arith.constant 0 : i32
    return %c0_i32, %c0_i32_0 : i32, i32
  }
  func.func @transform_11(%arg0: i32) -> (i32, i32) {
    %c0_i32 = arith.constant 0 : i32
    %c0_i32_0 = arith.constant 0 : i32
    %c0_i32_1 = arith.constant 0 : i32
    return %c0_i32, %c0_i32_0 : i32, i32
  }
  func.func @transform_12(%arg0: i32) -> (i32, i32) {
    %c0_i32 = arith.constant 0 : i32
    %c0_i32_0 = arith.constant 0 : i32
    %c0_i32_1 = arith.constant 0 : i32
    return %c0_i32, %c0_i32_0 : i32, i32
  }
  func.func @transform_13(%arg0: i32) -> (i32, i32) {
    %c0_i32 = arith.constant 0 : i32
    %c0_i32_0 = arith.constant 0 : i32
    %c0_i32_1 = arith.constant 0 : i32
    return %c0_i32, %c0_i32_0 : i32, i32
  }
  func.func @transform_14(%arg0: i32) -> (i32, i32) {
    %c0_i32 = arith.constant 0 : i32
    %c0_i32_0 = arith.constant 0 : i32
    %c0_i32_1 = arith.constant 0 : i32
    return %c0_i32, %c0_i32_0 : i32, i32
  }
  func.func @transform_15(%arg0: i32) -> (i32, i32) {
    %c0_i32 = arith.constant 0 : i32
    %c0_i32_0 = arith.constant 0 : i32
    %c0_i32_1 = arith.constant 0 : i32
    return %c0_i32, %c0_i32_0 : i32, i32
  }
  func.func @transform_16(%arg0: i32) -> (i32, i32) {
    %c0_i32 = arith.constant 0 : i32
    %c0_i32_0 = arith.constant 0 : i32
    %c0_i32_1 = arith.constant 0 : i32
    return %c0_i32, %c0_i32_0 : i32, i32
  }
  func.func @transform_17(%arg0: i32) -> (i32, i32) {
    %c0_i32 = arith.constant 0 : i32
    %c0_i32_0 = arith.constant 0 : i32
    %c0_i32_1 = arith.constant 0 : i32
    return %c0_i32, %c0_i32_0 : i32, i32
  }
  func.func @transform_18(%arg0: i32) -> (i32, i32) {
    %c0_i32 = arith.constant 0 : i32
    %c0_i32_0 = arith.constant 0 : i32
    %c0_i32_1 = arith.constant 0 : i32
    return %c0_i32, %c0_i32_0 : i32, i32
  }
  func.func @transform_19(%arg0: i32) -> (i32, i32) {
    %c0_i32 = arith.constant 0 : i32
    %c0_i32_0 = arith.constant 0 : i32
    %c0_i32_1 = arith.constant 0 : i32
    return %c0_i32, %c0_i32_0 : i32, i32
  }
  func.func @transform_20(%arg0: i32) -> (i32, i32) {
    %c0_i32 = arith.constant 0 : i32
    %c0_i32_0 = arith.constant 0 : i32
    %c0_i32_1 = arith.constant 0 : i32
    return %c0_i32, %c0_i32_0 : i32, i32
  }
  func.func @transform_21(%arg0: i32) -> (i32, i32) {
    %c0_i32 = arith.constant 0 : i32
    %c0_i32_0 = arith.constant 0 : i32
    %c0_i32_1 = arith.constant 0 : i32
    return %c0_i32, %c0_i32_0 : i32, i32
  }
  func.func @transform_22(%arg0: i32) -> (i32, i32) {
    %c0_i32 = arith.constant 0 : i32
    %c0_i32_0 = arith.constant 0 : i32
    %c0_i32_1 = arith.constant 0 : i32
    return %c0_i32, %c0_i32_0 : i32, i32
  }
  func.func @transform_23(%arg0: i32) -> (i32, i32) {
    %c0_i32 = arith.constant 0 : i32
    %c0_i32_0 = arith.constant 0 : i32
    %c0_i32_1 = arith.constant 0 : i32
    return %c0_i32, %c0_i32_0 : i32, i32
  }
  func.func @transform_24(%arg0: i32) -> (i32, i32) {
    %c0_i32 = arith.constant 0 : i32
    %c0_i32_0 = arith.constant 0 : i32
    %c0_i32_1 = arith.constant 0 : i32
    return %c0_i32, %c0_i32_0 : i32, i32
  }
}

</mosaic_0001>

<bundles_post_ra>
// kernel: tpu_custom_call.1
= control target key start
LH: loop header
LB: loop body
LE: loop exit
PB: predicated region body
PF: predicated region fallthrough
CT: control target
= control target key end

     0   :  { %s4286_s0 = inlined_call_operand.hbm [shape: f32[16,896], index: 0, kind: input, shape index: {}]   ;;  %s4287_s1 = inlined_call_operand.hbm [shape: f32[16,896], index: 1, kind: input, shape index: {}]   ;;  %s4288_s2 = inlined_call_operand.hbm [shape: f32[16,1024], index: 2, kind: input, shape index: {}]   ;;  %s4289_s3 = inlined_call_operand.hbm [shape: f32[16,512], index: 3, kind: input, shape index: {}]   ;;  %s4290_s4 = inlined_call_operand.hbm [shape: f32[16,256], index: 4, kind: input, shape index: {}]   ;;  %s4291_s5 = inlined_call_operand.hbm [shape: f32[16,256], index: 5, kind: input, shape index: {}]   ;;  %s4292_s6 = inlined_call_operand.hbm [shape: f32[16,256], index: 6, kind: input, shape index: {}]   ;;  %s4293_s7 = inlined_call_operand.hbm [shape: s8[896,1024], index: 7, kind: input, shape index: {}]   ;;  %s4294_s8 = inlined_call_operand.hbm [shape: s8[1024,512], index: 8, kind: input, shape index: {}]   ;;  %s4295_s9 = inlined_call_operand.hbm [shape: s8[1024,256], index: 9, kind: input, shape index: {}]   ;;  %s4296_s10 = inlined_call_operand.hbm [shape: s8[256,128], index: 10, kind: input, shape index: {}]   ;;  %s4297_s11 = inlined_call_operand.vmem [shape: f32[1,1024], index: 11, kind: input, shape index: {}]   ;;  %s4298_s12 = inlined_call_operand.vmem [shape: f32[1,512], index: 12, kind: input, shape index: {}]   ;;  %s4299_s13 = inlined_call_operand.hbm [shape: f32[1,256], index: 13, kind: input, shape index: {}]   ;;  %s4300_s14 = inlined_call_operand.hbm [shape: f32[1,256], index: 14, kind: input, shape index: {}]   ;;  %s4301_s15 = inlined_call_operand.vmem [shape: f32[1,256], index: 15, kind: input, shape index: {}]   ;;  %s4302_s16 = inlined_call_operand.hbm [shape: f32[1,128], index: 16, kind: input, shape index: {}]   ;;  %s4303_s17 = inlined_call_operand.vmem [shape: f32[1,1024], index: 17, kind: input, shape index: {}]   ;;  %s4304_s18 = inlined_call_operand.vmem [shape: f32[1,512], index: 18, kind: input, shape index: {}]   ;;  %s4305_s19 = inlined_call_operand.vmem [shape: f32[1,256], index: 19, kind: input, shape index: {}]   ;;  %s4306_s20 = inlined_call_operand.vmem [shape: f32[1,256], index: 20, kind: input, shape index: {}]   ;;  %s4307_s21 = inlined_call_operand.vmem [shape: f32[1,256], index: 21, kind: input, shape index: {}]   ;;  %s4308_s22 = inlined_call_operand.vmem [shape: f32[1,128], index: 22, kind: input, shape index: {}]   ;;  %s4309_s23 = inlined_call_operand.hbm [shape: f32[16,256], index: 23, kind: output, shape index: {0}]   ;;  %s4310_s24 = inlined_call_operand.hbm [shape: f32[16,128], index: 24, kind: output, shape index: {1}]  }
   0x1   :  { %4313 = sst [smem:[#allocation49_spill]] %s4286_s0 }
   0x2   :  { %4314 = sst [smem:[#allocation50_spill]] %s4287_s1 }
   0x3   :  { %4315 = sst [smem:[#allocation51_spill]] %s4288_s2 }
   0x4   :  { %4316 = sst [smem:[#allocation52_spill]] %s4289_s3 }
   0x5   :  { %4317 = sst [smem:[#allocation53_spill]] %s4290_s4 }
   0x6   :  { %4318 = sst [smem:[#allocation54_spill]] %s4291_s5 }
   0x7   :  { %4319 = sst [smem:[#allocation55_spill]] %s4292_s6 }
   0x8   :  { %4320 = sst [smem:[#allocation56_spill]] %s4293_s7 }
   0x9   :  { %4321 = sst [smem:[#allocation57_spill]] %s4294_s8 }
   0xa   :  { %4322 = sst [smem:[#allocation58_spill]] %s4308_s22 }
   0xb   :  { %4323 = sst [smem:[#allocation59_spill]] %s4310_s24 }
   0xc   :  { %30 = vsyncpa [#allocation8], 0 }
   0xd   :  { %31 = vsyncpa [#allocation11], 0 }
   0xe   :  { %32 = vsyncpa [#allocation14], 0 }
   0xf   :  { %33 = vsyncpa [#allocation17], 0 }
  0x10   :  { %34 = vsyncpa [#allocation20], 0 }
  0x11   :  { %35 = vsyncpa [#allocation23], 0 }
  0x12   :  { %36 = vsyncpa [#allocation9], 0 }
  0x13   :  { %37 = vsyncpa [#allocation26], 0  ;;  %s3766_s5 = smov [#allocation10]   ;;  %s3767_s27 = smov [#allocation13]  }
  0x14   :  { %s55_s26 = sshll.u32 %s3766_s5, 4  ;;  %s79_s28 = sshll.u32 %s3767_s27, 4  ;;  %s56_s26 = int_to_ptr.vmem [resolvable:$true] %s55_s26  ;;  %s80_s28 = int_to_ptr.vmem [resolvable:$true] %s79_s28 }
  0x15   :  { %s3430_s6 = scalar_lea.vmem %s56_s26, 1792  ;;  %p3435_p1 = scmp.lt.s32.totalorder %s56_s26, %s56_s26 }
  0x16   :  { %p3431_p0 = scmp.ne.s32.totalorder %s56_s26, %s3430_s6  ;;  %p3436_p2 = scmp.lt.s32.totalorder %s3430_s6, %s3430_s6 }
  0x18   :  { %p3437_p3 = por %p3436_p2, %p3435_p1 }
  0x1a   :  { %p3438_p4 = pnand %p3437_p3, %p3431_p0 }
  0x1c   :  { %3441 = shalt.err (!%p3438_p4)
}
  0x1d   :  { %s3768_s2 = smov 896   ;;  %s3769_s29 = smov 56  }
  0x1e   :  { %s4324_s30 = sld [smem:[#allocation50_spill]]  ;;  %s3450_s3 = scalar_lea.vmem %s80_s28, 1024 }
  0x1f   :  { %p3451_p5 = scmp.ne.s32.totalorder %s80_s28, %s3450_s3  ;;  %p3455_p6 = scmp.lt.s32.totalorder %s80_s28, %s80_s28 }
  0x20   :  { %p3456_p7 = scmp.lt.s32.totalorder %s3450_s3, %s3450_s3 }
  0x22   :  { %p3457_p8 = por %p3456_p7, %p3455_p6 }
  0x24   :  { %61 = dma.hbm_to_vmem [thread:$0]  %s4324_s30, 1792, %s56_s26, [#allocation11], %s3768_s2, %s3768_s2, %s3769_s29  }
  0x25   :  { %p3458_p9 = pnand %p3457_p8, %p3451_p5 }
  0x27   :  { %3461 = shalt.err (!%p3458_p9)
}
  0x28   :  { %s3770_s25 = smov 512   ;;  %s3771_s8 = smov 32  }
  0x29   :  { %s4325_s5 = sld [smem:[#allocation52_spill]]  ;;  %s3772_s27 = smov [#allocation16]  }
  0x2a   :  { %s103_s6 = sshll.u32 %s3772_s27, 4  ;;  %s3773_s24 = smov [#allocation19]   ;;  %s104_s6 = int_to_ptr.vmem [resolvable:$true] %s103_s6 }
  0x2b   :  { %s132_s22 = sshll.u32 %s3773_s24, 4  ;;  %s3470_s26 = scalar_lea.vmem %s104_s6, 512  ;;  %s133_s22 = int_to_ptr.vmem [resolvable:$true] %s132_s22 }
  0x2c   :  { %p3471_p10 = scmp.ne.s32.totalorder %s104_s6, %s3470_s26  ;;  %p3475_p11 = scmp.lt.s32.totalorder %s104_s6, %s104_s6 }
  0x2d   :  { %p3476_p12 = scmp.lt.s32.totalorder %s3470_s26, %s3470_s26 }
  0x2f   :  { %85 = dma.hbm_to_vmem [thread:$0]  %s4325_s5, 1024, %s80_s28, [#allocation14], %s3770_s25, %s3770_s25, %s3771_s8  }
  0x30   :  { %p3477_p13 = por %p3476_p12, %p3475_p11 }
  0x32   :  { %p3478_p0 = pnand %p3477_p13, %p3471_p10 }
  0x34   :  { %3481 = shalt.err (!%p3478_p0)
}
  0x35   :  { %s4311_s0 = smov 256   ;;  %s3775_s7 = smov 16  }
  0x36   :  { %s4326_s3 = sld [smem:[#allocation54_spill]]  ;;  %s3490_s25 = scalar_lea.vmem %s133_s22, 32 }
  0x37   :  { %p3491_p1 = scmp.ne.s32.totalorder %s133_s22, %s3490_s25  ;;  %p3495_p2 = scmp.lt.s32.totalorder %s133_s22, %s133_s22 }
  0x38   :  { %p3496_p3 = scmp.lt.s32.totalorder %s3490_s25, %s3490_s25 }
  0x3a   :  { %p3497_p4 = por %p3496_p3, %p3495_p2 }
  0x3c   :  { %109 = dma.hbm_to_vmem [thread:$0]  %s4326_s3, 512, %s104_s6, [#allocation17], %s4311_s0, %s4311_s0, %s3775_s7  }
  0x3d   :  { %p3498_p5 = pnand %p3497_p4, %p3491_p1 }
  0x3f   :  { %3501 = shalt.err (!%p3498_p5)
}
  0x40   :  { %135 = dma.hbm_to_vmem [thread:$0]  %s4299_s13, 32, %s133_s22, [#allocation20]  }
  0x41   :  { %s3776_s4 = smov [#allocation7]   ;;  %s3777_s5 = smov [#allocation12]  }
  0x42   :  { %s43_s1 = sshll.u32 %s3776_s4, 4  ;;  %s67_s27 = sshll.u32 %s3777_s5, 4  ;;  %s44_s1 = int_to_ptr.vmem [resolvable:$true] %s43_s1  ;;  %s68_s27 = int_to_ptr.vmem [resolvable:$true] %s67_s27 }
  0x43   :  { %s3510_s26 = scalar_lea.vmem %s44_s1, 1792  ;;  %p3515_p7 = scmp.lt.s32.totalorder %s44_s1, %s44_s1 }
  0x44   :  { %p3511_p6 = scmp.ne.s32.totalorder %s44_s1, %s3510_s26  ;;  %p3516_p8 = scmp.lt.s32.totalorder %s3510_s26, %s3510_s26 }
  0x46   :  { %p3517_p9 = por %p3516_p8, %p3515_p7 }
  0x48   :  { %p3518_p10 = pnand %p3517_p9, %p3511_p6 }
  0x4a   :  { %3521 = shalt.err (!%p3518_p10)
}
  0x4b   :  { %s4327_s28 = sld [smem:[#allocation49_spill]]  ;;  %s3530_s13 = scalar_lea.vmem %s68_s27, 2048 }
  0x4c   :  { %p3531_p11 = scmp.ne.s32.totalorder %s68_s27, %s3530_s13  ;;  %p3535_p12 = scmp.lt.s32.totalorder %s68_s27, %s68_s27 }
  0x4d   :  { %p3536_p13 = scmp.lt.s32.totalorder %s3530_s13, %s3530_s13 }
  0x4f   :  { %p3537_p0 = por %p3536_p13, %p3535_p12 }
  0x51   :  { %49 = dma.hbm_to_vmem [thread:$0]  %s4327_s28, 1792, %s44_s1, [#allocation8], %s3768_s2, %s3768_s2, %s3769_s29  }
  0x52   :  { %p3538_p1 = pnand %p3537_p0, %p3531_p11 }
  0x54   :  { %3541 = shalt.err (!%p3538_p1)
}
  0x55   :  { %s3778_s22 = smov 1024   ;;  %s3779_s3 = smov 64  }
  0x56   :  { %s4328_s8 = sld [smem:[#allocation51_spill]]  ;;  %s3780_s4 = smov [#allocation15]  }
  0x57   :  { %s91_s5 = sshll.u32 %s3780_s4, 4  ;;  %s3781_s26 = smov [#allocation18]   ;;  %s92_s5 = int_to_ptr.vmem [resolvable:$true] %s91_s5 }
  0x58   :  { %s115_s0 = sshll.u32 %s3781_s26, 4  ;;  %s3550_s2 = scalar_lea.vmem %s92_s5, 512  ;;  %s116_s0 = int_to_ptr.vmem [resolvable:$true] %s115_s0 }
  0x59   :  { %p3551_p2 = scmp.ne.s32.totalorder %s92_s5, %s3550_s2  ;;  %p3555_p3 = scmp.lt.s32.totalorder %s92_s5, %s92_s5 }
  0x5a   :  { %p3556_p4 = scmp.lt.s32.totalorder %s3550_s2, %s3550_s2 }
  0x5c   :  { %73 = dma.hbm_to_vmem [thread:$0]  %s4328_s8, 2048, %s68_s27, [#allocation11], %s3778_s22, %s3778_s22, %s3779_s3  }
  0x5d   :  { %p3557_p5 = por %p3556_p4, %p3555_p3 }
  0x5f   :  { %p3558_p6 = pnand %p3557_p5, %p3551_p2 }
  0x61   :  { %3561 = shalt.err (!%p3558_p6)
}
  0x62   :  { %s4329_s29 = smov 256   ;;  %s4330_s30 = sld [smem:[#allocation53_spill]] }
  0x63   :  { %s3570_s27 = scalar_lea.vmem %s116_s0, 512  ;;  %p3575_p8 = scmp.lt.s32.totalorder %s116_s0, %s116_s0 }
  0x64   :  { %p3571_p7 = scmp.ne.s32.totalorder %s116_s0, %s3570_s27  ;;  %p3576_p9 = scmp.lt.s32.totalorder %s3570_s27, %s3570_s27 }
  0x66   :  { %p3577_p10 = por %p3576_p9, %p3575_p8 }
  0x68   :  { %97 = dma.hbm_to_vmem [thread:$0]  %s4330_s30, 512, %s92_s5, [#allocation14], %s4329_s29, %s4329_s29, %s3775_s7  }
  0x69   :  { %p3578_p11 = pnand %p3577_p10, %p3571_p7 }
  0x6b   :  { %3581 = shalt.err (!%p3578_p11)
}
  0x6c   :  { %s4331_s22 = sld [smem:[#allocation55_spill]]  ;;  %s3782_s3 = smov [#allocation21]  }
  0x6d   :  { %s142_s25 = sshll.u32 %s3782_s3, 4  ;;  %s3783_s24 = smov [#allocation22]   ;;  %s143_s25 = int_to_ptr.vmem [resolvable:$true] %s142_s25 }
  0x6e   :  { %s154_s8 = sshll.u32 %s3783_s24, 4  ;;  %s3590_s4 = scalar_lea.vmem %s143_s25, 32  ;;  %s155_s8 = int_to_ptr.vmem [resolvable:$true] %s154_s8 }
  0x6f   :  { %p3591_p12 = scmp.ne.s32.totalorder %s143_s25, %s3590_s4  ;;  %p3595_p13 = scmp.lt.s32.totalorder %s143_s25, %s143_s25 }
  0x70   :  { %p3596_p0 = scmp.lt.s32.totalorder %s3590_s4, %s3590_s4 }
  0x72   :  { %121 = dma.hbm_to_vmem [thread:$0]  %s4331_s22, 512, %s116_s0, [#allocation17], %s4329_s29, %s4329_s29, %s3775_s7  }
  0x73   :  { %p3597_p1 = por %p3596_p0, %p3595_p13 }
  0x75   :  { %p3598_p2 = pnand %p3597_p1, %p3591_p12 }
  0x77   :  { %3601 = shalt.err (!%p3598_p2)
}
  0x78   :  { %145 = dma.hbm_to_vmem [thread:$0]  %s4300_s14, 32, %s143_s25, [#allocation20]  }
  0x79   :  { %s3610_s2 = scalar_lea.vmem %s155_s8, 16  ;;  %s3614_s0 = scalar_lea.vmem %s155_s8, 32 }
  0x7a   :  { %p3611_p3 = scmp.ne.s32.totalorder %s155_s8, %s3610_s2  ;;  %p3615_p4 = scmp.lt.s32.totalorder %s155_s8, %s155_s8 }
  0x7b   :  { %p3616_p5 = scmp.lt.s32.totalorder %s3614_s0, %s3610_s2 }
  0x7d   :  { %p3617_p6 = por %p3616_p5, %p3615_p4 }
  0x7f   :  { %p3618_p7 = pnand %p3617_p6, %p3611_p3 }
  0x81   :  { %3621 = shalt.err (!%p3618_p7)
}
  0x82   :  { %157 = dma.hbm_to_vmem [thread:$0]  %s4302_s16, 16, %s155_s8, [#allocation23]  }
  0x83   :  { %3742 = dma.done.wait [#allocation8], 1792  }
  0x84   :  { %3743 = vsyncadd [#allocation8], 4294965504 }
  0x85   :  { %3744 = dma.done.wait [#allocation11], 3840  }
  0x86   :  { %3745 = vsyncadd [#allocation11], 4294963456 }
  0x87   :  { %3746 = dma.done.wait [#allocation14], 1536  }
  0x88   :  { %3747 = vsyncadd [#allocation14], 4294965760 }
  0x89   :  { %3748 = dma.done.wait [#allocation17], 1024  }
  0x8a   :  { %3749 = vsyncadd [#allocation17], 4294966272 }
  0x8b   :  { %3750 = dma.done.wait [#allocation20], 64  }
  0x8c   :  { %3751 = vsyncadd [#allocation20], 4294967232 }
  0x8d   :  { %3752 = dma.done.wait [#allocation23], 16  }
  0x8e   :  { %3753 = vsyncadd [#allocation23], 4294967280  ;;  %s3784_s14 = smov [#allocation2]   ;;  %s3785_s27 = smov [#allocation3]  }
  0x8f   :  { %s208_s30 = sshll.u32 %s3784_s14, 4  ;;  %s220_s28 = sshll.u32 %s3785_s27, 4  ;;  %s209_s30 = int_to_ptr.vmem [resolvable:$true] %s208_s30  ;;  %s221_s28 = int_to_ptr.vmem [resolvable:$true] %s220_s28 }
  0x90   :  { %s3630_s13 = scalar_lea.vmem %s209_s30, 28672  ;;  %p3635_p9 = scmp.lt.s32.totalorder %s209_s30, %s209_s30 }
  0x91   :  { %p3631_p8 = scmp.ne.s32.totalorder %s209_s30, %s3630_s13  ;;  %p3636_p10 = scmp.lt.s32.totalorder %s3630_s13, %s3630_s13 }
  0x93   :  { %p3637_p11 = por %p3636_p10, %p3635_p9 }
  0x95   :  { %p3638_p12 = pnand %p3637_p11, %p3631_p8 }
  0x97   :  { %3641 = shalt.err (!%p3638_p12)  }
  0x98   :  { %s4332_s3 = sld [smem:[#allocation56_spill]]  ;;  %s3650_s25 = scalar_lea.vmem %s221_s28, 16384 }
  0x99   :  { %p3651_p13 = scmp.ne.s32.totalorder %s221_s28, %s3650_s25  ;;  %p3655_p0 = scmp.lt.s32.totalorder %s221_s28, %s221_s28 }
  0x9a   :  { %p3656_p1 = scmp.lt.s32.totalorder %s3650_s25, %s3650_s25 }
  0x9c   :  { %p3657_p2 = por %p3656_p1, %p3655_p0 }
  0x9e   :  { %211 = dma.hbm_to_vmem [thread:$0]  %s4332_s3, 28672, %s209_s30, [#allocation6] }
  0x9f   :  { %p3658_p3 = pnand %p3657_p2, %p3651_p13 }
  0xa1   :  { %3661 = shalt.err (!%p3658_p3)  }
  0xa2   :  { %s4333_s4 = sld [smem:[#allocation57_spill]]  ;;  %s3786_s5 = smov [#allocation4]  }
  0xa3   :  { %s232_s26 = sshll.u32 %s3786_s5, 4  ;;  %s3787_s2 = smov [#allocation5]   ;;  %s233_s26 = int_to_ptr.vmem [resolvable:$true] %s232_s26 }
  0xa4   :  { %s244_s0 = sshll.u32 %s3787_s2, 4  ;;  %s3670_s1 = scalar_lea.vmem %s233_s26, 8192  ;;  %s245_s0 = int_to_ptr.vmem [resolvable:$true] %s244_s0 }
  0xa5   :  { %p3671_p4 = scmp.ne.s32.totalorder %s233_s26, %s3670_s1  ;;  %p3675_p5 = scmp.lt.s32.totalorder %s233_s26, %s233_s26 }
  0xa6   :  { %p3676_p6 = scmp.lt.s32.totalorder %s3670_s1, %s3670_s1 }
  0xa8   :  { %223 = dma.hbm_to_vmem [thread:$0]  %s4333_s4, 16384, %s221_s28, [#allocation6 + $0x1] }
  0xa9   :  { %p3677_p7 = por %p3676_p6, %p3675_p5 }
  0xab   :  { %p3678_p8 = pnand %p3677_p7, %p3671_p4 }
  0xad   :  { %3681 = shalt.err (!%p3678_p8)  }
  0xae   :  { %235 = dma.hbm_to_vmem [thread:$0]  %s4295_s9, 8192, %s233_s26, [#allocation6 + $0x2] }
  0xaf   :  { %s3690_s30 = scalar_lea.vmem %s245_s0, 1024  ;;  %p3695_p10 = scmp.lt.s32.totalorder %s245_s0, %s245_s0 }
  0xb0   :  { %p3691_p9 = scmp.ne.s32.totalorder %s245_s0, %s3690_s30  ;;  %p3696_p11 = scmp.lt.s32.totalorder %s3690_s30, %s3690_s30 }
  0xb2   :  { %p3697_p12 = por %p3696_p11, %p3695_p10 }
  0xb4   :  { %p3698_p13 = pnand %p3697_p12, %p3691_p9 }
  0xb6   :  { %3701 = shalt.err (!%p3698_p13)  }
  0xb7   :  { %247 = dma.hbm_to_vmem [thread:$0]  %s4296_s10, 1024, %s245_s0, [#allocation6 + $0x3]  ;;  %v248_v0 = vld [vmem:[#allocation7] sm:$0xff]  ;;  %v249_v1 = vld [vmem:[#allocation7 + $0x8] sm:$0xff]  ;;  %v250_v2 = vld [vmem:[#allocation7 + $0x10] sm:$0xff] }
  0xb8   :  { %v262_v3 = vld [vmem:[#allocation10] sm:$0xff]  ;;  %v251_v4 = vld [vmem:[#allocation7 + $0x18] sm:$0xff]  ;;  %v264_v6 = vld [vmem:[#allocation10 + $0x10] sm:$0xff] }
  0xb9   :  { %v263_v5 = vld [vmem:[#allocation10 + $0x8] sm:$0xff]  ;;  %v265_v7 = vld [vmem:[#allocation10 + $0x18] sm:$0xff]  ;;  %v276_v8 = vmul.f32 0.3, %v262_v3  ;;  %v252_v9 = vld [vmem:[#allocation7 + $0x20] sm:$0xff] }
  0xba   :  { %v266_v10 = vld [vmem:[#allocation10 + $0x20] sm:$0xff]  ;;  %v267_v11 = vld [vmem:[#allocation10 + $0x28] sm:$0xff]  ;;  %v277_v12 = vmul.f32 0.3, %v263_v5  ;;  %v253_v13 = vld [vmem:[#allocation7 + $0x28] sm:$0xff] }
  0xbb   :  { %v254_v14 = vld [vmem:[#allocation7 + $0x30] sm:$0xff]  ;;  %v268_v15 = vld [vmem:[#allocation10 + $0x30] sm:$0xff]  ;;  %v269_v16 = vld [vmem:[#allocation10 + $0x38] sm:$0xff]  ;;  %v278_v18 = vmul.f32 0.3, %v264_v6  ;;  %v3975_v19 = vadd.f32 %v276_v8, %v248_v0 }
  0xbc   :  { %v270_v17 = vld [vmem:[#allocation10 + $0x40] sm:$0xff]  ;;  %v255_v20 = vld [vmem:[#allocation7 + $0x38] sm:$0xff]  ;;  %v256_v21 = vld [vmem:[#allocation7 + $0x40] sm:$0xff]  ;;  %v279_v27 = vmul.f32 0.3, %v265_v7  ;;  %v291_v28 = vadd.f32 %v277_v12, %v249_v1 }
  0xbd   :  { %v257_v22 = vld [vmem:[#allocation7 + $0x48] sm:$0xff]  ;;  %v258_v23 = vld [vmem:[#allocation7 + $0x50] sm:$0xff]  ;;  %v271_v24 = vld [vmem:[#allocation10 + $0x48] sm:$0xff]  ;;  %v280_v34 = vmul.f32 0.3, %v266_v10  ;;  %v3977_v36 = vadd.f32 %v278_v18, %v250_v2 }
  0xbe   :  { %v272_v25 = vld [vmem:[#allocation10 + $0x50] sm:$0xff]  ;;  %v273_v26 = vld [vmem:[#allocation10 + $0x58] sm:$0xff]  ;;  %v259_v29 = vld [vmem:[#allocation7 + $0x58] sm:$0xff]  ;;  %v281_v35 = vmul.f32 0.3, %v267_v11  ;;  %v293_v40 = vadd.f32 %v279_v27, %v251_v4 }
  0xbf   :  { %v260_v30 = vld [vmem:[#allocation7 + $0x60] sm:$0xff]  ;;  %v261_v31 = vld [vmem:[#allocation7 + $0x68] sm:$0xff]  ;;  %v274_v32 = vld [vmem:[#allocation10 + $0x60] sm:$0xff]  ;;  %v282_v37 = vmul.f32 0.3, %v268_v15  ;;  %v3979_v44 = vadd.f32 %v280_v34, %v252_v9 }
  0xc0   :  { %v275_v33 = vld [vmem:[#allocation10 + $0x68] sm:$0xff]  ;;  %v283_v38 = vmul.f32 0.3, %v269_v16  ;;  %v284_v39 = vmul.f32 0.3, %v270_v17  ;;  %v3981_v47 = vadd.f32 %v281_v35, %v253_v13 }
  0xc1   :  { %v285_v41 = vmul.f32 0.3, %v271_v24  ;;  %v286_v42 = vmul.f32 0.3, %v272_v25  ;;  %v287_v43 = vmul.f32 0.3, %v273_v26  ;;  %v3983_v48 = vadd.f32 %v282_v37, %v254_v14 }
  0xc2   :  { %v288_v45 = vmul.f32 0.3, %v274_v32  ;;  %v289_v46 = vmul.f32 0.3, %v275_v33  ;;  %v3985_v49 = vadd.f32 %v283_v38, %v255_v20  ;;  %v298_v50 = vadd.f32 %v284_v39, %v256_v21 }
  0xc3   :  { %v3987_v51 = vadd.f32 %v285_v41, %v257_v22  ;;  %v300_v52 = vadd.f32 %v286_v42, %v258_v23  ;;  %v3989_v53 = vadd.f32 %v287_v43, %v259_v29 }
  0xc4   :  { %v3991_v54 = vadd.f32 %v288_v45, %v260_v30  ;;  %v3993_v55 = vadd.f32 %v289_v46, %v261_v31 }
  0xc5   :  { %3754 = dma.done.wait [#allocation6], 28672 }
  0xc6   :  { %3755 = vsyncadd [#allocation6], 4294938624  ;;  %v3995_v56 = vpack.c.bf16 %v298_v50, %v291_v28  ;;  %v3997_v57 = vpack.c.bf16 %v300_v52, %v293_v40  ;;  %v333_v58 = vld [vmem:[#allocation2 + $0xc8] sm:$0xff]  ;;  %v332_v60 = vld [vmem:[#allocation2 + $0xc0] sm:$0xff] }
  0xc7   :  { %v397_v59 = vld [vmem:[#allocation2 + $0x2c8] sm:$0xff]  ;;  %v588_v61 = vunpack.c.l.s8.bf16 %v333_v58  ;;  %v596_v62 = vunpack.c.h.s8.bf16 %v333_v58  ;;  %v396_v1 = vld [vmem:[#allocation2 + $0x2c0] sm:$0xff]  ;;  %v595_v2 = vunpack.c.h.s8.bf16 %v332_v60  ;;  %v587_v6 = vunpack.c.l.s8.bf16 %v332_v60 }
  0xc8   :  { %1019 = vmatprep.mubr.bf16.mxu0 %v3995_v56  ;;  %1062 = vmatprep.mubr.bf16.mxu1 %v3997_v57  ;;  %v716_v63 = vunpack.c.l.s8.bf16 %v397_v59  ;;  %v724_v0 = vunpack.c.h.s8.bf16 %v397_v59  ;;  %v723_v3 = vunpack.c.h.s8.bf16 %v396_v1  ;;  %v325_v4 = vld [vmem:[#allocation2 + $0x88] sm:$0xff]  ;;  %v715_v7 = vunpack.c.l.s8.bf16 %v396_v1  ;;  %v324_v10 = vld [vmem:[#allocation2 + $0x80] sm:$0xff] }
  0xc9   :  { %v389_v5 = vld [vmem:[#allocation2 + $0x288] sm:$0xff]  ;;  %987 = vmatprep.subr.bf16.mxu0 %v596_v62  ;;  %v580_v8 = vunpack.c.h.s8.bf16 %v325_v4  ;;  %v388_v11 = vld [vmem:[#allocation2 + $0x280] sm:$0xff]  ;;  %v579_v12 = vunpack.c.h.s8.bf16 %v324_v10  ;;  %v572_v14 = vunpack.c.l.s8.bf16 %v325_v4  ;;  %v571_v18 = vunpack.c.l.s8.bf16 %v324_v10 }
  0xca   :  { %1030 = vmatprep.subr.bf16.mxu1 %v724_v0  ;;  %988 = vmatpush1.bf16.msra.mxu0 %v595_v2  ;;  %v708_v9 = vunpack.c.h.s8.bf16 %v389_v5  ;;  %v707_v13 = vunpack.c.h.s8.bf16 %v388_v11  ;;  %v700_v15 = vunpack.c.l.s8.bf16 %v389_v5  ;;  %v317_v16 = vld [vmem:[#allocation2 + $0x48] sm:$0xff]  ;;  %v699_v20 = vunpack.c.l.s8.bf16 %v388_v11  ;;  %v316_v23 = vld [vmem:[#allocation2 + $0x40] sm:$0xff] }
  0xcb   :  { %1031 = vmatpush1.bf16.msra.mxu1 %v723_v3  ;;  %989 = vmatprep.subr.bf16.mxu0 %v588_v61  ;;  %v381_v17 = vld [vmem:[#allocation2 + $0x248] sm:$0xff]  ;;  %v564_v21 = vunpack.c.h.s8.bf16 %v317_v16  ;;  %v380_v24 = vld [vmem:[#allocation2 + $0x240] sm:$0xff]  ;;  %v563_v25 = vunpack.c.h.s8.bf16 %v316_v23  ;;  %v556_v27 = vunpack.c.l.s8.bf16 %v317_v16  ;;  %v555_v31 = vunpack.c.l.s8.bf16 %v316_v23 }
  0xcc   :  { %1032 = vmatprep.subr.bf16.mxu1 %v716_v63  ;;  %v692_v22 = vunpack.c.h.s8.bf16 %v381_v17  ;;  %v691_v26 = vunpack.c.h.s8.bf16 %v380_v24  ;;  %v684_v28 = vunpack.c.l.s8.bf16 %v381_v17  ;;  %v309_v29 = vld [vmem:[#allocation2 + $0x8] sm:$0xff]  ;;  %v683_v32 = vunpack.c.l.s8.bf16 %v380_v24  ;;  %v308_v35 = vld [vmem:[#allocation2] sm:$0xff] }
  0xcd   :  { %v373_v30 = vld [vmem:[#allocation2 + $0x208] sm:$0xff]  ;;  %v548_v33 = vunpack.c.h.s8.bf16 %v309_v29  ;;  %v372_v37 = vld [vmem:[#allocation2 + $0x200] sm:$0xff]  ;;  %v547_v38 = vunpack.c.h.s8.bf16 %v308_v35  ;;  %v540_v40 = vunpack.c.l.s8.bf16 %v309_v29  ;;  %v539_v45 = vunpack.c.l.s8.bf16 %v308_v35 }
  0xce   :  { %990 = vmatpush1.bf16.msra.mxu0 %v587_v6  ;;  %v676_v34 = vunpack.c.h.s8.bf16 %v373_v30  ;;  %v675_v39 = vunpack.c.h.s8.bf16 %v372_v37  ;;  %v668_v41 = vunpack.c.l.s8.bf16 %v373_v30  ;;  %v365_v42 = vld [vmem:[#allocation2 + $0x1c8] sm:$0xff]  ;;  %v667_v46 = vunpack.c.l.s8.bf16 %v372_v37  ;;  %v364_v58 = vld [vmem:[#allocation2 + $0x1c0] sm:$0xff] }
  0xcf   :  { %1033 = vmatpush1.bf16.msra.mxu1 %v715_v7  ;;  %991 = vmatprep.subr.bf16.mxu0 %v580_v8  ;;  %v429_v43 = vld [vmem:[#allocation2 + $0x3c8] sm:$0xff]  ;;  %v660_v50 = vunpack.c.h.s8.bf16 %v365_v42  ;;  %v428_v59 = vld [vmem:[#allocation2 + $0x3c0] sm:$0xff]  ;;  %v659_v60 = vunpack.c.h.s8.bf16 %v364_v58  ;;  %v652_v62 = vunpack.c.l.s8.bf16 %v365_v42  ;;  %v651_v2 = vunpack.c.l.s8.bf16 %v364_v58 }
  0xd0   :  { %1034 = vmatprep.subr.bf16.mxu1 %v708_v9  ;;  %v788_v52 = vunpack.c.h.s8.bf16 %v429_v43  ;;  %v787_v61 = vunpack.c.h.s8.bf16 %v428_v59  ;;  %v780_v63 = vunpack.c.l.s8.bf16 %v429_v43  ;;  %v357_v0 = vld [vmem:[#allocation2 + $0x188] sm:$0xff]  ;;  %v779_v3 = vunpack.c.l.s8.bf16 %v428_v59  ;;  %v356_v6 = vld [vmem:[#allocation2 + $0x180] sm:$0xff] }
  0xd1   :  { %v421_v1 = vld [vmem:[#allocation2 + $0x388] sm:$0xff]  ;;  %v644_v4 = vunpack.c.h.s8.bf16 %v357_v0  ;;  %v420_v7 = vld [vmem:[#allocation2 + $0x380] sm:$0xff]  ;;  %v643_v8 = vunpack.c.h.s8.bf16 %v356_v6  ;;  %v636_v10 = vunpack.c.l.s8.bf16 %v357_v0  ;;  %v4011_v0 = vpack.c.bf16 %v3991_v54, %v3981_v47 }
  0xd2   :  { %992 = vmatpush1.bf16.msra.mxu0 %v579_v12  ;;  %v772_v5 = vunpack.c.h.s8.bf16 %v421_v1  ;;  %v771_v9 = vunpack.c.h.s8.bf16 %v420_v7  ;;  %v764_v11 = vunpack.c.l.s8.bf16 %v421_v1  ;;  %v349_v12 = vld [vmem:[#allocation2 + $0x148] sm:$0xff]  ;;  %v452_v1 = vld [vmem:[#allocation2 + $0x480] sm:$0xff] }
  0xd3   :  { %1035 = vmatpush1.bf16.msra.mxu1 %v707_v13  ;;  %993 = vmatprep.subr.bf16.mxu0 %v572_v14  ;;  %v413_v13 = vld [vmem:[#allocation2 + $0x348] sm:$0xff]  ;;  %v635_v14 = vunpack.c.l.s8.bf16 %v356_v6  ;;  %v628_v16 = vunpack.c.h.s8.bf16 %v349_v12  ;;  %v620_v23 = vunpack.c.l.s8.bf16 %v349_v12  ;;  %v835_v47 = vunpack.c.h.s8.bf16 %v452_v1  ;;  %v444_v12 = vld [vmem:[#allocation2 + $0x440] sm:$0xff] }
  0xd4   :  { %1036 = vmatprep.subr.bf16.mxu1 %v700_v15  ;;  %v763_v15 = vunpack.c.l.s8.bf16 %v420_v7  ;;  %v756_v17 = vunpack.c.h.s8.bf16 %v413_v13  ;;  %v748_v24 = vunpack.c.l.s8.bf16 %v413_v13  ;;  %v445_v6 = vld [vmem:[#allocation2 + $0x448] sm:$0xff]  ;;  %v508_v13 = vld [vmem:[#allocation2 + $0x640] sm:$0xff] }
  0xd5   :  { %v509_v7 = vld [vmem:[#allocation2 + $0x648] sm:$0xff] }
  0xd6   :  { %994 = vmatpush1.bf16.msra.mxu0 %v571_v18  ;;  %v348_v18 = vld [vmem:[#allocation2 + $0x140] sm:$0xff] }
  0xd7   :  { %1037 = vmatpush1.bf16.msra.mxu1 %v699_v20  ;;  %995 = vmatprep.subr.bf16.mxu0 %v564_v21  ;;  %v412_v20 = vld [vmem:[#allocation2 + $0x340] sm:$0xff]  ;;  %v627_v21 = vunpack.c.h.s8.bf16 %v348_v18 }
  0xd8   :  { %1038 = vmatprep.subr.bf16.mxu1 %v692_v22  ;;  %v755_v22 = vunpack.c.h.s8.bf16 %v412_v20 }
  0xda   :  { %996 = vmatpush1.bf16.msra.mxu0 %v563_v25  ;;  %v341_v25 = vld [vmem:[#allocation2 + $0x108] sm:$0xff] }
  0xdb   :  { %1039 = vmatpush1.bf16.msra.mxu1 %v691_v26  ;;  %997 = vmatprep.subr.bf16.mxu0 %v556_v27  ;;  %v405_v26 = vld [vmem:[#allocation2 + $0x308] sm:$0xff]  ;;  %v619_v27 = vunpack.c.l.s8.bf16 %v348_v18  ;;  %v612_v29 = vunpack.c.h.s8.bf16 %v341_v25  ;;  %v604_v35 = vunpack.c.l.s8.bf16 %v341_v25  ;;  %v436_v25 = vld [vmem:[#allocation2 + $0x400] sm:$0xff] }
  0xdc   :  { %1040 = vmatprep.subr.bf16.mxu1 %v684_v28  ;;  %v747_v28 = vunpack.c.l.s8.bf16 %v412_v20  ;;  %v740_v30 = vunpack.c.h.s8.bf16 %v405_v26  ;;  %v732_v37 = vunpack.c.l.s8.bf16 %v405_v26  ;;  %v437_v18 = vld [vmem:[#allocation2 + $0x408] sm:$0xff]  ;;  %v500_v26 = vld [vmem:[#allocation2 + $0x600] sm:$0xff] }
  0xdd   :  { %v501_v20 = vld [vmem:[#allocation2 + $0x608] sm:$0xff] }
  0xde   :  { %998 = vmatpush1.bf16.msra.mxu0 %v555_v31  ;;  %v340_v31 = vld [vmem:[#allocation2 + $0x100] sm:$0xff] }
  0xdf   :  { %1041 = vmatpush1.bf16.msra.mxu1 %v683_v32  ;;  %999 = vmatprep.subr.bf16.mxu0 %v548_v33  ;;  %v404_v32 = vld [vmem:[#allocation2 + $0x300] sm:$0xff]  ;;  %v611_v33 = vunpack.c.h.s8.bf16 %v340_v31 }
  0xe0   :  { %1042 = vmatprep.subr.bf16.mxu1 %v676_v34  ;;  %v739_v34 = vunpack.c.h.s8.bf16 %v404_v32 }
  0xe2   :  { %1000 = vmatpush1.bf16.msra.mxu0 %v547_v38  ;;  %v461_v38 = vld [vmem:[#allocation2 + $0x4c8] sm:$0xff] }
  0xe3   :  { %1043 = vmatpush1.bf16.msra.mxu1 %v675_v39  ;;  %1001 = vmatprep.subr.bf16.mxu0 %v540_v40  ;;  %v525_v39 = vld [vmem:[#allocation2 + $0x6c8] sm:$0xff]  ;;  %v603_v40 = vunpack.c.l.s8.bf16 %v340_v31  ;;  %v852_v42 = vunpack.c.h.s8.bf16 %v461_v38 }
  0xe4   :  { %1044 = vmatprep.subr.bf16.mxu1 %v668_v41  ;;  %v731_v41 = vunpack.c.l.s8.bf16 %v404_v32  ;;  %v980_v43 = vunpack.c.h.s8.bf16 %v525_v39  ;;  %v493_v31 = vld [vmem:[#allocation2 + $0x5c8] sm:$0xff]  ;;  %v335_v32 = vld [vmem:[#allocation2 + $0xd8] sm:$0xff] }
  0xe6   :  { %1002 = vmatpush1.bf16.msra.mxu0 %v539_v45  ;;  %v460_v45 = vld [vmem:[#allocation2 + $0x4c0] sm:$0xff] }
  0xe7   :  { %1045 = vmatpush1.bf16.msra.mxu1 %v667_v46  ;;  %1003 = vmatprep.subr.bf16.mxu0 %v660_v50  ;;  %v524_v46 = vld [vmem:[#allocation2 + $0x6c0] sm:$0xff]  ;;  %v4003_v50 = vpack.c.bf16 %v3985_v49, %v3975_v19  ;;  %v851_v58 = vunpack.c.h.s8.bf16 %v460_v45  ;;  %v843_v19 = vunpack.c.l.s8.bf16 %v460_v45  ;;  %v590_v45 = vunpack.c.l.s8.bf16 %v335_v32 }
  0xe8   :  { %1046 = vmatprep.subr.bf16.mxu1 %v788_v52  ;;  %v4007_v52 = vpack.c.bf16 %v3987_v51, %v3977_v36  ;;  %v979_v59 = vunpack.c.h.s8.bf16 %v524_v46  ;;  %v971_v36 = vunpack.c.l.s8.bf16 %v524_v46  ;;  %v485_v46 = vld [vmem:[#allocation2 + $0x588] sm:$0xff] }
  0xea   :  { %1004 = vmatpush2.bf16.msra.mxu0 %v659_v60  ;;  %v844_v60 = vunpack.c.l.s8.bf16 %v461_v38  ;;  %v492_v38 = vld [vmem:[#allocation2 + $0x5c0] sm:$0xff] }
  0xeb   :  { %1047 = vmatpush2.bf16.msra.mxu1 %v787_v61  ;;  %1005 = vmatprep.subr.bf16.mxu0 %v652_v62  ;;  %v972_v61 = vunpack.c.l.s8.bf16 %v525_v39  ;;  %v453_v62 = vld [vmem:[#allocation2 + $0x488] sm:$0xff]  ;;  %v334_v39 = vld [vmem:[#allocation2 + $0xd0] sm:$0xff] }
  0xec   :  { %1048 = vmatprep.subr.bf16.mxu1 %v780_v63  ;;  %v517_v63 = vld [vmem:[#allocation2 + $0x688] sm:$0xff]  ;;  %v836_v49 = vunpack.c.h.s8.bf16 %v453_v62 }
  0xed   :  { %v964_v51 = vunpack.c.h.s8.bf16 %v517_v63 }
  0xee   :  { %1006 = vmatpush2.bf16.msra.mxu0 %v651_v2  ;;  %v516_v2 = vld [vmem:[#allocation2 + $0x680] sm:$0xff] }
  0xef   :  { %1049 = vmatpush2.bf16.msra.mxu1 %v779_v3  ;;  %1007 = vmatprep.subr.bf16.mxu0 %v644_v4  ;;  %v3788_v3 = vmov 0   ;;  %v963_v54 = vunpack.c.h.s8.bf16 %v516_v2  ;;  %v828_v4 = vunpack.c.l.s8.bf16 %v453_v62  ;;  %v326_v62 = vld [vmem:[#allocation2 + $0x90] sm:$0xff] }
  0xf0   :  { %1050 = vmatprep.subr.bf16.mxu1 %v772_v5  ;;  %v956_v5 = vunpack.c.l.s8.bf16 %v517_v63 }
  0xf2   :  { %1008 = vmatpush2.bf16.msra.mxu0 %v643_v8  ;;  %v827_v8 = vunpack.c.l.s8.bf16 %v452_v1  ;;  %v319_v1 = vld [vmem:[#allocation2 + $0x58] sm:$0xff] }
  0xf3   :  { %1051 = vmatpush2.bf16.msra.mxu1 %v771_v9  ;;  %1009 = vmatprep.subr.bf16.mxu0 %v636_v10  ;;  %v955_v9 = vunpack.c.l.s8.bf16 %v516_v2  ;;  %v820_v10 = vunpack.c.h.s8.bf16 %v445_v6 }
  0xf4   :  { %1052 = vmatprep.subr.bf16.mxu1 %v764_v11  ;;  %v948_v11 = vunpack.c.h.s8.bf16 %v509_v7 }
  0xf6   :  { %1010 = vmatpush2.bf16.msra.mxu0 %v635_v14  ;;  %v819_v14 = vunpack.c.h.s8.bf16 %v444_v12 }
  0xf7   :  { %1053 = vmatpush2.bf16.msra.mxu1 %v763_v15  ;;  %1011 = vmatprep.subr.bf16.mxu0 %v628_v16  ;;  %v947_v15 = vunpack.c.h.s8.bf16 %v508_v13  ;;  %v812_v16 = vunpack.c.l.s8.bf16 %v445_v6  ;;  %v318_v6 = vld [vmem:[#allocation2 + $0x50] sm:$0xff] }
  0xf8   :  { %1054 = vmatprep.subr.bf16.mxu1 %v756_v17  ;;  %v940_v17 = vunpack.c.l.s8.bf16 %v509_v7 }
  0xfa   :  { %1012 = vmatpush2.bf16.msra.mxu0 %v627_v21  ;;  %v811_v21 = vunpack.c.l.s8.bf16 %v444_v12  ;;  %v311_v12 = vld [vmem:[#allocation2 + $0x18] sm:$0xff] }
  0xfb   :  { %1055 = vmatpush2.bf16.msra.mxu1 %v755_v22  ;;  %1013 = vmatprep.subr.bf16.mxu0 %v620_v23  ;;  %v939_v22 = vunpack.c.l.s8.bf16 %v508_v13  ;;  %v804_v23 = vunpack.c.h.s8.bf16 %v437_v18 }
  0xfc   :  { %1056 = vmatprep.subr.bf16.mxu1 %v748_v24  ;;  %v932_v24 = vunpack.c.h.s8.bf16 %v501_v20 }
  0xfe   :  { %1014 = vmatpush2.bf16.msra.mxu0 %v619_v27  ;;  %v803_v27 = vunpack.c.h.s8.bf16 %v436_v25 }
  0xff   :  { %1057 = vmatpush2.bf16.msra.mxu1 %v747_v28  ;;  %1015 = vmatprep.subr.bf16.mxu0 %v612_v29  ;;  %v931_v28 = vunpack.c.h.s8.bf16 %v500_v26  ;;  %v796_v29 = vunpack.c.l.s8.bf16 %v437_v18  ;;  %v310_v18 = vld [vmem:[#allocation2 + $0x10] sm:$0xff] }
 0x100   :  { %1058 = vmatprep.subr.bf16.mxu1 %v740_v30  ;;  %v924_v30 = vunpack.c.l.s8.bf16 %v501_v20 }
 0x102   :  { %1016 = vmatpush2.bf16.msra.mxu0 %v611_v33  ;;  %v795_v33 = vunpack.c.l.s8.bf16 %v436_v25  ;;  %v399_v25 = vld [vmem:[#allocation2 + $0x2d8] sm:$0xff] }
 0x103   :  { %1059 = vmatpush2.bf16.msra.mxu1 %v739_v34  ;;  %1017 = vmatprep.subr.bf16.mxu0 %v604_v35  ;;  %v923_v34 = vunpack.c.l.s8.bf16 %v500_v26  ;;  %v916_v35 = vunpack.c.h.s8.bf16 %v493_v31 }
 0x104   :  { %1060 = vmatprep.subr.bf16.mxu1 %v732_v37  ;;  %v598_v37 = vunpack.c.h.s8.bf16 %v335_v32  ;;  %v4025_v32 = vpack.c.bf16 %v3989_v53, %v3979_v44 }
 0x106   :  { %1018 = vmatpush2.bf16.msra.mxu0 %v603_v40  ;;  %v4019_v40 = vpack.c.bf16 %v3993_v55, %v3983_v48  ;;  %v900_v48 = vunpack.c.h.s8.bf16 %v485_v46 }
 0x107   :  { %1061 = vmatpush2.bf16.msra.mxu1 %v731_v41  ;;  %1073 = vmatprep.subr.bf16.mxu0 %v852_v42  ;;  %v915_v41 = vunpack.c.h.s8.bf16 %v492_v38  ;;  %v597_v42 = vunpack.c.h.s8.bf16 %v334_v39 }
 0x108   :  { %1116 = vmatprep.subr.bf16.mxu1 %v980_v43  ;;  %v908_v43 = vunpack.c.l.s8.bf16 %v493_v31  ;;  %v398_v31 = vld [vmem:[#allocation2 + $0x2d0] sm:$0xff] }
 0x109   :  { %1020 = vmatmul.mubr.bf16.vlgmr.msra.gmra.mxu0 %v4003_v50 }
 0x10a   :  { %1063 = vmatmul.mubr.bf16.vlgmr.msra.gmra.mxu1 %v4007_v52  ;;  %1074 = vmatpush1.bf16.msra.mxu0 %v851_v58  ;;  %v327_v58 = vld [vmem:[#allocation2 + $0x98] sm:$0xff] }
 0x10b   :  { %1117 = vmatpush1.bf16.msra.mxu1 %v979_v59  ;;  %1075 = vmatprep.subr.bf16.mxu0 %v844_v60  ;;  %v907_v59 = vunpack.c.l.s8.bf16 %v492_v38  ;;  %v589_v60 = vunpack.c.l.s8.bf16 %v334_v39  ;;  %v582_v55 = vunpack.c.h.s8.bf16 %v327_v58  ;;  %v359_v38 = vld [vmem:[#allocation2 + $0x198] sm:$0xff] }
 0x10c   :  { %1118 = vmatprep.subr.bf16.mxu1 %v972_v61  ;;  %1148 = vmatprep.mubr.bf16.mxu1 %v3788_v3  ;;  %v484_v61 = vld [vmem:[#allocation2 + $0x580] sm:$0xff]  ;;  %v391_v39 = vld [vmem:[#allocation2 + $0x298] sm:$0xff]  ;;  %v646_v44 = vunpack.c.h.s8.bf16 %v359_v38 }
 0x10d   :  { %1105 = vmatprep.mubr.bf16.mxu0 %v4011_v0  ;;  %v899_v63 = vunpack.c.h.s8.bf16 %v484_v61  ;;  %v891_v2 = vunpack.c.l.s8.bf16 %v484_v61  ;;  %v710_v53 = vunpack.c.h.s8.bf16 %v391_v39 }
 0x10e   :  { %1076 = vmatpush1.bf16.msra.mxu0 %v843_v19  ;;  %v581_v19 = vunpack.c.h.s8.bf16 %v326_v62 }
 0x10f   :  { %1119 = vmatpush1.bf16.msra.mxu1 %v971_v36  ;;  %1077 = vmatprep.subr.bf16.mxu0 %v836_v49  ;;  %v892_v36 = vunpack.c.l.s8.bf16 %v485_v46  ;;  %v574_v49 = vunpack.c.l.s8.bf16 %v327_v58 }
 0x110   :  { %1120 = vmatprep.subr.bf16.mxu1 %v964_v51  ;;  %v477_v51 = vld [vmem:[#allocation2 + $0x548] sm:$0xff] }
 0x112   :  { %1078 = vmatpush1.bf16.msra.mxu0 %v835_v47  ;;  %v573_v47 = vunpack.c.l.s8.bf16 %v326_v62 }
 0x113   :  { %1121 = vmatpush1.bf16.msra.mxu1 %v963_v54  ;;  %1079 = vmatprep.subr.bf16.mxu0 %v828_v4  ;;  %v884_v54 = vunpack.c.h.s8.bf16 %v477_v51  ;;  %v566_v4 = vunpack.c.h.s8.bf16 %v319_v1 }
 0x114   :  { %1122 = vmatprep.subr.bf16.mxu1 %v956_v5  ;;  %v476_v5 = vld [vmem:[#allocation2 + $0x540] sm:$0xff] }
 0x115   :  { %v883_v7 = vunpack.c.h.s8.bf16 %v476_v5  ;;  %v875_v13 = vunpack.c.l.s8.bf16 %v476_v5 }
 0x116   :  { %1080 = vmatpush1.bf16.msra.mxu0 %v827_v8  ;;  %v565_v8 = vunpack.c.h.s8.bf16 %v318_v6 }
 0x117   :  { %1123 = vmatpush1.bf16.msra.mxu1 %v955_v9  ;;  %1081 = vmatprep.subr.bf16.mxu0 %v820_v10  ;;  %v876_v9 = vunpack.c.l.s8.bf16 %v477_v51  ;;  %v558_v10 = vunpack.c.l.s8.bf16 %v319_v1 }
 0x118   :  { %1124 = vmatprep.subr.bf16.mxu1 %v948_v11  ;;  %v469_v11 = vld [vmem:[#allocation2 + $0x508] sm:$0xff] }
 0x11a   :  { %1082 = vmatpush1.bf16.msra.mxu0 %v819_v14  ;;  %v557_v14 = vunpack.c.l.s8.bf16 %v318_v6 }
 0x11b   :  { %1125 = vmatpush1.bf16.msra.mxu1 %v947_v15  ;;  %1083 = vmatprep.subr.bf16.mxu0 %v812_v16  ;;  %v868_v15 = vunpack.c.h.s8.bf16 %v469_v11  ;;  %v550_v16 = vunpack.c.h.s8.bf16 %v311_v12 }
 0x11c   :  { %1126 = vmatprep.subr.bf16.mxu1 %v940_v17  ;;  %v468_v17 = vld [vmem:[#allocation2 + $0x500] sm:$0xff] }
 0x11d   :  { %v867_v20 = vunpack.c.h.s8.bf16 %v468_v17  ;;  %v859_v26 = vunpack.c.l.s8.bf16 %v468_v17 }
 0x11e   :  { %1084 = vmatpush1.bf16.msra.mxu0 %v811_v21  ;;  %v549_v21 = vunpack.c.h.s8.bf16 %v310_v18 }
 0x11f   :  { %1127 = vmatpush1.bf16.msra.mxu1 %v939_v22  ;;  %1085 = vmatprep.subr.bf16.mxu0 %v804_v23  ;;  %v860_v22 = vunpack.c.l.s8.bf16 %v469_v11  ;;  %v542_v23 = vunpack.c.l.s8.bf16 %v311_v12 }
 0x120   :  { %1128 = vmatprep.subr.bf16.mxu1 %v932_v24  ;;  %v367_v24 = vld [vmem:[#allocation2 + $0x1d8] sm:$0xff] }
 0x122   :  { %1086 = vmatpush1.bf16.msra.mxu0 %v803_v27  ;;  %v541_v27 = vunpack.c.l.s8.bf16 %v310_v18 }
 0x123   :  { %1129 = vmatpush1.bf16.msra.mxu1 %v931_v28  ;;  %1087 = vmatprep.subr.bf16.mxu0 %v796_v29  ;;  %v662_v28 = vunpack.c.h.s8.bf16 %v367_v24  ;;  %v726_v29 = vunpack.c.h.s8.bf16 %v399_v25 }
 0x124   :  { %1130 = vmatprep.subr.bf16.mxu1 %v924_v30  ;;  %v366_v30 = vld [vmem:[#allocation2 + $0x1d0] sm:$0xff] }
 0x126   :  { %1088 = vmatpush1.bf16.msra.mxu0 %v795_v33  ;;  %v661_v33 = vunpack.c.h.s8.bf16 %v366_v30 }
 0x127   :  { %1131 = vmatpush1.bf16.msra.mxu1 %v923_v34  ;;  %1089 = vmatprep.subr.bf16.mxu0 %v916_v35  ;;  %v725_v34 = vunpack.c.h.s8.bf16 %v398_v31  ;;  %v654_v35 = vunpack.c.l.s8.bf16 %v367_v24 }
 0x128   :  { %1159 = vmatprep.subr.bf16.mxu1 %v598_v37  ;;  %v718_v37 = vunpack.c.l.s8.bf16 %v399_v25 }
 0x12a   :  { %1149 = vmatmul.mubr.bf16.vlgmr.msra.gmra.mxu1 %v4019_v40  ;;  %1090 = vmatpush2.bf16.msra.mxu0 %v915_v41  ;;  %v653_v41 = vunpack.c.l.s8.bf16 %v366_v30 }
 0x12b   :  { %1160 = vmatpush1.bf16.msra.mxu1 %v597_v42  ;;  %1091 = vmatprep.subr.bf16.mxu0 %v908_v43  ;;  %v717_v42 = vunpack.c.l.s8.bf16 %v398_v31  ;;  %v358_v43 = vld [vmem:[#allocation2 + $0x190] sm:$0xff] }
 0x12c   :  { %1161 = vmatprep.subr.bf16.mxu1 %v590_v45  ;;  %1191 = vmatprep.mubr.bf16.mxu1 %v3995_v56  ;;  %v390_v45 = vld [vmem:[#allocation2 + $0x290] sm:$0xff]  ;;  %v645_v46 = vunpack.c.h.s8.bf16 %v358_v43  ;;  %v637_v61 = vunpack.c.l.s8.bf16 %v358_v43 }
 0x12d   :  { %v709_v58 = vunpack.c.h.s8.bf16 %v390_v45  ;;  %v701_v62 = vunpack.c.l.s8.bf16 %v390_v45 }
 0x12e   :  { %1092 = vmatpush2.bf16.msra.mxu0 %v907_v59  ;;  %v638_v59 = vunpack.c.l.s8.bf16 %v359_v38 }
 0x12f   :  { %1162 = vmatpush1.bf16.msra.mxu1 %v589_v60  ;;  %1093 = vmatprep.subr.bf16.mxu0 %v900_v48  ;;  %v702_v60 = vunpack.c.l.s8.bf16 %v391_v39  ;;  %v351_v48 = vld [vmem:[#allocation2 + $0x158] sm:$0xff] }
 0x130   :  { %1163 = vmatprep.subr.bf16.mxu1 %v582_v55  ;;  %v383_v55 = vld [vmem:[#allocation2 + $0x258] sm:$0xff] }
 0x132   :  { %1094 = vmatpush2.bf16.msra.mxu0 %v899_v63  ;;  %v630_v63 = vunpack.c.h.s8.bf16 %v351_v48 }
 0x133   :  { %1164 = vmatpush1.bf16.msra.mxu1 %v581_v19  ;;  %1095 = vmatprep.subr.bf16.mxu0 %v892_v36  ;;  %v694_v19 = vunpack.c.h.s8.bf16 %v383_v55  ;;  %v350_v36 = vld [vmem:[#allocation2 + $0x150] sm:$0xff] }
 0x134   :  { %1165 = vmatprep.subr.bf16.mxu1 %v574_v49  ;;  %v382_v49 = vld [vmem:[#allocation2 + $0x250] sm:$0xff]  ;;  %v629_v51 = vunpack.c.h.s8.bf16 %v350_v36  ;;  %v621_v5 = vunpack.c.l.s8.bf16 %v350_v36 }
 0x135   :  { %v693_v1 = vunpack.c.h.s8.bf16 %v382_v49  ;;  %v685_v6 = vunpack.c.l.s8.bf16 %v382_v49 }
 0x136   :  { %1096 = vmatpush2.bf16.msra.mxu0 %v891_v2  ;;  %v622_v2 = vunpack.c.l.s8.bf16 %v351_v48 }
 0x137   :  { %1166 = vmatpush1.bf16.msra.mxu1 %v573_v47  ;;  %1097 = vmatprep.subr.bf16.mxu0 %v884_v54  ;;  %v686_v47 = vunpack.c.l.s8.bf16 %v383_v55  ;;  %v343_v54 = vld [vmem:[#allocation2 + $0x118] sm:$0xff] }
 0x138   :  { %1167 = vmatprep.subr.bf16.mxu1 %v566_v4  ;;  %v375_v4 = vld [vmem:[#allocation2 + $0x218] sm:$0xff] }
 0x13a   :  { %1098 = vmatpush2.bf16.msra.mxu0 %v883_v7  ;;  %v614_v7 = vunpack.c.h.s8.bf16 %v343_v54 }
 0x13b   :  { %1168 = vmatpush1.bf16.msra.mxu1 %v565_v8  ;;  %1099 = vmatprep.subr.bf16.mxu0 %v876_v9  ;;  %v678_v8 = vunpack.c.h.s8.bf16 %v375_v4  ;;  %v342_v9 = vld [vmem:[#allocation2 + $0x110] sm:$0xff] }
 0x13c   :  { %1169 = vmatprep.subr.bf16.mxu1 %v558_v10  ;;  %v374_v10 = vld [vmem:[#allocation2 + $0x210] sm:$0xff]  ;;  %v613_v11 = vunpack.c.h.s8.bf16 %v342_v9  ;;  %v605_v17 = vunpack.c.l.s8.bf16 %v342_v9 }
 0x13d   :  { %v677_v12 = vunpack.c.h.s8.bf16 %v374_v10  ;;  %v669_v18 = vunpack.c.l.s8.bf16 %v374_v10 }
 0x13e   :  { %1100 = vmatpush2.bf16.msra.mxu0 %v875_v13  ;;  %v606_v13 = vunpack.c.l.s8.bf16 %v343_v54 }
 0x13f   :  { %1170 = vmatpush1.bf16.msra.mxu1 %v557_v14  ;;  %1101 = vmatprep.subr.bf16.mxu0 %v868_v15  ;;  %v670_v14 = vunpack.c.l.s8.bf16 %v375_v4  ;;  %v431_v15 = vld [vmem:[#allocation2 + $0x3d8] sm:$0xff] }
 0x140   :  { %1171 = vmatprep.subr.bf16.mxu1 %v550_v16  ;;  %v463_v16 = vld [vmem:[#allocation2 + $0x4d8] sm:$0xff] }
 0x142   :  { %1102 = vmatpush2.bf16.msra.mxu0 %v867_v20  ;;  %v790_v20 = vunpack.c.h.s8.bf16 %v431_v15 }
 0x143   :  { %1172 = vmatpush1.bf16.msra.mxu1 %v549_v21  ;;  %1103 = vmatprep.subr.bf16.mxu0 %v860_v22  ;;  %v854_v21 = vunpack.c.h.s8.bf16 %v463_v16  ;;  %v430_v22 = vld [vmem:[#allocation2 + $0x3d0] sm:$0xff] }
 0x144   :  { %1173 = vmatprep.subr.bf16.mxu1 %v542_v23  ;;  %v462_v23 = vld [vmem:[#allocation2 + $0x4d0] sm:$0xff]  ;;  %v789_v24 = vunpack.c.h.s8.bf16 %v430_v22  ;;  %v781_v30 = vunpack.c.l.s8.bf16 %v430_v22 }
 0x145   :  { %v853_v25 = vunpack.c.h.s8.bf16 %v462_v23  ;;  %v845_v31 = vunpack.c.l.s8.bf16 %v462_v23 }
 0x146   :  { %1104 = vmatpush2.bf16.msra.mxu0 %v859_v26  ;;  %v782_v26 = vunpack.c.l.s8.bf16 %v431_v15 }
 0x147   :  { %1174 = vmatpush1.bf16.msra.mxu1 %v541_v27  ;;  %1202 = vmatprep.subr.bf16.mxu0 %v726_v29  ;;  %v846_v27 = vunpack.c.l.s8.bf16 %v463_v16  ;;  %v455_v29 = vld [vmem:[#allocation2 + $0x498] sm:$0xff] }
 0x148   :  { %1175 = vmatprep.subr.bf16.mxu1 %v662_v28  ;;  %v423_v28 = vld [vmem:[#allocation2 + $0x398] sm:$0xff] }
 0x149   :  { %1106 = vmatmul.mubr.bf16.vlgmr.msra.gmra.mxu0 %v4025_v32 }
 0x14a   :  { %1203 = vmatpush1.bf16.msra.mxu0 %v725_v34  ;;  %1234 = vmatprep.mubr.bf16.mxu0 %v3997_v57  ;;  %v838_v34 = vunpack.c.h.s8.bf16 %v455_v29 }
 0x14b   :  { %1176 = vmatpush2.bf16.msra.mxu1 %v661_v33  ;;  %1204 = vmatprep.subr.bf16.mxu0 %v718_v37  ;;  %v774_v33 = vunpack.c.h.s8.bf16 %v423_v28  ;;  %v454_v37 = vld [vmem:[#allocation2 + $0x490] sm:$0xff] }
 0x14c   :  { %1177 = vmatprep.subr.bf16.mxu1 %v654_v35  ;;  %v422_v35 = vld [vmem:[#allocation2 + $0x390] sm:$0xff]  ;;  %v837_v39 = vunpack.c.h.s8.bf16 %v454_v37  ;;  %v829_v45 = vunpack.c.l.s8.bf16 %v454_v37 }
 0x14d   :  { %v773_v38 = vunpack.c.h.s8.bf16 %v422_v35  ;;  %v765_v43 = vunpack.c.l.s8.bf16 %v422_v35 }
 0x14e   :  { %1205 = vmatpush1.bf16.msra.mxu0 %v717_v42  ;;  %v830_v42 = vunpack.c.l.s8.bf16 %v455_v29 }
 0x14f   :  { %1178 = vmatpush2.bf16.msra.mxu1 %v653_v41  ;;  %1206 = vmatprep.subr.bf16.mxu0 %v710_v53  ;;  %v766_v41 = vunpack.c.l.s8.bf16 %v423_v28  ;;  %v447_v53 = vld [vmem:[#allocation2 + $0x458] sm:$0xff] }
 0x150   :  { %1179 = vmatprep.subr.bf16.mxu1 %v646_v44  ;;  %v415_v44 = vld [vmem:[#allocation2 + $0x358] sm:$0xff] }
 0x152   :  { %1207 = vmatpush1.bf16.msra.mxu0 %v709_v58  ;;  %v822_v58 = vunpack.c.h.s8.bf16 %v447_v53 }
 0x153   :  { %1180 = vmatpush2.bf16.msra.mxu1 %v645_v46  ;;  %1208 = vmatprep.subr.bf16.mxu0 %v702_v60  ;;  %v758_v46 = vunpack.c.h.s8.bf16 %v415_v44  ;;  %v446_v60 = vld [vmem:[#allocation2 + $0x450] sm:$0xff] }
 0x154   :  { %1181 = vmatprep.subr.bf16.mxu1 %v638_v59  ;;  %v414_v59 = vld [vmem:[#allocation2 + $0x350] sm:$0xff]  ;;  %v821_v55 = vunpack.c.h.s8.bf16 %v446_v60  ;;  %v813_v49 = vunpack.c.l.s8.bf16 %v446_v60 }
 0x155   :  { %v757_v48 = vunpack.c.h.s8.bf16 %v414_v59  ;;  %v749_v36 = vunpack.c.l.s8.bf16 %v414_v59 }
 0x156   :  { %1209 = vmatpush1.bf16.msra.mxu0 %v701_v62  ;;  %v814_v62 = vunpack.c.l.s8.bf16 %v447_v53 }
 0x157   :  { %1182 = vmatpush2.bf16.msra.mxu1 %v637_v61  ;;  %1210 = vmatprep.subr.bf16.mxu0 %v694_v19  ;;  %v750_v61 = vunpack.c.l.s8.bf16 %v415_v44  ;;  %v439_v19 = vld [vmem:[#allocation2 + $0x418] sm:$0xff] }
 0x158   :  { %1183 = vmatprep.subr.bf16.mxu1 %v630_v63  ;;  %v407_v63 = vld [vmem:[#allocation2 + $0x318] sm:$0xff] }
 0x15a   :  { %1211 = vmatpush1.bf16.msra.mxu0 %v693_v1  ;;  %v806_v1 = vunpack.c.h.s8.bf16 %v439_v19 }
 0x15b   :  { %1184 = vmatpush2.bf16.msra.mxu1 %v629_v51  ;;  %1212 = vmatprep.subr.bf16.mxu0 %v686_v47  ;;  %v742_v51 = vunpack.c.h.s8.bf16 %v407_v63  ;;  %v438_v47 = vld [vmem:[#allocation2 + $0x410] sm:$0xff] }
 0x15c   :  { %1185 = vmatprep.subr.bf16.mxu1 %v622_v2  ;;  %v406_v2 = vld [vmem:[#allocation2 + $0x310] sm:$0xff]  ;;  %v805_v4 = vunpack.c.h.s8.bf16 %v438_v47  ;;  %v797_v10 = vunpack.c.l.s8.bf16 %v438_v47 }
 0x15d   :  { %v741_v54 = vunpack.c.h.s8.bf16 %v406_v2  ;;  %v733_v9 = vunpack.c.l.s8.bf16 %v406_v2 }
 0x15e   :  { %1213 = vmatpush1.bf16.msra.mxu0 %v685_v6  ;;  %v798_v6 = vunpack.c.l.s8.bf16 %v439_v19 }
 0x15f   :  { %1186 = vmatpush2.bf16.msra.mxu1 %v621_v5  ;;  %1214 = vmatprep.subr.bf16.mxu0 %v678_v8  ;;  %v734_v5 = vunpack.c.l.s8.bf16 %v407_v63  ;;  %v527_v8 = vld [vmem:[#allocation2 + $0x6d8] sm:$0xff] }
 0x160   :  { %1187 = vmatprep.subr.bf16.mxu1 %v614_v7  ;;  %v495_v7 = vld [vmem:[#allocation2 + $0x5d8] sm:$0xff] }
 0x162   :  { %1215 = vmatpush1.bf16.msra.mxu0 %v677_v12  ;;  %v982_v12 = vunpack.c.h.s8.bf16 %v527_v8 }
 0x163   :  { %1188 = vmatpush2.bf16.msra.mxu1 %v613_v11  ;;  %1216 = vmatprep.subr.bf16.mxu0 %v670_v14  ;;  %v918_v11 = vunpack.c.h.s8.bf16 %v495_v7  ;;  %v526_v14 = vld [vmem:[#allocation2 + $0x6d0] sm:$0xff] }
 0x164   :  { %1189 = vmatprep.subr.bf16.mxu1 %v606_v13  ;;  %v494_v13 = vld [vmem:[#allocation2 + $0x5d0] sm:$0xff]  ;;  %v981_v16 = vunpack.c.h.s8.bf16 %v526_v14  ;;  %v973_v23 = vunpack.c.l.s8.bf16 %v526_v14 }
 0x165   :  { %v917_v15 = vunpack.c.h.s8.bf16 %v494_v13  ;;  %v909_v22 = vunpack.c.l.s8.bf16 %v494_v13 }
 0x166   :  { %1217 = vmatpush1.bf16.msra.mxu0 %v669_v18  ;;  %v974_v18 = vunpack.c.l.s8.bf16 %v527_v8 }
 0x167   :  { %1190 = vmatpush2.bf16.msra.mxu1 %v605_v17  ;;  %1218 = vmatprep.subr.bf16.mxu0 %v790_v20  ;;  %v910_v17 = vunpack.c.l.s8.bf16 %v495_v7  ;;  %v487_v20 = vld [vmem:[#allocation2 + $0x598] sm:$0xff] }
 0x168   :  { %1245 = vmatprep.subr.bf16.mxu1 %v854_v21  ;;  %v519_v21 = vld [vmem:[#allocation2 + $0x698] sm:$0xff] }
 0x16a   :  { %1192 = vmatmul.mubr.bf16.vlgmr.msra.gmra.mxu1 %v4003_v50  ;;  %1219 = vmatpush2.bf16.msra.mxu0 %v789_v24  ;;  %v902_v24 = vunpack.c.h.s8.bf16 %v487_v20 }
 0x16b   :  { %1246 = vmatpush1.bf16.msra.mxu1 %v853_v25  ;;  %1220 = vmatprep.subr.bf16.mxu0 %v782_v26  ;;  %v966_v25 = vunpack.c.h.s8.bf16 %v519_v21  ;;  %v486_v26 = vld [vmem:[#allocation2 + $0x590] sm:$0xff] }
 0x16c   :  { %1247 = vmatprep.subr.bf16.mxu1 %v846_v27  ;;  %1277 = vmatprep.mubr.bf16.mxu1 %v4011_v0  ;;  %v518_v27 = vld [vmem:[#allocation2 + $0x690] sm:$0xff]  ;;  %v901_v28 = vunpack.c.h.s8.bf16 %v486_v26  ;;  %v893_v35 = vunpack.c.l.s8.bf16 %v486_v26 }
 0x16d   :  { %v965_v29 = vunpack.c.h.s8.bf16 %v518_v27  ;;  %v957_v37 = vunpack.c.l.s8.bf16 %v518_v27 }
 0x16e   :  { %1221 = vmatpush2.bf16.msra.mxu0 %v781_v30  ;;  %v894_v30 = vunpack.c.l.s8.bf16 %v487_v20 }
 0x16f   :  { %1248 = vmatpush1.bf16.msra.mxu1 %v845_v31  ;;  %1222 = vmatprep.subr.bf16.mxu0 %v774_v33  ;;  %v958_v31 = vunpack.c.l.s8.bf16 %v519_v21  ;;  %v479_v33 = vld [vmem:[#allocation2 + $0x558] sm:$0xff] }
 0x170   :  { %1249 = vmatprep.subr.bf16.mxu1 %v838_v34  ;;  %v511_v34 = vld [vmem:[#allocation2 + $0x658] sm:$0xff] }
 0x172   :  { %1223 = vmatpush2.bf16.msra.mxu0 %v773_v38  ;;  %v886_v38 = vunpack.c.h.s8.bf16 %v479_v33 }
 0x173   :  { %1250 = vmatpush1.bf16.msra.mxu1 %v837_v39  ;;  %1224 = vmatprep.subr.bf16.mxu0 %v766_v41  ;;  %v950_v39 = vunpack.c.h.s8.bf16 %v511_v34  ;;  %v478_v41 = vld [vmem:[#allocation2 + $0x550] sm:$0xff] }
 0x174   :  { %1251 = vmatprep.subr.bf16.mxu1 %v830_v42  ;;  %v510_v42 = vld [vmem:[#allocation2 + $0x650] sm:$0xff]  ;;  %v885_v44 = vunpack.c.h.s8.bf16 %v478_v41  ;;  %v877_v59 = vunpack.c.l.s8.bf16 %v478_v41 }
 0x175   :  { %v949_v53 = vunpack.c.h.s8.bf16 %v510_v42  ;;  %v941_v60 = vunpack.c.l.s8.bf16 %v510_v42 }
 0x176   :  { %1225 = vmatpush2.bf16.msra.mxu0 %v765_v43  ;;  %v878_v43 = vunpack.c.l.s8.bf16 %v479_v33 }
 0x177   :  { %1252 = vmatpush1.bf16.msra.mxu1 %v829_v45  ;;  %1226 = vmatprep.subr.bf16.mxu0 %v758_v46  ;;  %v942_v45 = vunpack.c.l.s8.bf16 %v511_v34  ;;  %v471_v46 = vld [vmem:[#allocation2 + $0x518] sm:$0xff] }
 0x178   :  { %1253 = vmatprep.subr.bf16.mxu1 %v822_v58  ;;  %v503_v58 = vld [vmem:[#allocation2 + $0x618] sm:$0xff] }
 0x17a   :  { %1227 = vmatpush2.bf16.msra.mxu0 %v757_v48  ;;  %v870_v48 = vunpack.c.h.s8.bf16 %v471_v46 }
 0x17b   :  { %1254 = vmatpush1.bf16.msra.mxu1 %v821_v55  ;;  %1228 = vmatprep.subr.bf16.mxu0 %v750_v61  ;;  %v934_v55 = vunpack.c.h.s8.bf16 %v503_v58  ;;  %v470_v61 = vld [vmem:[#allocation2 + $0x510] sm:$0xff] }
 0x17c   :  { %1255 = vmatprep.subr.bf16.mxu1 %v814_v62  ;;  %v502_v62 = vld [vmem:[#allocation2 + $0x610] sm:$0xff]  ;;  %v869_v63 = vunpack.c.h.s8.bf16 %v470_v61  ;;  %v861_v2 = vunpack.c.l.s8.bf16 %v470_v61 }
 0x17d   :  { %v933_v19 = vunpack.c.h.s8.bf16 %v502_v62  ;;  %v925_v47 = vunpack.c.l.s8.bf16 %v502_v62 }
 0x17e   :  { %1229 = vmatpush2.bf16.msra.mxu0 %v749_v36  ;;  %v862_v36 = vunpack.c.l.s8.bf16 %v471_v46 }
 0x17f   :  { %1256 = vmatpush1.bf16.msra.mxu1 %v813_v49  ;;  %1230 = vmatprep.subr.bf16.mxu0 %v742_v51  ;;  %v926_v49 = vunpack.c.l.s8.bf16 %v503_v58  ;;  %v337_v51 = vld [vmem:[#allocation2 + $0xe8] sm:$0xff] }
 0x180   :  { %1257 = vmatprep.subr.bf16.mxu1 %v806_v1  ;;  %v401_v1 = vld [vmem:[#allocation2 + $0x2e8] sm:$0xff] }
 0x182   :  { %1231 = vmatpush2.bf16.msra.mxu0 %v741_v54  ;;  %v600_v54 = vunpack.c.h.s8.bf16 %v337_v51 }
 0x183   :  { %1258 = vmatpush1.bf16.msra.mxu1 %v805_v4  ;;  %1232 = vmatprep.subr.bf16.mxu0 %v734_v5  ;;  %v728_v4 = vunpack.c.h.s8.bf16 %v401_v1  ;;  %v336_v5 = vld [vmem:[#allocation2 + $0xe0] sm:$0xff] }
 0x184   :  { %1259 = vmatprep.subr.bf16.mxu1 %v798_v6  ;;  %v400_v6 = vld [vmem:[#allocation2 + $0x2e0] sm:$0xff]  ;;  %v599_v7 = vunpack.c.h.s8.bf16 %v336_v5  ;;  %v591_v13 = vunpack.c.l.s8.bf16 %v336_v5 }
 0x185   :  { %v727_v8 = vunpack.c.h.s8.bf16 %v400_v6  ;;  %v719_v14 = vunpack.c.l.s8.bf16 %v400_v6 }
 0x186   :  { %1233 = vmatpush2.bf16.msra.mxu0 %v733_v9  ;;  %v592_v9 = vunpack.c.l.s8.bf16 %v337_v51 }
 0x187   :  { %1260 = vmatpush1.bf16.msra.mxu1 %v797_v10  ;;  %1288 = vmatprep.subr.bf16.mxu0 %v982_v12  ;;  %v720_v10 = vunpack.c.l.s8.bf16 %v401_v1  ;;  %v393_v12 = vld [vmem:[#allocation2 + $0x2a8] sm:$0xff] }
 0x188   :  { %1261 = vmatprep.subr.bf16.mxu1 %v918_v11  ;;  %v329_v11 = vld [vmem:[#allocation2 + $0xa8] sm:$0xff] }
 0x189   :  { %1235 = vmatmul.mubr.bf16.vlgmr.msra.gmra.mxu0 %v4007_v52 }
 0x18a   :  { %1289 = vmatpush1.bf16.msra.mxu0 %v981_v16  ;;  %1320 = vmatprep.mubr.bf16.mxu0 %v3788_v3  ;;  %v712_v16 = vunpack.c.h.s8.bf16 %v393_v12 }
 0x18b   :  { %1262 = vmatpush2.bf16.msra.mxu1 %v917_v15  ;;  %1290 = vmatprep.subr.bf16.mxu0 %v974_v18  ;;  %v584_v15 = vunpack.c.h.s8.bf16 %v329_v11  ;;  %v392_v18 = vld [vmem:[#allocation2 + $0x2a0] sm:$0xff] }
 0x18c   :  { %1263 = vmatprep.subr.bf16.mxu1 %v910_v17  ;;  %v328_v17 = vld [vmem:[#allocation2 + $0xa0] sm:$0xff]  ;;  %v711_v21 = vunpack.c.h.s8.bf16 %v392_v18  ;;  %v703_v27 = vunpack.c.l.s8.bf16 %v392_v18 }
 0x18d   :  { %v583_v20 = vunpack.c.h.s8.bf16 %v328_v17  ;;  %v575_v26 = vunpack.c.l.s8.bf16 %v328_v17 }
 0x18e   :  { %1291 = vmatpush1.bf16.msra.mxu0 %v973_v23  ;;  %v704_v23 = vunpack.c.l.s8.bf16 %v393_v12 }
 0x18f   :  { %1264 = vmatpush2.bf16.msra.mxu1 %v909_v22  ;;  %1292 = vmatprep.subr.bf16.mxu0 %v966_v25  ;;  %v576_v22 = vunpack.c.l.s8.bf16 %v329_v11  ;;  %v385_v25 = vld [vmem:[#allocation2 + $0x268] sm:$0xff] }
 0x190   :  { %1265 = vmatprep.subr.bf16.mxu1 %v902_v24  ;;  %v321_v24 = vld [vmem:[#allocation2 + $0x68] sm:$0xff] }
 0x192   :  { %1293 = vmatpush1.bf16.msra.mxu0 %v965_v29  ;;  %v696_v29 = vunpack.c.h.s8.bf16 %v385_v25 }
 0x193   :  { %1266 = vmatpush2.bf16.msra.mxu1 %v901_v28  ;;  %1294 = vmatprep.subr.bf16.mxu0 %v958_v31  ;;  %v568_v28 = vunpack.c.h.s8.bf16 %v321_v24  ;;  %v384_v31 = vld [vmem:[#allocation2 + $0x260] sm:$0xff] }
 0x194   :  { %1267 = vmatprep.subr.bf16.mxu1 %v894_v30  ;;  %v320_v30 = vld [vmem:[#allocation2 + $0x60] sm:$0xff]  ;;  %v695_v34 = vunpack.c.h.s8.bf16 %v384_v31  ;;  %v687_v42 = vunpack.c.l.s8.bf16 %v384_v31 }
 0x195   :  { %v567_v33 = vunpack.c.h.s8.bf16 %v320_v30  ;;  %v559_v41 = vunpack.c.l.s8.bf16 %v320_v30 }
 0x196   :  { %1295 = vmatpush1.bf16.msra.mxu0 %v957_v37  ;;  %v688_v37 = vunpack.c.l.s8.bf16 %v385_v25 }
 0x197   :  { %1268 = vmatpush2.bf16.msra.mxu1 %v893_v35  ;;  %1296 = vmatprep.subr.bf16.mxu0 %v950_v39  ;;  %v560_v35 = vunpack.c.l.s8.bf16 %v321_v24  ;;  %v377_v39 = vld [vmem:[#allocation2 + $0x228] sm:$0xff] }
 0x198   :  { %1269 = vmatprep.subr.bf16.mxu1 %v886_v38  ;;  %v313_v38 = vld [vmem:[#allocation2 + $0x28] sm:$0xff] }
 0x19a   :  { %1297 = vmatpush1.bf16.msra.mxu0 %v949_v53  ;;  %v680_v53 = vunpack.c.h.s8.bf16 %v377_v39 }
 0x19b   :  { %1270 = vmatpush2.bf16.msra.mxu1 %v885_v44  ;;  %1298 = vmatprep.subr.bf16.mxu0 %v942_v45  ;;  %v552_v44 = vunpack.c.h.s8.bf16 %v313_v38  ;;  %v376_v45 = vld [vmem:[#allocation2 + $0x220] sm:$0xff] }
 0x19c   :  { %1271 = vmatprep.subr.bf16.mxu1 %v878_v43  ;;  %v312_v43 = vld [vmem:[#allocation2 + $0x20] sm:$0xff]  ;;  %v679_v58 = vunpack.c.h.s8.bf16 %v376_v45  ;;  %v671_v62 = vunpack.c.l.s8.bf16 %v376_v45 }
 0x19d   :  { %v551_v46 = vunpack.c.h.s8.bf16 %v312_v43  ;;  %v543_v61 = vunpack.c.l.s8.bf16 %v312_v43 }
 0x19e   :  { %1299 = vmatpush1.bf16.msra.mxu0 %v941_v60  ;;  %v672_v60 = vunpack.c.l.s8.bf16 %v377_v39 }
 0x19f   :  { %1272 = vmatpush2.bf16.msra.mxu1 %v877_v59  ;;  %1300 = vmatprep.subr.bf16.mxu0 %v934_v55  ;;  %v544_v59 = vunpack.c.l.s8.bf16 %v313_v38  ;;  %v433_v55 = vld [vmem:[#allocation2 + $0x3e8] sm:$0xff] }
 0x1a0   :  { %1273 = vmatprep.subr.bf16.mxu1 %v870_v48  ;;  %v369_v48 = vld [vmem:[#allocation2 + $0x1e8] sm:$0xff] }
 0x1a2   :  { %1301 = vmatpush1.bf16.msra.mxu0 %v933_v19  ;;  %v792_v19 = vunpack.c.h.s8.bf16 %v433_v55 }
 0x1a3   :  { %1274 = vmatpush2.bf16.msra.mxu1 %v869_v63  ;;  %1302 = vmatprep.subr.bf16.mxu0 %v926_v49  ;;  %v664_v63 = vunpack.c.h.s8.bf16 %v369_v48  ;;  %v432_v49 = vld [vmem:[#allocation2 + $0x3e0] sm:$0xff] }
 0x1a4   :  { %1275 = vmatprep.subr.bf16.mxu1 %v862_v36  ;;  %v368_v36 = vld [vmem:[#allocation2 + $0x1e0] sm:$0xff]  ;;  %v791_v1 = vunpack.c.h.s8.bf16 %v432_v49  ;;  %v783_v6 = vunpack.c.l.s8.bf16 %v432_v49 }
 0x1a5   :  { %v663_v51 = vunpack.c.h.s8.bf16 %v368_v36  ;;  %v655_v5 = vunpack.c.l.s8.bf16 %v368_v36 }
 0x1a6   :  { %1303 = vmatpush1.bf16.msra.mxu0 %v925_v47  ;;  %v784_v47 = vunpack.c.l.s8.bf16 %v433_v55 }
 0x1a7   :  { %1276 = vmatpush2.bf16.msra.mxu1 %v861_v2  ;;  %1331 = vmatprep.subr.bf16.mxu0 %v600_v54  ;;  %v656_v2 = vunpack.c.l.s8.bf16 %v369_v48  ;;  %v361_v54 = vld [vmem:[#allocation2 + $0x1a8] sm:$0xff] }
 0x1a8   :  { %1374 = vmatprep.subr.bf16.mxu1 %v728_v4  ;;  %v425_v4 = vld [vmem:[#allocation2 + $0x3a8] sm:$0xff] }
 0x1a9   :  { %1321 = vmatmul.mubr.bf16.vlgmr.msra.gmra.mxu0 %v4019_v40 }
 0x1aa   :  { %1278 = vmatmul.mubr.bf16.vlgmr.msra.gmra.mxu1 %v4025_v32  ;;  %1332 = vmatpush1.bf16.msra.mxu0 %v599_v7  ;;  %v648_v7 = vunpack.c.h.s8.bf16 %v361_v54 }
 0x1ab   :  { %1375 = vmatpush1.bf16.msra.mxu1 %v727_v8  ;;  %1333 = vmatprep.subr.bf16.mxu0 %v592_v9  ;;  %v776_v8 = vunpack.c.h.s8.bf16 %v425_v4  ;;  %v360_v9 = vld [vmem:[#allocation2 + $0x1a0] sm:$0xff] }
 0x1ac   :  { %1376 = vmatprep.subr.bf16.mxu1 %v720_v10  ;;  %1363 = vmatprep.mubr.bf16.mxu0 %v3995_v56  ;;  %v424_v10 = vld [vmem:[#allocation2 + $0x3a0] sm:$0xff]  ;;  %v647_v11 = vunpack.c.h.s8.bf16 %v360_v9  ;;  %v639_v17 = vunpack.c.l.s8.bf16 %v360_v9 }
 0x1ad   :  { %1406 = vmatprep.mubr.bf16.mxu1 %v3997_v57  ;;  %v775_v12 = vunpack.c.h.s8.bf16 %v424_v10  ;;  %v767_v18 = vunpack.c.l.s8.bf16 %v424_v10 }
 0x1ae   :  { %1334 = vmatpush1.bf16.msra.mxu0 %v591_v13  ;;  %v640_v13 = vunpack.c.l.s8.bf16 %v361_v54 }
 0x1af   :  { %1377 = vmatpush1.bf16.msra.mxu1 %v719_v14  ;;  %1335 = vmatprep.subr.bf16.mxu0 %v584_v15  ;;  %v768_v14 = vunpack.c.l.s8.bf16 %v425_v4  ;;  %v353_v15 = vld [vmem:[#allocation2 + $0x168] sm:$0xff] }
 0x1b0   :  { %1378 = vmatprep.subr.bf16.mxu1 %v712_v16  ;;  %v417_v16 = vld [vmem:[#allocation2 + $0x368] sm:$0xff] }
 0x1b2   :  { %1336 = vmatpush1.bf16.msra.mxu0 %v583_v20  ;;  %v632_v20 = vunpack.c.h.s8.bf16 %v353_v15 }
 0x1b3   :  { %1379 = vmatpush1.bf16.msra.mxu1 %v711_v21  ;;  %1337 = vmatprep.subr.bf16.mxu0 %v576_v22  ;;  %v760_v21 = vunpack.c.h.s8.bf16 %v417_v16  ;;  %v352_v22 = vld [vmem:[#allocation2 + $0x160] sm:$0xff] }
 0x1b4   :  { %1380 = vmatprep.subr.bf16.mxu1 %v704_v23  ;;  %v416_v23 = vld [vmem:[#allocation2 + $0x360] sm:$0xff]  ;;  %v631_v24 = vunpack.c.h.s8.bf16 %v352_v22  ;;  %v623_v30 = vunpack.c.l.s8.bf16 %v352_v22  ;;  %v505_v22 = vld [vmem:[#allocation2 + $0x628] sm:$0xff] }
 0x1b5   :  { %v759_v25 = vunpack.c.h.s8.bf16 %v416_v23  ;;  %v751_v31 = vunpack.c.l.s8.bf16 %v416_v23 }
 0x1b6   :  { %1338 = vmatpush1.bf16.msra.mxu0 %v575_v26  ;;  %v624_v26 = vunpack.c.l.s8.bf16 %v353_v15 }
 0x1b7   :  { %1381 = vmatpush1.bf16.msra.mxu1 %v703_v27  ;;  %1339 = vmatprep.subr.bf16.mxu0 %v568_v28  ;;  %v752_v27 = vunpack.c.l.s8.bf16 %v417_v16  ;;  %v345_v28 = vld [vmem:[#allocation2 + $0x128] sm:$0xff] }
 0x1b8   :  { %1382 = vmatprep.subr.bf16.mxu1 %v696_v29  ;;  %v409_v29 = vld [vmem:[#allocation2 + $0x328] sm:$0xff] }
 0x1ba   :  { %1340 = vmatpush1.bf16.msra.mxu0 %v567_v33  ;;  %v616_v33 = vunpack.c.h.s8.bf16 %v345_v28 }
 0x1bb   :  { %1383 = vmatpush1.bf16.msra.mxu1 %v695_v34  ;;  %1341 = vmatprep.subr.bf16.mxu0 %v560_v35  ;;  %v744_v34 = vunpack.c.h.s8.bf16 %v409_v29  ;;  %v344_v35 = vld [vmem:[#allocation2 + $0x120] sm:$0xff] }
 0x1bc   :  { %1384 = vmatprep.subr.bf16.mxu1 %v688_v37  ;;  %v408_v37 = vld [vmem:[#allocation2 + $0x320] sm:$0xff]  ;;  %v615_v38 = vunpack.c.h.s8.bf16 %v344_v35  ;;  %v607_v43 = vunpack.c.l.s8.bf16 %v344_v35 }
 0x1bd   :  { %v743_v39 = vunpack.c.h.s8.bf16 %v408_v37  ;;  %v735_v45 = vunpack.c.l.s8.bf16 %v408_v37 }
 0x1be   :  { %1342 = vmatpush1.bf16.msra.mxu0 %v559_v41  ;;  %v608_v41 = vunpack.c.l.s8.bf16 %v345_v28  ;;  %v936_v28 = vunpack.c.h.s8.bf16 %v505_v22 }
 0x1bf   :  { %1385 = vmatpush1.bf16.msra.mxu1 %v687_v42  ;;  %1343 = vmatprep.subr.bf16.mxu0 %v552_v44  ;;  %v736_v42 = vunpack.c.l.s8.bf16 %v409_v29  ;;  %v465_v44 = vld [vmem:[#allocation2 + $0x4e8] sm:$0xff]  ;;  %v440_v29 = vld [vmem:[#allocation2 + $0x420] sm:$0xff] }
 0x1c0   :  { %1386 = vmatprep.subr.bf16.mxu1 %v680_v53  ;;  %v529_v53 = vld [vmem:[#allocation2 + $0x6e8] sm:$0xff] }
 0x1c2   :  { %1344 = vmatpush1.bf16.msra.mxu0 %v551_v46  ;;  %v856_v46 = vunpack.c.h.s8.bf16 %v465_v44 }
 0x1c3   :  { %1387 = vmatpush1.bf16.msra.mxu1 %v679_v58  ;;  %1345 = vmatprep.subr.bf16.mxu0 %v544_v59  ;;  %v984_v58 = vunpack.c.h.s8.bf16 %v529_v53  ;;  %v464_v59 = vld [vmem:[#allocation2 + $0x4e0] sm:$0xff] }
 0x1c4   :  { %1388 = vmatprep.subr.bf16.mxu1 %v672_v60  ;;  %v528_v60 = vld [vmem:[#allocation2 + $0x6e0] sm:$0xff]  ;;  %v855_v48 = vunpack.c.h.s8.bf16 %v464_v59  ;;  %v847_v36 = vunpack.c.l.s8.bf16 %v464_v59 }
 0x1c5   :  { %v983_v55 = vunpack.c.h.s8.bf16 %v528_v60  ;;  %v975_v49 = vunpack.c.l.s8.bf16 %v528_v60  ;;  %v496_v60 = vld [vmem:[#allocation2 + $0x5e0] sm:$0xff] }
 0x1c6   :  { %1346 = vmatpush1.bf16.msra.mxu0 %v543_v61  ;;  %v848_v61 = vunpack.c.l.s8.bf16 %v465_v44 }
 0x1c7   :  { %1389 = vmatpush1.bf16.msra.mxu1 %v671_v62  ;;  %1347 = vmatprep.subr.bf16.mxu0 %v664_v63  ;;  %v976_v62 = vunpack.c.l.s8.bf16 %v529_v53  ;;  %v457_v63 = vld [vmem:[#allocation2 + $0x4a8] sm:$0xff]  ;;  %v799_v53 = vunpack.c.l.s8.bf16 %v440_v29 }
 0x1c8   :  { %1390 = vmatprep.subr.bf16.mxu1 %v792_v19  ;;  %v521_v19 = vld [vmem:[#allocation2 + $0x6a8] sm:$0xff] }
 0x1ca   :  { %1348 = vmatpush2.bf16.msra.mxu0 %v663_v51  ;;  %v840_v51 = vunpack.c.h.s8.bf16 %v457_v63 }
 0x1cb   :  { %1391 = vmatpush2.bf16.msra.mxu1 %v791_v1  ;;  %1349 = vmatprep.subr.bf16.mxu0 %v656_v2  ;;  %v968_v1 = vunpack.c.h.s8.bf16 %v521_v19  ;;  %v456_v2 = vld [vmem:[#allocation2 + $0x4a0] sm:$0xff] }
 0x1cc   :  { %1392 = vmatprep.subr.bf16.mxu1 %v784_v47  ;;  %v520_v47 = vld [vmem:[#allocation2 + $0x6a0] sm:$0xff]  ;;  %v839_v54 = vunpack.c.h.s8.bf16 %v456_v2  ;;  %v831_v9 = vunpack.c.l.s8.bf16 %v456_v2 }
 0x1cd   :  { %v967_v4 = vunpack.c.h.s8.bf16 %v520_v47  ;;  %v959_v10 = vunpack.c.l.s8.bf16 %v520_v47  ;;  %v4054_v2 = vld [vmem:[%s4303_s17] sm:$0xff] }
 0x1ce   :  { %1350 = vmatpush2.bf16.msra.mxu0 %v655_v5  ;;  %v832_v5 = vunpack.c.l.s8.bf16 %v457_v63  ;;  %v919_v63 = vunpack.c.h.s8.bf16 %v496_v60 }
 0x1cf   :  { %1393 = vmatpush2.bf16.msra.mxu1 %v783_v6  ;;  %1351 = vmatprep.subr.bf16.mxu0 %v648_v7  ;;  %v960_v6 = vunpack.c.l.s8.bf16 %v521_v19  ;;  %v449_v7 = vld [vmem:[#allocation2 + $0x468] sm:$0xff] }
 0x1d0   :  { %1394 = vmatprep.subr.bf16.mxu1 %v776_v8  ;;  %v513_v8 = vld [vmem:[#allocation2 + $0x668] sm:$0xff] }
 0x1d2   :  { %1352 = vmatpush2.bf16.msra.mxu0 %v647_v11  ;;  %v824_v11 = vunpack.c.h.s8.bf16 %v449_v7 }
 0x1d3   :  { %1395 = vmatpush2.bf16.msra.mxu1 %v775_v12  ;;  %1353 = vmatprep.subr.bf16.mxu0 %v640_v13  ;;  %v952_v12 = vunpack.c.h.s8.bf16 %v513_v8  ;;  %v448_v13 = vld [vmem:[#allocation2 + $0x460] sm:$0xff] }
 0x1d4   :  { %1396 = vmatprep.subr.bf16.mxu1 %v768_v14  ;;  %v512_v14 = vld [vmem:[#allocation2 + $0x660] sm:$0xff]  ;;  %v823_v15 = vunpack.c.h.s8.bf16 %v448_v13  ;;  %v815_v23 = vunpack.c.l.s8.bf16 %v448_v13 }
 0x1d5   :  { %v951_v16 = vunpack.c.h.s8.bf16 %v512_v14 }
 0x1d6   :  { %1354 = vmatpush2.bf16.msra.mxu0 %v639_v17  ;;  %v1064_v17 = vpop.f32.mrf.mxu1 }
 0x1d7   :  { %1397 = vmatpush2.bf16.msra.mxu1 %v767_v18  ;;  %1355 = vmatprep.subr.bf16.mxu0 %v632_v20  ;;  %v816_v18 = vunpack.c.l.s8.bf16 %v449_v7  ;;  %v944_v20 = vunpack.c.l.s8.bf16 %v513_v8 }
 0x1d8   :  { %1398 = vmatprep.subr.bf16.mxu1 %v760_v21  ;;  %v441_v21 = vld [vmem:[#allocation2 + $0x428] sm:$0xff] }
 0x1da   :  { %1356 = vmatpush2.bf16.msra.mxu0 %v631_v24  ;;  %v943_v24 = vunpack.c.l.s8.bf16 %v512_v14 }
 0x1db   :  { %1399 = vmatpush2.bf16.msra.mxu1 %v759_v25  ;;  %1357 = vmatprep.subr.bf16.mxu0 %v624_v26  ;;  %v1021_v25 = vpop.f32.mrf.mxu0  ;;  %v1066_v26 = vpop.f32.mrf.mxu1 }
 0x1dc   :  { %1400 = vmatprep.subr.bf16.mxu1 %v752_v27  ;;  %v808_v27 = vunpack.c.h.s8.bf16 %v441_v21 }
 0x1dd   :  { %v1023_v35 = vpop.f32.mrf.mxu0  ;;  %v1068_v37 = vpop.f32.mrf.mxu1 }
 0x1de   :  { %1358 = vmatpush2.bf16.msra.mxu0 %v623_v30  ;;  %v504_v30 = vld [vmem:[#allocation2 + $0x620] sm:$0xff]  ;;  %v1067_v8 = vadd.f32 %v1066_v26, %v1023_v35 }
 0x1df   :  { %1401 = vmatpush2.bf16.msra.mxu1 %v751_v31  ;;  %1359 = vmatprep.subr.bf16.mxu0 %v616_v33  ;;  %v1677_v31 = vlaneseq  ;;  %v807_v33 = vunpack.c.h.s8.bf16 %v440_v29 }
 0x1e0   :  { %1402 = vmatprep.subr.bf16.mxu1 %v744_v34  ;;  %v935_v34 = vunpack.c.h.s8.bf16 %v504_v30 }
 0x1e1   :  { %v4041_v44 = vshrl.u32 %v1677_v31, 7  ;;  %v1808_v31 = vld [vmem:[#allocation12 + $0x8] sm:$0xff] }
 0x1e2   :  { %1360 = vmatpush2.bf16.msra.mxu0 %v615_v38  ;;  %v800_v38 = vunpack.c.l.s8.bf16 %v441_v21  ;;  %v1807_v21 = vld [vmem:[#allocation12] sm:$0xff] }
 0x1e3   :  { %1403 = vmatpush2.bf16.msra.mxu1 %v743_v39  ;;  %1361 = vmatprep.subr.bf16.mxu0 %v608_v41  ;;  %v928_v39 = vunpack.c.l.s8.bf16 %v505_v22  ;;  %v497_v41 = vld [vmem:[#allocation2 + $0x5e8] sm:$0xff]  ;;  %v4057_v47 = vsub.s32 1, %v4041_v44  ;;  %v1823_v35 = vmul.f32 0.5, %v1807_v21 }
 0x1e4   :  { %1404 = vmatprep.subr.bf16.mxu1 %v736_v42  ;;  %v339_v42 = vld [vmem:[#allocation2 + $0xf8] sm:$0xff] }
 0x1e5   :  { %v602_v59 = vunpack.c.h.s8.bf16 %v339_v42  ;;  %v1742_v26 = vrot.slane %v4054_v2, %v4057_v47 }
 0x1e6   :  { %1362 = vmatpush2.bf16.msra.mxu0 %v607_v43  ;;  %v927_v43 = vunpack.c.l.s8.bf16 %v504_v30 }
 0x1e7   :  { %1405 = vmatpush2.bf16.msra.mxu1 %v735_v45  ;;  %1417 = vmatprep.subr.bf16.mxu0 %v856_v46  ;;  %v1025_v45 = vpop.f32.mrf.mxu0  ;;  %v1070_v46 = vpop.f32.mrf.mxu1 }
 0x1e8   :  { %1460 = vmatprep.subr.bf16.mxu1 %v984_v58  ;;  %v920_v58 = vunpack.c.h.s8.bf16 %v497_v41 }
 0x1e9   :  { %1364 = vmatmul.mubr.bf16.vlgmr.msra.gmra.mxu0 %v4003_v50 }
 0x1ea   :  { %1407 = vmatmul.mubr.bf16.vlgmr.msra.gmra.mxu1 %v4007_v52  ;;  %1418 = vmatpush1.bf16.msra.mxu0 %v855_v48  ;;  %v338_v48 = vld [vmem:[#allocation2 + $0xf0] sm:$0xff] }
 0x1eb   :  { %1461 = vmatpush1.bf16.msra.mxu1 %v983_v55  ;;  %1419 = vmatprep.subr.bf16.mxu0 %v848_v61  ;;  %v1150_v55 = vpop.f32.mrf.mxu1  ;;  %v4044_v61 = vsub.s32 0, %v4041_v44  ;;  %v601_v19 = vunpack.c.h.s8.bf16 %v338_v48 }
 0x1ec   :  { %1462 = vmatprep.subr.bf16.mxu1 %v976_v62  ;;  %1492 = vmatprep.mubr.bf16.mxu1 %v3788_v3  ;;  %v4049_v62 = vld [vmem:[%s4297_s11] sm:$0xff] }
 0x1ed   :  { %1449 = vmatprep.mubr.bf16.mxu0 %v4011_v0  ;;  %v1680_v7 = vrot.slane %v4049_v62, %v4044_v61  ;;  %v1738_v13 = vrot.slane %v4054_v2, %v4044_v61 }
 0x1ee   :  { %1420 = vmatpush1.bf16.msra.mxu0 %v847_v36  ;;  %v1027_v36 = vpop.f32.mrf.mxu0 }
 0x1ef   :  { %1463 = vmatpush1.bf16.msra.mxu1 %v975_v49  ;;  %1421 = vmatprep.subr.bf16.mxu0 %v840_v51  ;;  %v912_v49 = vunpack.c.l.s8.bf16 %v497_v41  ;;  %v594_v51 = vunpack.c.l.s8.bf16 %v339_v42 }
 0x1f0   :  { %1464 = vmatprep.subr.bf16.mxu1 %v968_v1  ;;  %v1065_v1 = vadd.f32 %v1064_v17, %v1021_v25  ;;  %v330_v17 = vld [vmem:[#allocation2 + $0xb0] sm:$0xff] }
 0x1f2   :  { %1422 = vmatpush1.bf16.msra.mxu0 %v839_v54  ;;  %v4059_v54 = vld [vmem:[#allocation2 + $0x5a8] sm:$0xff] }
 0x1f3   :  { %1465 = vmatpush1.bf16.msra.mxu1 %v967_v4  ;;  %1423 = vmatprep.subr.bf16.mxu0 %v832_v5  ;;  %v4061_v4 = vld [vmem:[#allocation2 + $0xb8] sm:$0xff]  ;;  %v1152_v5 = vpop.f32.mrf.mxu1 }
 0x1f4   :  { %1466 = vmatprep.subr.bf16.mxu1 %v960_v6 }
 0x1f5   :  { %v1154_v25 = vpop.f32.mrf.mxu1 }
 0x1f6   :  { %1424 = vmatpush1.bf16.msra.mxu0 %v831_v9 }
 0x1f7   :  { %1467 = vmatpush1.bf16.msra.mxu1 %v959_v10  ;;  %1425 = vmatprep.subr.bf16.mxu0 %v824_v11  ;;  %v911_v10 = vunpack.c.l.s8.bf16 %v496_v60  ;;  %v593_v11 = vunpack.c.l.s8.bf16 %v338_v48  ;;  %v577_v48 = vunpack.c.l.s8.bf16 %v330_v17 }
 0x1f8   :  { %1468 = vmatprep.subr.bf16.mxu1 %v952_v12  ;;  %v4066_v12 = vld [vmem:[#allocation2 + $0x5a0] sm:$0xff] }
 0x1f9   :  { %v895_v60 = vunpack.c.l.s8.bf16 %v4066_v12 }
 0x1fa   :  { %1426 = vmatpush1.bf16.msra.mxu0 %v823_v15  ;;  %v904_v15 = vunpack.c.h.s8.bf16 %v4059_v54 }
 0x1fb   :  { %1469 = vmatpush1.bf16.msra.mxu1 %v951_v16  ;;  %1427 = vmatprep.subr.bf16.mxu0 %v816_v18  ;;  %v586_v16 = vunpack.c.h.s8.bf16 %v4061_v4  ;;  %v1069_v18 = vadd.f32 %v1068_v37, %v1025_v45  ;;  %v481_v45 = vld [vmem:[#allocation2 + $0x568] sm:$0xff] }
 0x1fc   :  { %1470 = vmatprep.subr.bf16.mxu1 %v944_v20 }
 0x1fe   :  { %1428 = vmatpush1.bf16.msra.mxu0 %v815_v23  ;;  %v1684_v23 = vrot.slane %v4049_v62, %v4057_v47 }
 0x1ff   :  { %1471 = vmatpush1.bf16.msra.mxu1 %v943_v24  ;;  %1429 = vmatprep.subr.bf16.mxu0 %v808_v27  ;;  %v1071_v24 = vadd.f32 %v1070_v46, %v1027_v36  ;;  %v323_v46 = vld [vmem:[#allocation2 + $0x78] sm:$0xff] }
 0x200   :  { %1472 = vmatprep.subr.bf16.mxu1 %v936_v28  ;;  %v903_v28 = vunpack.c.h.s8.bf16 %v4066_v12 }
 0x202   :  { %1430 = vmatpush1.bf16.msra.mxu0 %v807_v33 }
 0x203   :  { %1473 = vmatpush1.bf16.msra.mxu1 %v935_v34  ;;  %1431 = vmatprep.subr.bf16.mxu0 %v800_v38  ;;  %v585_v34 = vunpack.c.h.s8.bf16 %v330_v17  ;;  %v578_v38 = vunpack.c.l.s8.bf16 %v4061_v4  ;;  %v570_v4 = vunpack.c.h.s8.bf16 %v323_v46  ;;  %v880_v17 = vunpack.c.l.s8.bf16 %v481_v45 }
 0x204   :  { %1474 = vmatprep.subr.bf16.mxu1 %v928_v39 }
 0x206   :  { %1432 = vmatpush1.bf16.msra.mxu0 %v799_v53  ;;  %v1815_v53 = vld [vmem:[#allocation12 + $0x40] sm:$0xff] }
 0x207   :  { %1475 = vmatpush1.bf16.msra.mxu1 %v927_v43  ;;  %1433 = vmatprep.subr.bf16.mxu0 %v920_v58  ;;  %v1156_v58 = vpop.f32.mrf.mxu1 }
 0x208   :  { %1503 = vmatprep.subr.bf16.mxu1 %v602_v59  ;;  %v1824_v59 = vmul.f32 0.5, %v1808_v31 }
 0x209   :  { %v1107_v6 = vpop.f32.mrf.mxu0 }
 0x20a   :  { %1493 = vmatmul.mubr.bf16.vlgmr.msra.gmra.mxu1 %v4019_v40  ;;  %v1108_v9 = vadd.f32 %v1107_v6, %v1065_v1  ;;  %1434 = vmatpush2.bf16.msra.mxu0 %v919_v63  ;;  %v1831_v1 = vmul.f32 0.5, %v1815_v53  ;;  %v402_v53 = vld [vmem:[#allocation2 + $0x2f0] sm:$0xff] }
 0x20b   :  { %1504 = vmatpush1.bf16.msra.mxu1 %v601_v19  ;;  %v1109_v14 = vpop.f32.mrf.mxu0  ;;  %1435 = vmatprep.subr.bf16.mxu0 %v912_v49  ;;  %v1816_v49 = vld [vmem:[#allocation12 + $0x48] sm:$0xff] }
 0x20c   :  { %1505 = vmatprep.subr.bf16.mxu1 %v594_v51  ;;  %v1151_v20 = vadd.f32 %v1150_v55, %v1108_v9  ;;  %v1110_v22 = vadd.f32 %v1109_v14, %v1067_v8  ;;  %1535 = vmatprep.mubr.bf16.mxu1 %v3995_v56  ;;  %v896_v56 = vunpack.c.l.s8.bf16 %v4059_v54  ;;  %v480_v51 = vld [vmem:[#allocation2 + $0x560] sm:$0xff]  ;;  %v888_v54 = vunpack.c.h.s8.bf16 %v481_v45 }
 0x20d   :  { %v1111_v27 = vpop.f32.mrf.mxu0  ;;  %v887_v12 = vunpack.c.h.s8.bf16 %v480_v51  ;;  %v729_v45 = vunpack.c.h.s8.bf16 %v402_v53 }
 0x20e   :  { %v1717_v29 = vmul.f32 %v1680_v7, %v1151_v20  ;;  %v1153_v30 = vadd.f32 %v1152_v5, %v1110_v22  ;;  %v1112_v33 = vadd.f32 %v1111_v27, %v1069_v18  ;;  %1436 = vmatpush2.bf16.msra.mxu0 %v911_v10  ;;  %v322_v5 = vld [vmem:[#allocation2 + $0x70] sm:$0xff]  ;;  %v562_v18 = vunpack.c.l.s8.bf16 %v323_v46  ;;  %v473_v22 = vld [vmem:[#allocation2 + $0x528] sm:$0xff] }
 0x20f   :  { %1506 = vmatpush1.bf16.msra.mxu1 %v593_v11  ;;  %v1113_v37 = vpop.f32.mrf.mxu0  ;;  %1437 = vmatprep.subr.bf16.mxu0 %v904_v15  ;;  %v1832_v11 = vmul.f32 0.5, %v1816_v49  ;;  %v394_v49 = vld [vmem:[#allocation2 + $0x2b0] sm:$0xff] }
 0x210   :  { %1507 = vmatprep.subr.bf16.mxu1 %v586_v16  ;;  %v1775_v39 = vadd.f32 %v1738_v13, %v1717_v29  ;;  %v1718_v41 = vmul.f32 %v1684_v23, %v1153_v30  ;;  %v1155_v42 = vadd.f32 %v1154_v25, %v1112_v33  ;;  %v1114_v43 = vadd.f32 %v1113_v37, %v1071_v24  ;;  %v315_v24 = vld [vmem:[#allocation2 + $0x38] sm:$0xff]  ;;  %v314_v29 = vld [vmem:[#allocation2 + $0x30] sm:$0xff] }
 0x211   :  { %v569_v16 = vunpack.c.h.s8.bf16 %v322_v5  ;;  %v561_v25 = vunpack.c.l.s8.bf16 %v322_v5  ;;  %v554_v27 = vunpack.c.h.s8.bf16 %v315_v24  ;;  %v553_v31 = vunpack.c.h.s8.bf16 %v314_v29  ;;  %v403_v37 = vld [vmem:[#allocation2 + $0x2f8] sm:$0xff] }
 0x212   :  { %v1791_v55 = vmax.f32 %v1775_v39, 0.0  ;;  %v1776_v63 = vadd.f32 %v1742_v26, %v1718_v41  ;;  %v1725_v19 = vmul.f32 %v1680_v7, %v1155_v42  ;;  %v1157_v36 = vadd.f32 %v1156_v58, %v1114_v43  ;;  %1438 = vmatpush2.bf16.msra.mxu0 %v903_v28  ;;  %v472_v28 = vld [vmem:[#allocation2 + $0x520] sm:$0xff]  ;;  %v370_v42 = vld [vmem:[#allocation2 + $0x1f0] sm:$0xff]  ;;  %v355_v5 = vld [vmem:[#allocation2 + $0x178] sm:$0xff] }
 0x213   :  { %1508 = vmatpush1.bf16.msra.mxu1 %v585_v34  ;;  %1439 = vmatprep.subr.bf16.mxu0 %v896_v56  ;;  %v871_v30 = vunpack.c.h.s8.bf16 %v472_v28  ;;  %v864_v33 = vunpack.c.l.s8.bf16 %v473_v22  ;;  %v546_v34 = vunpack.c.l.s8.bf16 %v315_v24  ;;  %v863_v56 = vunpack.c.l.s8.bf16 %v472_v28  ;;  %v378_v28 = vld [vmem:[#allocation2 + $0x230] sm:$0xff] }
 0x214   :  { %1509 = vmatprep.subr.bf16.mxu1 %v578_v38  ;;  %v4081_v6 = vadd.f32 %v1823_v35, %v1791_v55  ;;  %v1792_v8 = vmax.f32 %v1776_v63, 0.0  ;;  %v1783_v9 = vadd.f32 %v1738_v13, %v1725_v19  ;;  %v1726_v10 = vmul.f32 %v1684_v23, %v1157_v36  ;;  %v371_v35 = vld [vmem:[#allocation2 + $0x1f8] sm:$0xff]  ;;  %v362_v36 = vld [vmem:[#allocation2 + $0x1b0] sm:$0xff] }
 0x215   :  { %v879_v23 = vunpack.c.l.s8.bf16 %v480_v51  ;;  %v545_v38 = vunpack.c.l.s8.bf16 %v314_v29  ;;  %v666_v39 = vunpack.c.h.s8.bf16 %v371_v35  ;;  %v730_v41 = vunpack.c.h.s8.bf16 %v403_v37 }
 0x216   :  { %v4083_v14 = vadd.f32 %v1824_v59, %v1792_v8  ;;  %v1799_v7 = vmax.f32 %v1783_v9, 0.0  ;;  %v1784_v15 = vadd.f32 %v1742_v26, %v1726_v10  ;;  %1440 = vmatpush2.bf16.msra.mxu0 %v895_v60  ;;  %v872_v26 = vunpack.c.h.s8.bf16 %v473_v22  ;;  %v363_v59 = vld [vmem:[#allocation2 + $0x1b8] sm:$0xff] }
 0x217   :  { %1510 = vmatpush1.bf16.msra.mxu1 %v577_v48  ;;  %1441 = vmatprep.subr.bf16.mxu0 %v888_v54  ;;  %v665_v43 = vunpack.c.h.s8.bf16 %v370_v42  ;;  %v658_v46 = vunpack.c.l.s8.bf16 %v371_v35  ;;  %v722_v58 = vunpack.c.l.s8.bf16 %v403_v37  ;;  %v395_v60 = vld [vmem:[#allocation2 + $0x2b8] sm:$0xff]  ;;  %v657_v48 = vunpack.c.l.s8.bf16 %v370_v42  ;;  %v466_v42 = vld [vmem:[#allocation2 + $0x4f0] sm:$0xff] }
 0x218   :  { %1511 = vmatprep.subr.bf16.mxu1 %v570_v4  ;;  %v4085_v20 = vadd.f32 %v1831_v1, %v1799_v7  ;;  %v1800_v21 = vmax.f32 %v1784_v15, 0.0  ;;  %v721_v55 = vunpack.c.l.s8.bf16 %v402_v53  ;;  %v650_v63 = vunpack.c.h.s8.bf16 %v363_v59  ;;  %v387_v8 = vld [vmem:[#allocation2 + $0x278] sm:$0xff]  ;;  %v354_v7 = vld [vmem:[#allocation2 + $0x170] sm:$0xff] }
 0x219   :  { %v714_v19 = vunpack.c.h.s8.bf16 %v395_v60  ;;  %v649_v51 = vunpack.c.h.s8.bf16 %v362_v36  ;;  %v713_v1 = vunpack.c.h.s8.bf16 %v394_v49  ;;  %v642_v54 = vunpack.c.l.s8.bf16 %v363_v59  ;;  %v379_v22 = vld [vmem:[#allocation2 + $0x238] sm:$0xff] }
 0x21a   :  { %v4087_v13 = vadd.f32 %v1832_v11, %v1800_v21  ;;  %1442 = vmatpush2.bf16.msra.mxu0 %v887_v12  ;;  %v706_v4 = vunpack.c.l.s8.bf16 %v395_v60  ;;  %v641_v9 = vunpack.c.l.s8.bf16 %v362_v36  ;;  %v705_v10 = vunpack.c.l.s8.bf16 %v394_v49  ;;  %v347_v21 = vld [vmem:[#allocation2 + $0x138] sm:$0xff]  ;;  %v458_v36 = vld [vmem:[#allocation2 + $0x4b0] sm:$0xff] }
 0x21b   :  { %1512 = vmatpush1.bf16.msra.mxu1 %v569_v16  ;;  %1443 = vmatprep.subr.bf16.mxu0 %v880_v17  ;;  %v634_v11 = vunpack.c.h.s8.bf16 %v355_v5  ;;  %v698_v12 = vunpack.c.h.s8.bf16 %v387_v8  ;;  %v633_v15 = vunpack.c.h.s8.bf16 %v354_v7  ;;  %v626_v17 = vunpack.c.l.s8.bf16 %v355_v5  ;;  %v467_v35 = vld [vmem:[#allocation2 + $0x4f8] sm:$0xff] }
 0x21c   :  { %1513 = vmatprep.subr.bf16.mxu1 %v562_v18  ;;  %v690_v18 = vunpack.c.l.s8.bf16 %v387_v8  ;;  %v625_v24 = vunpack.c.l.s8.bf16 %v354_v7  ;;  %v459_v59 = vld [vmem:[#allocation2 + $0x4b8] sm:$0xff]  ;;  %v833_v8 = vunpack.c.l.s8.bf16 %v458_v36 }
 0x21e   :  { %1444 = vmatpush2.bf16.msra.mxu0 %v879_v23 }
 0x21f   :  { %1514 = vmatpush1.bf16.msra.mxu1 %v561_v25  ;;  %1445 = vmatprep.subr.bf16.mxu0 %v872_v26  ;;  %v618_v25 = vunpack.c.h.s8.bf16 %v347_v21  ;;  %v682_v26 = vunpack.c.h.s8.bf16 %v379_v22 }
 0x220   :  { %1515 = vmatprep.subr.bf16.mxu1 %v554_v27  ;;  %v346_v27 = vld [vmem:[#allocation2 + $0x130] sm:$0xff] }
 0x221   :  { %v617_v29 = vunpack.c.h.s8.bf16 %v346_v27  ;;  %v609_v37 = vunpack.c.l.s8.bf16 %v346_v27  ;;  %v442_v27 = vld [vmem:[#allocation2 + $0x430] sm:$0xff] }
 0x222   :  { %1446 = vmatpush2.bf16.msra.mxu0 %v871_v30  ;;  %v681_v30 = vunpack.c.h.s8.bf16 %v378_v28 }
 0x223   :  { %1516 = vmatpush1.bf16.msra.mxu1 %v553_v31  ;;  %1447 = vmatprep.subr.bf16.mxu0 %v864_v33  ;;  %v610_v31 = vunpack.c.l.s8.bf16 %v347_v21  ;;  %v674_v33 = vunpack.c.l.s8.bf16 %v379_v22 }
 0x224   :  { %1517 = vmatprep.subr.bf16.mxu1 %v546_v34  ;;  %v435_v34 = vld [vmem:[#allocation2 + $0x3f8] sm:$0xff] }
 0x226   :  { %1448 = vmatpush2.bf16.msra.mxu0 %v863_v56  ;;  %v673_v56 = vunpack.c.l.s8.bf16 %v378_v28 }
 0x227   :  { %1518 = vmatpush1.bf16.msra.mxu1 %v545_v38  ;;  %1546 = vmatprep.subr.bf16.mxu0 %v730_v41  ;;  %v794_v38 = vunpack.c.h.s8.bf16 %v435_v34  ;;  %v434_v41 = vld [vmem:[#allocation2 + $0x3f0] sm:$0xff] }
 0x228   :  { %1519 = vmatprep.subr.bf16.mxu1 %v666_v39  ;;  %v858_v39 = vunpack.c.h.s8.bf16 %v467_v35  ;;  %v793_v53 = vunpack.c.h.s8.bf16 %v434_v41  ;;  %v785_v60 = vunpack.c.l.s8.bf16 %v434_v41 }
 0x229   :  { %1450 = vmatmul.mubr.bf16.vlgmr.msra.gmra.mxu0 %v4025_v32 }
 0x22a   :  { %1547 = vmatpush1.bf16.msra.mxu0 %v729_v45  ;;  %1578 = vmatprep.mubr.bf16.mxu0 %v3997_v57  ;;  %v386_v57 = vld [vmem:[#allocation2 + $0x270] sm:$0xff]  ;;  %v786_v45 = vunpack.c.l.s8.bf16 %v435_v34  ;;  %v1193_v22 = vpop.f32.mrf.mxu1 }
 0x22b   :  { %1520 = vmatpush2.bf16.msra.mxu1 %v665_v43  ;;  %1548 = vmatprep.subr.bf16.mxu0 %v722_v58  ;;  %v697_v16 = vunpack.c.h.s8.bf16 %v386_v57  ;;  %v689_v23 = vunpack.c.l.s8.bf16 %v386_v57  ;;  %v857_v43 = vunpack.c.h.s8.bf16 %v466_v42  ;;  %v427_v58 = vld [vmem:[#allocation2 + $0x3b8] sm:$0xff] }
 0x22c   :  { %1521 = vmatprep.subr.bf16.mxu1 %v658_v46  ;;  %v850_v46 = vunpack.c.l.s8.bf16 %v467_v35  ;;  %v499_v35 = vld [vmem:[#allocation2 + $0x5f8] sm:$0xff] }
 0x22e   :  { %1549 = vmatpush1.bf16.msra.mxu0 %v721_v55  ;;  %v778_v55 = vunpack.c.h.s8.bf16 %v427_v58 }
 0x22f   :  { %1522 = vmatpush2.bf16.msra.mxu1 %v657_v48  ;;  %1550 = vmatprep.subr.bf16.mxu0 %v714_v19  ;;  %v849_v48 = vunpack.c.l.s8.bf16 %v466_v42  ;;  %v426_v19 = vld [vmem:[#allocation2 + $0x3b0] sm:$0xff]  ;;  %v922_v42 = vunpack.c.h.s8.bf16 %v499_v35 }
 0x230   :  { %1523 = vmatprep.subr.bf16.mxu1 %v650_v63  ;;  %v842_v63 = vunpack.c.h.s8.bf16 %v459_v59  ;;  %v777_v49 = vunpack.c.h.s8.bf16 %v426_v19  ;;  %v769_v5 = vunpack.c.l.s8.bf16 %v426_v19 }
 0x232   :  { %1551 = vmatpush1.bf16.msra.mxu0 %v713_v1  ;;  %v770_v1 = vunpack.c.l.s8.bf16 %v427_v58 }
 0x233   :  { %1524 = vmatpush2.bf16.msra.mxu1 %v649_v51  ;;  %1552 = vmatprep.subr.bf16.mxu0 %v706_v4  ;;  %v841_v51 = vunpack.c.h.s8.bf16 %v458_v36  ;;  %v451_v4 = vld [vmem:[#allocation2 + $0x478] sm:$0xff]  ;;  %v4097_v36 = vsub.s32 3, %v4041_v44 }
 0x234   :  { %1525 = vmatprep.subr.bf16.mxu1 %v642_v54  ;;  %v419_v54 = vld [vmem:[#allocation2 + $0x378] sm:$0xff] }
 0x235   :  { %v754_v57 = vunpack.c.l.s8.bf16 %v419_v54 }
 0x236   :  { %1553 = vmatpush1.bf16.msra.mxu0 %v705_v10  ;;  %v826_v10 = vunpack.c.h.s8.bf16 %v451_v4 }
 0x237   :  { %1526 = vmatpush2.bf16.msra.mxu1 %v641_v9  ;;  %1554 = vmatprep.subr.bf16.mxu0 %v698_v12  ;;  %v762_v9 = vunpack.c.h.s8.bf16 %v419_v54 }
 0x238   :  { %1527 = vmatprep.subr.bf16.mxu1 %v634_v11  ;;  %v418_v11 = vld [vmem:[#allocation2 + $0x370] sm:$0xff] }
 0x239   :  { %v761_v12 = vunpack.c.h.s8.bf16 %v418_v11 }
 0x23a   :  { %1555 = vmatpush1.bf16.msra.mxu0 %v697_v16  ;;  %v411_v16 = vld [vmem:[#allocation2 + $0x338] sm:$0xff] }
 0x23b   :  { %1528 = vmatpush2.bf16.msra.mxu1 %v633_v15  ;;  %1556 = vmatprep.subr.bf16.mxu0 %v690_v18  ;;  %v818_v15 = vunpack.c.l.s8.bf16 %v451_v4  ;;  %v753_v18 = vunpack.c.l.s8.bf16 %v418_v11 }
 0x23c   :  { %1529 = vmatprep.subr.bf16.mxu1 %v626_v17  ;;  %v443_v17 = vld [vmem:[#allocation2 + $0x438] sm:$0xff] }
 0x23d   :  { %v802_v34 = vunpack.c.l.s8.bf16 %v443_v17 }
 0x23e   :  { %1557 = vmatpush1.bf16.msra.mxu0 %v689_v23  ;;  %v746_v23 = vunpack.c.h.s8.bf16 %v411_v16 }
 0x23f   :  { %1530 = vmatpush2.bf16.msra.mxu1 %v625_v24  ;;  %1558 = vmatprep.subr.bf16.mxu0 %v682_v26  ;;  %v410_v26 = vld [vmem:[#allocation2 + $0x330] sm:$0xff] }
 0x240   :  { %1531 = vmatprep.subr.bf16.mxu1 %v618_v25  ;;  %v810_v25 = vunpack.c.h.s8.bf16 %v443_v17  ;;  %v745_v28 = vunpack.c.h.s8.bf16 %v410_v26  ;;  %v1809_v17 = vld [vmem:[#allocation12 + $0x10] sm:$0xff] }
 0x242   :  { %1559 = vmatpush1.bf16.msra.mxu0 %v681_v30  ;;  %v1195_v30 = vpop.f32.mrf.mxu1 }
 0x243   :  { %1532 = vmatpush2.bf16.msra.mxu1 %v617_v29  ;;  %1560 = vmatprep.subr.bf16.mxu0 %v674_v33  ;;  %v809_v29 = vunpack.c.h.s8.bf16 %v442_v27  ;;  %v738_v33 = vunpack.c.l.s8.bf16 %v411_v16 }
 0x244   :  { %1533 = vmatprep.subr.bf16.mxu1 %v610_v31 }
 0x246   :  { %1561 = vmatpush1.bf16.msra.mxu0 %v673_v56  ;;  %v737_v56 = vunpack.c.l.s8.bf16 %v410_v26 }
 0x247   :  { %1534 = vmatpush2.bf16.msra.mxu1 %v609_v37  ;;  %1562 = vmatprep.subr.bf16.mxu0 %v794_v38  ;;  %v531_v37 = vld [vmem:[#allocation2 + $0x6f8] sm:$0xff]  ;;  %v801_v38 = vunpack.c.l.s8.bf16 %v442_v27 }
 0x248   :  { %1589 = vmatprep.subr.bf16.mxu1 %v858_v39  ;;  %v1197_v39 = vpop.f32.mrf.mxu1 }
 0x249   :  { %v1236_v24 = vpop.f32.mrf.mxu0 }
 0x24a   :  { %1536 = vmatmul.mubr.bf16.vlgmr.msra.gmra.mxu1 %v4003_v50  ;;  %1563 = vmatpush2.bf16.msra.mxu0 %v793_v53  ;;  %v834_v50 = vunpack.c.l.s8.bf16 %v459_v59  ;;  %v986_v53 = vunpack.c.h.s8.bf16 %v531_v37  ;;  %v1237_v19 = vadd.f32 %v1236_v24, %v1193_v22  ;;  %v1750_v24 = vrot.slane %v4054_v2, %v4097_v36 }
 0x24b   :  { %1590 = vmatpush1.bf16.msra.mxu1 %v857_v43  ;;  %1564 = vmatprep.subr.bf16.mxu0 %v786_v45  ;;  %v1238_v31 = vpop.f32.mrf.mxu0  ;;  %v498_v43 = vld [vmem:[#allocation2 + $0x5f0] sm:$0xff] }
 0x24c   :  { %1591 = vmatprep.subr.bf16.mxu1 %v850_v46  ;;  %1621 = vmatprep.mubr.bf16.mxu1 %v4011_v0  ;;  %v450_v0 = vld [vmem:[#allocation2 + $0x470] sm:$0xff]  ;;  %v4094_v46 = vsub.s32 2, %v4041_v44  ;;  %v921_v58 = vunpack.c.h.s8.bf16 %v498_v43  ;;  %v1239_v4 = vadd.f32 %v1238_v31, %v1195_v30 }
 0x24d   :  { %v825_v7 = vunpack.c.h.s8.bf16 %v450_v0  ;;  %v817_v21 = vunpack.c.l.s8.bf16 %v450_v0  ;;  %v1240_v41 = vpop.f32.mrf.mxu0  ;;  %v530_v45 = vld [vmem:[#allocation2 + $0x6f0] sm:$0xff] }
 0x24e   :  { %1565 = vmatpush2.bf16.msra.mxu0 %v785_v60  ;;  %v985_v59 = vunpack.c.h.s8.bf16 %v530_v45  ;;  %v1199_v60 = vpop.f32.mrf.mxu1  ;;  %v1688_v54 = vrot.slane %v4049_v62, %v4094_v46  ;;  %v1746_v11 = vrot.slane %v4054_v2, %v4094_v46 }
 0x24f   :  { %1592 = vmatpush1.bf16.msra.mxu1 %v849_v48  ;;  %1566 = vmatprep.subr.bf16.mxu0 %v778_v55  ;;  %v1242_v48 = vpop.f32.mrf.mxu0  ;;  %v914_v55 = vunpack.c.l.s8.bf16 %v499_v35 }
 0x250   :  { %1593 = vmatprep.subr.bf16.mxu1 %v842_v63  ;;  %v978_v63 = vunpack.c.l.s8.bf16 %v531_v37  ;;  %v1243_v22 = vadd.f32 %v1242_v48, %v1199_v60 }
 0x252   :  { %1567 = vmatpush2.bf16.msra.mxu0 %v777_v49  ;;  %v4099_v49 = vld [vmem:[#allocation2 + $0x5b8] sm:$0xff] }
 0x253   :  { %1594 = vmatpush1.bf16.msra.mxu1 %v841_v51  ;;  %1568 = vmatprep.subr.bf16.mxu0 %v770_v1  ;;  %v4101_v51 = vld [vmem:[#allocation2 + $0x6b8] sm:$0xff] }
 0x254   :  { %1595 = vmatprep.subr.bf16.mxu1 %v834_v50  ;;  %v962_v35 = vunpack.c.l.s8.bf16 %v4101_v51 }
 0x256   :  { %1569 = vmatpush2.bf16.msra.mxu0 %v769_v5 }
 0x257   :  { %1596 = vmatpush1.bf16.msra.mxu1 %v833_v8  ;;  %1570 = vmatprep.subr.bf16.mxu0 %v762_v9  ;;  %v913_v8 = vunpack.c.l.s8.bf16 %v498_v43  ;;  %v977_v9 = vunpack.c.l.s8.bf16 %v530_v45 }
 0x258   :  { %1597 = vmatprep.subr.bf16.mxu1 %v826_v10  ;;  %v4106_v10 = vld [vmem:[#allocation2 + $0x5b0] sm:$0xff] }
 0x259   :  { %v905_v26 = vunpack.c.h.s8.bf16 %v4106_v10 }
 0x25a   :  { %1571 = vmatpush2.bf16.msra.mxu0 %v761_v12 }
 0x25b   :  { %1598 = vmatpush1.bf16.msra.mxu1 %v825_v7  ;;  %1572 = vmatprep.subr.bf16.mxu0 %v754_v57  ;;  %v906_v7 = vunpack.c.h.s8.bf16 %v4099_v49  ;;  %v970_v57 = vunpack.c.h.s8.bf16 %v4101_v51 }
 0x25c   :  { %1599 = vmatprep.subr.bf16.mxu1 %v818_v15  ;;  %v1241_v15 = vadd.f32 %v1240_v41, %v1197_v39  ;;  %v1817_v39 = vld [vmem:[#allocation12 + $0x50] sm:$0xff] }
 0x25d   :  { %v1833_v51 = vmul.f32 0.5, %v1817_v39 }
 0x25e   :  { %1573 = vmatpush2.bf16.msra.mxu0 %v753_v18 }
 0x25f   :  { %1600 = vmatpush1.bf16.msra.mxu1 %v817_v21  ;;  %1574 = vmatprep.subr.bf16.mxu0 %v746_v23  ;;  %v1692_v21 = vrot.slane %v4049_v62, %v4097_v36 }
 0x260   :  { %1601 = vmatprep.subr.bf16.mxu1 %v810_v25 }
 0x262   :  { %1575 = vmatpush2.bf16.msra.mxu0 %v745_v28 }
 0x263   :  { %1602 = vmatpush1.bf16.msra.mxu1 %v809_v29  ;;  %1576 = vmatprep.subr.bf16.mxu0 %v738_v33  ;;  %v1810_v29 = vld [vmem:[#allocation12 + $0x18] sm:$0xff]  ;;  %v1825_v33 = vmul.f32 0.5, %v1809_v17 }
 0x264   :  { %1603 = vmatprep.subr.bf16.mxu1 %v802_v34  ;;  %v1826_v43 = vmul.f32 0.5, %v1810_v29 }
 0x266   :  { %1577 = vmatpush2.bf16.msra.mxu0 %v737_v56 }
 0x267   :  { %1604 = vmatpush1.bf16.msra.mxu1 %v801_v38  ;;  %1632 = vmatprep.subr.bf16.mxu0 %v986_v53  ;;  %v515_v53 = vld [vmem:[#allocation2 + $0x678] sm:$0xff] }
 0x268   :  { %1605 = vmatprep.subr.bf16.mxu1 %v922_v42  ;;  %v483_v42 = vld [vmem:[#allocation2 + $0x578] sm:$0xff] }
 0x269   :  { %v1322_v50 = vpop.f32.mrf.mxu0  ;;  %1579 = vmatmul.mubr.bf16.vlgmr.msra.gmra.mxu0 %v4007_v52  ;;  %v522_v52 = vld [vmem:[#allocation2 + $0x6b0] sm:$0xff] }
 0x26a   :  { %v1279_v1 = vpop.f32.mrf.mxu1  ;;  %1633 = vmatpush1.bf16.msra.mxu0 %v985_v59  ;;  %1664 = vmatprep.mubr.bf16.mxu0 %v3788_v3  ;;  %v969_v31 = vunpack.c.h.s8.bf16 %v522_v52  ;;  %v898_v3 = vunpack.c.l.s8.bf16 %v4099_v49  ;;  %v961_v59 = vunpack.c.l.s8.bf16 %v522_v52  ;;  %v482_v49 = vld [vmem:[#allocation2 + $0x570] sm:$0xff] }
 0x26b   :  { %v1280_v5 = vadd.f32 %v1279_v1, %v1237_v19  ;;  %1606 = vmatpush2.bf16.msra.mxu1 %v921_v58  ;;  %v1324_v12 = vpop.f32.mrf.mxu0  ;;  %1634 = vmatprep.subr.bf16.mxu0 %v978_v63  ;;  %v897_v58 = vunpack.c.l.s8.bf16 %v4106_v10  ;;  %v1818_v19 = vld [vmem:[#allocation12 + $0x58] sm:$0xff]  ;;  %v890_v1 = vunpack.c.h.s8.bf16 %v483_v42 }
 0x26c   :  { %v1281_v0 = vpop.f32.mrf.mxu1  ;;  %1607 = vmatprep.subr.bf16.mxu1 %v914_v55 }
 0x26d   :  { %v1323_v16 = vadd.f32 %v1322_v50, %v1280_v5  ;;  %v1282_v18 = vadd.f32 %v1281_v0, %v1239_v4  ;;  %v1326_v25 = vpop.f32.mrf.mxu0  ;;  %v954_v50 = vunpack.c.h.s8.bf16 %v515_v53  ;;  %v514_v4 = vld [vmem:[#allocation2 + $0x670] sm:$0xff]  ;;  %v1834_v0 = vmul.f32 0.5, %v1818_v19 }
 0x26e   :  { %v1283_v23 = vpop.f32.mrf.mxu1  ;;  %1635 = vmatpush1.bf16.msra.mxu0 %v977_v9  ;;  %v953_v52 = vunpack.c.h.s8.bf16 %v514_v4 }
 0x26f   :  { %v1719_v27 = vmul.f32 %v1688_v54, %v1323_v16  ;;  %v1325_v28 = vadd.f32 %v1324_v12, %v1282_v18  ;;  %v1284_v30 = vadd.f32 %v1283_v23, %v1241_v15  ;;  %1608 = vmatpush2.bf16.msra.mxu1 %v913_v8  ;;  %1636 = vmatprep.subr.bf16.mxu0 %v970_v57  ;;  %v1328_v45 = vpop.f32.mrf.mxu0  ;;  %v889_v12 = vunpack.c.h.s8.bf16 %v482_v49  ;;  %v507_v23 = vld [vmem:[#allocation2 + $0x638] sm:$0xff] }
 0x270   :  { %v1285_v34 = vpop.f32.mrf.mxu1  ;;  %1609 = vmatprep.subr.bf16.mxu1 %v906_v7  ;;  %v882_v15 = vunpack.c.l.s8.bf16 %v483_v42  ;;  %v946_v16 = vunpack.c.l.s8.bf16 %v515_v53 }
 0x271   :  { %v1777_v37 = vadd.f32 %v1746_v11, %v1719_v27  ;;  %v1720_v56 = vmul.f32 %v1692_v21, %v1325_v28  ;;  %v1327_v38 = vadd.f32 %v1326_v25, %v1284_v30  ;;  %v1286_v41 = vadd.f32 %v1285_v34, %v1243_v22  ;;  %v475_v22 = vld [vmem:[#allocation2 + $0x538] sm:$0xff]  ;;  %v474_v27 = vld [vmem:[#allocation2 + $0x530] sm:$0xff] }
 0x272   :  { %1637 = vmatpush1.bf16.msra.mxu0 %v969_v31  ;;  %v945_v25 = vunpack.c.l.s8.bf16 %v514_v4  ;;  %v506_v28 = vld [vmem:[#allocation2 + $0x630] sm:$0xff]  ;;  %v873_v29 = vunpack.c.h.s8.bf16 %v474_v27  ;;  %v866_v31 = vunpack.c.l.s8.bf16 %v475_v22  ;;  %v865_v34 = vunpack.c.l.s8.bf16 %v474_v27 }
 0x273   :  { %v1793_v60 = vmax.f32 %v1777_v37, 0.0  ;;  %v1778_v48 = vadd.f32 %v1750_v24, %v1720_v56  ;;  %v1727_v55 = vmul.f32 %v1688_v54, %v1327_v38  ;;  %v1329_v63 = vadd.f32 %v1328_v45, %v1286_v41  ;;  %1610 = vmatpush2.bf16.msra.mxu1 %v905_v26  ;;  %1638 = vmatprep.subr.bf16.mxu0 %v962_v35 }
 0x274   :  { %1611 = vmatprep.subr.bf16.mxu1 %v898_v3  ;;  %v938_v26 = vunpack.c.h.s8.bf16 %v507_v23  ;;  %v937_v30 = vunpack.c.h.s8.bf16 %v506_v28  ;;  %v929_v3 = vunpack.c.l.s8.bf16 %v506_v28 }
 0x275   :  { %v4121_v5 = vadd.f32 %v1825_v33, %v1793_v60  ;;  %v1794_v8 = vmax.f32 %v1778_v48, 0.0  ;;  %v1785_v9 = vadd.f32 %v1746_v11, %v1727_v55  ;;  %v1728_v10 = vmul.f32 %v1692_v21, %v1329_v63 }
 0x276   :  { %1639 = vmatpush1.bf16.msra.mxu0 %v961_v59  ;;  %v881_v21 = vunpack.c.l.s8.bf16 %v482_v49  ;;  %v930_v33 = vunpack.c.l.s8.bf16 %v507_v23  ;;  %v1699_v59 = vsub.s32 5, %v4041_v44 }
 0x277   :  { %v4123_v7 = vadd.f32 %v1826_v43, %v1794_v8  ;;  %v1801_v54 = vmax.f32 %v1785_v9, 0.0  ;;  %v1786_v57 = vadd.f32 %v1750_v24, %v1728_v10  ;;  %1612 = vmatpush2.bf16.msra.mxu1 %v897_v58  ;;  %1640 = vmatprep.subr.bf16.mxu0 %v954_v50  ;;  %v874_v24 = vunpack.c.h.s8.bf16 %v475_v22 }
 0x278   :  { %1613 = vmatprep.subr.bf16.mxu1 %v890_v1  ;;  %v1695_v43 = vsub.s32 4, %v4041_v44  ;;  %v1811_v1 = vld [vmem:[#allocation12 + $0x20] sm:$0xff]  ;;  %v1700_v4 = vrot.slane %v4049_v62, %v1699_v59  ;;  %v1758_v9 = vrot.slane %v4054_v2, %v1699_v59 }
 0x279   :  { %v4125_v17 = vadd.f32 %v1833_v51, %v1801_v54  ;;  %v1802_v18 = vmax.f32 %v1786_v57, 0.0  ;;  %v1812_v57 = vld [vmem:[#allocation12 + $0x28] sm:$0xff] }
 0x27a   :  { %1641 = vmatpush1.bf16.msra.mxu0 %v953_v52  ;;  %v1754_v63 = vrot.slane %v4054_v2, %v1695_v43 }
 0x27b   :  { %v4127_v11 = vadd.f32 %v1834_v0, %v1802_v18  ;;  %1614 = vmatpush2.bf16.msra.mxu1 %v889_v12  ;;  %1642 = vmatprep.subr.bf16.mxu0 %v946_v16 }
 0x27c   :  { %1615 = vmatprep.subr.bf16.mxu1 %v882_v15  ;;  %v1827_v15 = vmul.f32 0.5, %v1811_v1 }
 0x27e   :  { %1643 = vmatpush1.bf16.msra.mxu0 %v945_v25 }
 0x27f   :  { %1616 = vmatpush2.bf16.msra.mxu1 %v881_v21  ;;  %1644 = vmatprep.subr.bf16.mxu0 %v938_v26  ;;  %v1819_v21 = vld [vmem:[#allocation12 + $0x60] sm:$0xff]  ;;  %v1828_v26 = vmul.f32 0.5, %v1812_v57  ;;  %v1813_v57 = vld [vmem:[#allocation12 + $0x30] sm:$0xff] }
 0x280   :  { %1617 = vmatprep.subr.bf16.mxu1 %v874_v24 }
 0x282   :  { %1645 = vmatpush1.bf16.msra.mxu0 %v937_v30 }
 0x283   :  { %1618 = vmatpush2.bf16.msra.mxu1 %v873_v29  ;;  %1646 = vmatprep.subr.bf16.mxu0 %v930_v33  ;;  %v1820_v33 = vld [vmem:[#allocation12 + $0x68] sm:$0xff] }
 0x284   :  { %1619 = vmatprep.subr.bf16.mxu1 %v866_v31  ;;  %v1835_v31 = vmul.f32 0.5, %v1819_v21 }
 0x286   :  { %1647 = vmatpush1.bf16.msra.mxu0 %v929_v3 }
 0x287   :  { %1620 = vmatpush2.bf16.msra.mxu1 %v865_v34 }
 0x289   :  { %1665 = vmatmul.mubr.bf16.vlgmr.msra.gmra.mxu0 %v4019_v40  ;;  %v1696_v40 = vrot.slane %v4049_v62, %v1695_v43 }
 0x28a   :  { %1622 = vmatmul.mubr.bf16.vlgmr.msra.gmra.mxu1 %v4025_v32 }
 0x2a9   :  { %v1365_v37 = vpop.f32.mrf.mxu0 }
 0x2aa   :  { %v1408_v35 = vpop.f32.mrf.mxu1 }
 0x2ab   :  { %v1367_v38 = vpop.f32.mrf.mxu0  ;;  %v1409_v58 = vadd.f32 %v1408_v35, %v1365_v37 }
 0x2ac   :  { %v1410_v56 = vpop.f32.mrf.mxu1 }
 0x2ad   :  { %v1369_v41 = vpop.f32.mrf.mxu0  ;;  %v1411_v55 = vadd.f32 %v1410_v56, %v1367_v38 }
 0x2ae   :  { %v1412_v39 = vpop.f32.mrf.mxu1 }
 0x2af   :  { %v1371_v45 = vpop.f32.mrf.mxu0  ;;  %v1413_v49 = vadd.f32 %v1412_v39, %v1369_v41  ;;  %v1836_v41 = vmul.f32 0.5, %v1820_v33 }
 0x2b0   :  { %v1414_v42 = vpop.f32.mrf.mxu1 }
 0x2b1   :  { %v1415_v0 = vadd.f32 %v1414_v42, %v1371_v45 }
 0x2ca   :  { %v1494_v53 = vpop.f32.mrf.mxu1 }
 0x2cc   :  { %v1496_v60 = vpop.f32.mrf.mxu1 }
 0x2ce   :  { %v1498_v8 = vpop.f32.mrf.mxu1 }
 0x2d0   :  { %v1500_v24 = vpop.f32.mrf.mxu1 }
 0x2e9   :  { %v1451_v48 = vpop.f32.mrf.mxu0 }
 0x2ea   :  { %v1452_v32 = vadd.f32 %v1451_v48, %v1409_v58 }
 0x2eb   :  { %v1453_v19 = vpop.f32.mrf.mxu0 }
 0x2ec   :  { %v1495_v51 = vadd.f32 %v1494_v53, %v1452_v32  ;;  %v1454_v50 = vadd.f32 %v1453_v19, %v1411_v55  ;;  %v1703_v32 = vsub.s32 6, %v4041_v44 }
 0x2ed   :  { %v1455_v10 = vpop.f32.mrf.mxu0 }
 0x2ee   :  { %v1721_v12 = vmul.f32 %v1696_v40, %v1495_v51  ;;  %v1497_v54 = vadd.f32 %v1496_v60, %v1454_v50  ;;  %v1456_v52 = vadd.f32 %v1455_v10, %v1413_v49  ;;  %v1707_v49 = vsub.s32 7, %v4041_v44 }
 0x2ef   :  { %v1457_v16 = vpop.f32.mrf.mxu0 }
 0x2f0   :  { %v1779_v18 = vadd.f32 %v1754_v63, %v1721_v12  ;;  %v1722_v22 = vmul.f32 %v1700_v4, %v1497_v54  ;;  %v1499_v23 = vadd.f32 %v1498_v8, %v1456_v52  ;;  %v1458_v25 = vadd.f32 %v1457_v16, %v1415_v0 }
 0x2f1   :  { %v1704_v8 = vrot.slane %v4049_v62, %v1703_v32  ;;  %v1766_v44 = vrot.slane %v4054_v2, %v1707_v49 }
 0x2f2   :  { %v1795_v27 = vmax.f32 %v1779_v18, 0.0  ;;  %v1780_v28 = vadd.f32 %v1758_v9, %v1722_v22  ;;  %v1729_v29 = vmul.f32 %v1696_v40, %v1499_v23  ;;  %v1501_v30 = vadd.f32 %v1500_v24, %v1458_v25  ;;  %v1814_v25 = vld [vmem:[#allocation12 + $0x38] sm:$0xff] }
 0x2f4   :  { %v4137_v34 = vadd.f32 %v1827_v15, %v1795_v27  ;;  %v1796_v3 = vmax.f32 %v1780_v28, 0.0  ;;  %v1787_v35 = vadd.f32 %v1754_v63, %v1729_v29  ;;  %v1730_v37 = vmul.f32 %v1700_v4, %v1501_v30  ;;  %v3421_v15 = vld [vmem:[%s4297_s11] sm:$0xff] }
 0x2f5   :  { %v1708_v16 = vrot.slane %v3421_v15, %v1707_v49 }
 0x2f6   :  { %v4139_v56 = vadd.f32 %v1828_v26, %v1796_v3  ;;  %v1803_v38 = vmax.f32 %v1787_v35, 0.0  ;;  %v1788_v39 = vadd.f32 %v1758_v9, %v1730_v37  ;;  %v1762_v9 = vrot.slane %v4054_v2, %v1703_v32 }
 0x2f7   :  { %v1829_v26 = vmul.f32 0.5, %v1813_v57  ;;  %v1830_v3 = vmul.f32 0.5, %v1814_v25 }
 0x2f8   :  { %v4141_v42 = vadd.f32 %v1835_v31, %v1803_v38  ;;  %v1804_v53 = vmax.f32 %v1788_v39, 0.0  ;;  %v1821_v31 = vld [vmem:[#allocation12 + $0x70] sm:$0xff] }
 0x2fa   :  { %v4143_v43 = vadd.f32 %v1836_v41, %v1804_v53  ;;  %v1837_v41 = vmul.f32 0.5, %v1821_v31  ;;  %v1822_v53 = vld [vmem:[#allocation12 + $0x78] sm:$0xff] }
 0x30a   :  { %v1537_v45 = vpop.f32.mrf.mxu1 }
 0x30c   :  { %v1539_v59 = vpop.f32.mrf.mxu1 }
 0x30e   :  { %v1541_v48 = vpop.f32.mrf.mxu1 }
 0x310   :  { %v1543_v40 = vpop.f32.mrf.mxu1 }
 0x329   :  { %v1580_v58 = vpop.f32.mrf.mxu0 }
 0x32a   :  { %v1581_v19 = vadd.f32 %v1580_v58, %v1537_v45 }
 0x32b   :  { %v1582_v60 = vpop.f32.mrf.mxu0 }
 0x32c   :  { %v1583_v50 = vadd.f32 %v1582_v60, %v1539_v59 }
 0x32d   :  { %v1584_v55 = vpop.f32.mrf.mxu0 }
 0x32e   :  { %v1585_v12 = vadd.f32 %v1584_v55, %v1541_v48 }
 0x32f   :  { %v1586_v63 = vpop.f32.mrf.mxu0 }
 0x330   :  { %v1587_v23 = vadd.f32 %v1586_v63, %v1543_v40  ;;  %v1838_v40 = vmul.f32 0.5, %v1822_v53 }
 0x349   :  { %v1666_v1 = vpop.f32.mrf.mxu0 }
 0x34a   :  { %v1623_v51 = vpop.f32.mrf.mxu1 }
 0x34b   :  { %v1624_v4 = vadd.f32 %v1623_v51, %v1581_v19  ;;  %v1668_v0 = vpop.f32.mrf.mxu0 }
 0x34c   :  { %v1625_v10 = vpop.f32.mrf.mxu1 }
 0x34d   :  { %v1667_v54 = vadd.f32 %v1666_v1, %v1624_v4  ;;  %v1626_v52 = vadd.f32 %v1625_v10, %v1583_v50  ;;  %v1670_v22 = vpop.f32.mrf.mxu0 }
 0x34e   :  { %v1627_v18 = vpop.f32.mrf.mxu1 }
 0x34f   :  { %v1723_v21 = vmul.f32 %v1704_v8, %v1667_v54  ;;  %v1669_v62 = vadd.f32 %v1668_v0, %v1626_v52  ;;  %v1628_v24 = vadd.f32 %v1627_v18, %v1585_v12  ;;  %v1672_v35 = vpop.f32.mrf.mxu0 }
 0x350   :  { %v1629_v27 = vpop.f32.mrf.mxu1 }
 0x351   :  { %v1781_v28 = vadd.f32 %v1762_v9, %v1723_v21  ;;  %v1724_v29 = vmul.f32 %v1708_v16, %v1669_v62  ;;  %v1671_v30 = vadd.f32 %v1670_v22, %v1628_v24  ;;  %v1630_v33 = vadd.f32 %v1629_v27, %v1587_v23 }
 0x353   :  { %v1797_v37 = vmax.f32 %v1781_v28, 0.0  ;;  %v1782_v38 = vadd.f32 %v1766_v44, %v1724_v29  ;;  %v1731_v39 = vmul.f32 %v1704_v8, %v1671_v30  ;;  %v1673_v2 = vadd.f32 %v1672_v35, %v1630_v33 }
 0x355   :  { %v4153_v45 = vadd.f32 %v1829_v26, %v1797_v37  ;;  %v1798_v58 = vmax.f32 %v1782_v38, 0.0  ;;  %v1789_v59 = vadd.f32 %v1762_v9, %v1731_v39  ;;  %v1732_v60 = vmul.f32 %v1708_v16, %v1673_v2 }
 0x357   :  { %v4155_v48 = vadd.f32 %v1830_v3, %v1798_v58  ;;  %v1805_v55 = vmax.f32 %v1789_v59, 0.0  ;;  %v1790_v32 = vadd.f32 %v1766_v44, %v1732_v60 }
 0x359   :  { %v4157_v63 = vadd.f32 %v1837_v41, %v1805_v55  ;;  %v1806_v19 = vmax.f32 %v1790_v32, 0.0 }
 0x35b   :  { %v4159_v49 = vadd.f32 %v1838_v40, %v1806_v19 }
 0x35c   :  { %3756 = dma.done.wait [#allocation6 + $0x1], 16384 }
 0x35d   :  { %3757 = vsyncadd [#allocation6 + $0x1], 4294950912  ;;  %v4163_v51 = vpack.c.bf16 %v4087_v13, %v4083_v14  ;;  %v4167_v1 = vpack.c.bf16 %v4127_v11, %v4123_v7  ;;  %v1872_v50 = vld [vmem:[#allocation3 + $0x68] sm:$0xff]  ;;  %v1871_v8 = vld [vmem:[#allocation3 + $0x60] sm:$0xff] }
 0x35e   :  { %v1904_v4 = vld [vmem:[#allocation3 + $0x168] sm:$0xff]  ;;  %v2020_v9 = vunpack.c.l.s8.bf16 %v1872_v50  ;;  %v2024_v10 = vunpack.c.h.s8.bf16 %v1872_v50  ;;  %v1903_v54 = vld [vmem:[#allocation3 + $0x160] sm:$0xff]  ;;  %v2023_v57 = vunpack.c.h.s8.bf16 %v1871_v8  ;;  %v2019_v7 = vunpack.c.l.s8.bf16 %v1871_v8 }
 0x35f   :  { %2283 = vmatprep.mubr.bf16.mxu0 %v4163_v51  ;;  %2326 = vmatprep.mubr.bf16.mxu1 %v4167_v1  ;;  %v2084_v0 = vunpack.c.l.s8.bf16 %v1904_v4  ;;  %v2088_v12 = vunpack.c.h.s8.bf16 %v1904_v4  ;;  %v2087_v52 = vunpack.c.h.s8.bf16 %v1903_v54  ;;  %v1868_v14 = vld [vmem:[#allocation3 + $0x48] sm:$0xff]  ;;  %v2083_v11 = vunpack.c.l.s8.bf16 %v1903_v54  ;;  %v1867_v44 = vld [vmem:[#allocation3 + $0x40] sm:$0xff] }
 0x360   :  { %v1900_v13 = vld [vmem:[#allocation3 + $0x148] sm:$0xff]  ;;  %2251 = vmatprep.subr.bf16.mxu0 %v2024_v10  ;;  %v2016_v15 = vunpack.c.h.s8.bf16 %v1868_v14  ;;  %v1899_v18 = vld [vmem:[#allocation3 + $0x140] sm:$0xff]  ;;  %v2015_v22 = vunpack.c.h.s8.bf16 %v1867_v44  ;;  %v2012_v21 = vunpack.c.l.s8.bf16 %v1868_v14  ;;  %v2011_v26 = vunpack.c.l.s8.bf16 %v1867_v44 }
 0x361   :  { %2294 = vmatprep.subr.bf16.mxu1 %v2088_v12  ;;  %2252 = vmatpush1.bf16.msra.mxu0 %v2023_v57  ;;  %v2080_v16 = vunpack.c.h.s8.bf16 %v1900_v13  ;;  %v2079_v23 = vunpack.c.h.s8.bf16 %v1899_v18  ;;  %v2076_v62 = vunpack.c.l.s8.bf16 %v1900_v13  ;;  %v1864_v25 = vld [vmem:[#allocation3 + $0x28] sm:$0xff]  ;;  %v2075_v27 = vunpack.c.l.s8.bf16 %v1899_v18  ;;  %v1863_v30 = vld [vmem:[#allocation3 + $0x20] sm:$0xff] }
 0x362   :  { %2295 = vmatpush1.bf16.msra.mxu1 %v2087_v52  ;;  %2253 = vmatprep.subr.bf16.mxu0 %v2020_v9  ;;  %v1896_v24 = vld [vmem:[#allocation3 + $0x128] sm:$0xff]  ;;  %v2008_v28 = vunpack.c.h.s8.bf16 %v1864_v25  ;;  %v1895_v31 = vld [vmem:[#allocation3 + $0x120] sm:$0xff]  ;;  %v2007_v33 = vunpack.c.h.s8.bf16 %v1863_v30  ;;  %v2004_v35 = vunpack.c.l.s8.bf16 %v1864_v25  ;;  %v2003_v2 = vunpack.c.l.s8.bf16 %v1863_v30 }
 0x363   :  { %2296 = vmatprep.subr.bf16.mxu1 %v2084_v0  ;;  %v2072_v29 = vunpack.c.h.s8.bf16 %v1896_v24  ;;  %v2071_v3 = vunpack.c.h.s8.bf16 %v1895_v31  ;;  %v2068_v37 = vunpack.c.l.s8.bf16 %v1896_v24  ;;  %v1860_v38 = vld [vmem:[#allocation3 + $0x8] sm:$0xff]  ;;  %v2067_v41 = vunpack.c.l.s8.bf16 %v1895_v31  ;;  %v1859_v59 = vld [vmem:[#allocation3] sm:$0xff] }
 0x364   :  { %v1892_v39 = vld [vmem:[#allocation3 + $0x108] sm:$0xff]  ;;  %v2000_v53 = vunpack.c.h.s8.bf16 %v1860_v38  ;;  %v1891_v60 = vld [vmem:[#allocation3 + $0x100] sm:$0xff]  ;;  %v1999_v55 = vunpack.c.h.s8.bf16 %v1859_v59  ;;  %v1996_v40 = vunpack.c.l.s8.bf16 %v1860_v38  ;;  %v1995_v8 = vunpack.c.l.s8.bf16 %v1859_v59 }
 0x365   :  { %2254 = vmatpush1.bf16.msra.mxu0 %v2019_v7  ;;  %v2064_v58 = vunpack.c.h.s8.bf16 %v1892_v39  ;;  %v2063_v32 = vunpack.c.h.s8.bf16 %v1891_v60  ;;  %v2060_v19 = vunpack.c.l.s8.bf16 %v1892_v39  ;;  %v1888_v50 = vld [vmem:[#allocation3 + $0xe8] sm:$0xff]  ;;  %v2059_v9 = vunpack.c.l.s8.bf16 %v1891_v60  ;;  %v1887_v12 = vld [vmem:[#allocation3 + $0xe0] sm:$0xff] }
 0x366   :  { %2297 = vmatpush1.bf16.msra.mxu1 %v2083_v11  ;;  %2255 = vmatprep.subr.bf16.mxu0 %v2016_v15  ;;  %v1920_v4 = vld [vmem:[#allocation3 + $0x1e8] sm:$0xff]  ;;  %v2056_v10 = vunpack.c.h.s8.bf16 %v1888_v50  ;;  %v1919_v54 = vld [vmem:[#allocation3 + $0x1e0] sm:$0xff]  ;;  %v2055_v57 = vunpack.c.h.s8.bf16 %v1887_v12  ;;  %v2052_v14 = vunpack.c.l.s8.bf16 %v1888_v50  ;;  %v2051_v15 = vunpack.c.l.s8.bf16 %v1887_v12 }
 0x367   :  { %2298 = vmatprep.subr.bf16.mxu1 %v2080_v16  ;;  %v2120_v0 = vunpack.c.h.s8.bf16 %v1920_v4  ;;  %v2119_v52 = vunpack.c.h.s8.bf16 %v1919_v54  ;;  %v2116_v13 = vunpack.c.l.s8.bf16 %v1920_v4  ;;  %v1884_v7 = vld [vmem:[#allocation3 + $0xc8] sm:$0xff]  ;;  %v2115_v16 = vunpack.c.l.s8.bf16 %v1919_v54 }
 0x368   :  { %v1916_v11 = vld [vmem:[#allocation3 + $0x1c8] sm:$0xff]  ;;  %v2048_v44 = vunpack.c.h.s8.bf16 %v1884_v7  ;;  %v2044_v25 = vunpack.c.l.s8.bf16 %v1884_v7 }
 0x369   :  { %2256 = vmatpush1.bf16.msra.mxu0 %v2015_v22  ;;  %v2112_v18 = vunpack.c.h.s8.bf16 %v1916_v11  ;;  %v1883_v22 = vld [vmem:[#allocation3 + $0xc0] sm:$0xff]  ;;  %v2108_v24 = vunpack.c.l.s8.bf16 %v1916_v11 }
 0x36a   :  { %2299 = vmatpush1.bf16.msra.mxu1 %v2079_v23  ;;  %2257 = vmatprep.subr.bf16.mxu0 %v2012_v21  ;;  %v1915_v23 = vld [vmem:[#allocation3 + $0x1c0] sm:$0xff]  ;;  %v2047_v21 = vunpack.c.h.s8.bf16 %v1883_v22 }
 0x36b   :  { %2300 = vmatprep.subr.bf16.mxu1 %v2076_v62  ;;  %v2111_v62 = vunpack.c.h.s8.bf16 %v1915_v23 }
 0x36d   :  { %2258 = vmatpush1.bf16.msra.mxu0 %v2011_v26  ;;  %v1880_v26 = vld [vmem:[#allocation3 + $0xa8] sm:$0xff] }
 0x36e   :  { %2301 = vmatpush1.bf16.msra.mxu1 %v2075_v27  ;;  %2259 = vmatprep.subr.bf16.mxu0 %v2008_v28  ;;  %v1912_v27 = vld [vmem:[#allocation3 + $0x1a8] sm:$0xff]  ;;  %v2043_v28 = vunpack.c.l.s8.bf16 %v1883_v22  ;;  %v2040_v30 = vunpack.c.h.s8.bf16 %v1880_v26  ;;  %v2036_v38 = vunpack.c.l.s8.bf16 %v1880_v26  ;;  %v4181_v22 = vpack.c.bf16 %v4143_v43, %v4139_v56 }
 0x36f   :  { %2302 = vmatprep.subr.bf16.mxu1 %v2072_v29  ;;  %v2107_v29 = vunpack.c.l.s8.bf16 %v1915_v23  ;;  %v2104_v31 = vunpack.c.h.s8.bf16 %v1912_v27  ;;  %v2100_v39 = vunpack.c.l.s8.bf16 %v1912_v27 }
 0x371   :  { %2260 = vmatpush1.bf16.msra.mxu0 %v2007_v33  ;;  %v1879_v33 = vld [vmem:[#allocation3 + $0xa0] sm:$0xff] }
 0x372   :  { %2303 = vmatpush1.bf16.msra.mxu1 %v2071_v3  ;;  %2261 = vmatprep.subr.bf16.mxu0 %v2004_v35  ;;  %v1911_v3 = vld [vmem:[#allocation3 + $0x1a0] sm:$0xff]  ;;  %v2039_v35 = vunpack.c.h.s8.bf16 %v1879_v33 }
 0x373   :  { %2304 = vmatprep.subr.bf16.mxu1 %v2068_v37  ;;  %v2103_v37 = vunpack.c.h.s8.bf16 %v1911_v3 }
 0x375   :  { %2262 = vmatpush1.bf16.msra.mxu0 %v2003_v2  ;;  %v1876_v2 = vld [vmem:[#allocation3 + $0x88] sm:$0xff] }
 0x376   :  { %2305 = vmatpush1.bf16.msra.mxu1 %v2067_v41  ;;  %2263 = vmatprep.subr.bf16.mxu0 %v2000_v53  ;;  %v1908_v41 = vld [vmem:[#allocation3 + $0x188] sm:$0xff]  ;;  %v2035_v53 = vunpack.c.l.s8.bf16 %v1879_v33  ;;  %v2032_v59 = vunpack.c.h.s8.bf16 %v1876_v2  ;;  %v2028_v50 = vunpack.c.l.s8.bf16 %v1876_v2 }
 0x377   :  { %2306 = vmatprep.subr.bf16.mxu1 %v2064_v58  ;;  %v2099_v58 = vunpack.c.l.s8.bf16 %v1911_v3  ;;  %v2096_v60 = vunpack.c.h.s8.bf16 %v1908_v41  ;;  %v2092_v4 = vunpack.c.l.s8.bf16 %v1908_v41 }
 0x379   :  { %2264 = vmatpush1.bf16.msra.mxu0 %v1999_v55  ;;  %v1875_v55 = vld [vmem:[#allocation3 + $0x80] sm:$0xff] }
 0x37a   :  { %2307 = vmatpush1.bf16.msra.mxu1 %v2063_v32  ;;  %2265 = vmatprep.subr.bf16.mxu0 %v1996_v40  ;;  %v1907_v32 = vld [vmem:[#allocation3 + $0x180] sm:$0xff]  ;;  %v2031_v40 = vunpack.c.h.s8.bf16 %v1875_v55 }
 0x37b   :  { %2308 = vmatprep.subr.bf16.mxu1 %v2060_v19  ;;  %v2095_v19 = vunpack.c.h.s8.bf16 %v1907_v32 }
 0x37d   :  { %2266 = vmatpush1.bf16.msra.mxu0 %v1995_v8  ;;  %v1936_v8 = vld [vmem:[#allocation3 + $0x268] sm:$0xff] }
 0x37e   :  { %2309 = vmatpush1.bf16.msra.mxu1 %v2059_v9  ;;  %2267 = vmatprep.subr.bf16.mxu0 %v2056_v10  ;;  %v1968_v9 = vld [vmem:[#allocation3 + $0x368] sm:$0xff]  ;;  %v2027_v10 = vunpack.c.l.s8.bf16 %v1875_v55  ;;  %v2152_v12 = vunpack.c.h.s8.bf16 %v1936_v8 }
 0x37f   :  { %2310 = vmatprep.subr.bf16.mxu1 %v2120_v0  ;;  %v2091_v0 = vunpack.c.l.s8.bf16 %v1907_v32  ;;  %v2216_v54 = vunpack.c.h.s8.bf16 %v1968_v9 }
 0x381   :  { %2268 = vmatpush2.bf16.msra.mxu0 %v2055_v57  ;;  %v1935_v57 = vld [vmem:[#allocation3 + $0x260] sm:$0xff] }
 0x382   :  { %2311 = vmatpush2.bf16.msra.mxu1 %v2119_v52  ;;  %2269 = vmatprep.subr.bf16.mxu0 %v2052_v14  ;;  %v1967_v52 = vld [vmem:[#allocation3 + $0x360] sm:$0xff]  ;;  %v4173_v14 = vpack.c.bf16 %v4085_v20, %v4081_v6  ;;  %v2151_v7 = vunpack.c.h.s8.bf16 %v1935_v57  ;;  %v4185_v6 = vpack.c.bf16 %v4159_v49, %v4155_v48  ;;  %v2147_v20 = vunpack.c.l.s8.bf16 %v1935_v57 }
 0x383   :  { %2312 = vmatprep.subr.bf16.mxu1 %v2116_v13  ;;  %v4177_v13 = vpack.c.bf16 %v4125_v17, %v4121_v5  ;;  %v2215_v11 = vunpack.c.h.s8.bf16 %v1967_v52  ;;  %v2211_v5 = vunpack.c.l.s8.bf16 %v1967_v52 }
 0x385   :  { %2270 = vmatpush2.bf16.msra.mxu0 %v2051_v15  ;;  %v2148_v15 = vunpack.c.l.s8.bf16 %v1936_v8 }
 0x386   :  { %2313 = vmatpush2.bf16.msra.mxu1 %v2115_v16  ;;  %2271 = vmatprep.subr.bf16.mxu0 %v2048_v44  ;;  %v2212_v16 = vunpack.c.l.s8.bf16 %v1968_v9  ;;  %v1932_v44 = vld [vmem:[#allocation3 + $0x248] sm:$0xff] }
 0x387   :  { %2314 = vmatprep.subr.bf16.mxu1 %v2112_v18  ;;  %v1964_v18 = vld [vmem:[#allocation3 + $0x348] sm:$0xff]  ;;  %v2144_v17 = vunpack.c.h.s8.bf16 %v1932_v44  ;;  %v2140_v48 = vunpack.c.l.s8.bf16 %v1932_v44 }
 0x388   :  { %v2208_v23 = vunpack.c.h.s8.bf16 %v1964_v18  ;;  %v2204_v49 = vunpack.c.l.s8.bf16 %v1964_v18 }
 0x389   :  { %2272 = vmatpush2.bf16.msra.mxu0 %v2047_v21  ;;  %v1931_v21 = vld [vmem:[#allocation3 + $0x240] sm:$0xff] }
 0x38a   :  { %2315 = vmatpush2.bf16.msra.mxu1 %v2111_v62  ;;  %2273 = vmatprep.subr.bf16.mxu0 %v2044_v25  ;;  %v1963_v62 = vld [vmem:[#allocation3 + $0x340] sm:$0xff]  ;;  %v2143_v56 = vunpack.c.h.s8.bf16 %v1931_v21  ;;  %v1928_v25 = vld [vmem:[#allocation3 + $0x228] sm:$0xff]  ;;  %v2139_v26 = vunpack.c.l.s8.bf16 %v1931_v21 }
 0x38b   :  { %2316 = vmatprep.subr.bf16.mxu1 %v2108_v24  ;;  %v2207_v43 = vunpack.c.h.s8.bf16 %v1963_v62  ;;  %v1960_v24 = vld [vmem:[#allocation3 + $0x328] sm:$0xff]  ;;  %v2203_v27 = vunpack.c.l.s8.bf16 %v1963_v62 }
 0x38d   :  { %2274 = vmatpush2.bf16.msra.mxu0 %v2043_v28  ;;  %v2136_v28 = vunpack.c.h.s8.bf16 %v1928_v25 }
 0x38e   :  { %2317 = vmatpush2.bf16.msra.mxu1 %v2107_v29  ;;  %2275 = vmatprep.subr.bf16.mxu0 %v2040_v30  ;;  %v2200_v29 = vunpack.c.h.s8.bf16 %v1960_v24  ;;  %v1927_v30 = vld [vmem:[#allocation3 + $0x220] sm:$0xff] }
 0x38f   :  { %2318 = vmatprep.subr.bf16.mxu1 %v2104_v31  ;;  %v1959_v31 = vld [vmem:[#allocation3 + $0x320] sm:$0xff]  ;;  %v2135_v33 = vunpack.c.h.s8.bf16 %v1927_v30  ;;  %v2131_v2 = vunpack.c.l.s8.bf16 %v1927_v30 }
 0x390   :  { %v2199_v3 = vunpack.c.h.s8.bf16 %v1959_v31  ;;  %v2195_v41 = vunpack.c.l.s8.bf16 %v1959_v31 }
 0x391   :  { %2276 = vmatpush2.bf16.msra.mxu0 %v2039_v35  ;;  %v2132_v35 = vunpack.c.l.s8.bf16 %v1928_v25 }
 0x392   :  { %2319 = vmatpush2.bf16.msra.mxu1 %v2103_v37  ;;  %2277 = vmatprep.subr.bf16.mxu0 %v2036_v38  ;;  %v2196_v37 = vunpack.c.l.s8.bf16 %v1960_v24  ;;  %v1924_v38 = vld [vmem:[#allocation3 + $0x208] sm:$0xff] }
 0x393   :  { %2320 = vmatprep.subr.bf16.mxu1 %v2100_v39  ;;  %v1956_v39 = vld [vmem:[#allocation3 + $0x308] sm:$0xff] }
 0x395   :  { %2278 = vmatpush2.bf16.msra.mxu0 %v2035_v53  ;;  %v2128_v53 = vunpack.c.h.s8.bf16 %v1924_v38 }
 0x396   :  { %2321 = vmatpush2.bf16.msra.mxu1 %v2099_v58  ;;  %2279 = vmatprep.subr.bf16.mxu0 %v2032_v59  ;;  %v2192_v58 = vunpack.c.h.s8.bf16 %v1956_v39  ;;  %v1923_v59 = vld [vmem:[#allocation3 + $0x200] sm:$0xff] }
 0x397   :  { %2322 = vmatprep.subr.bf16.mxu1 %v2096_v60  ;;  %v1955_v60 = vld [vmem:[#allocation3 + $0x300] sm:$0xff]  ;;  %v2127_v55 = vunpack.c.h.s8.bf16 %v1923_v59  ;;  %v2123_v8 = vunpack.c.l.s8.bf16 %v1923_v59 }
 0x398   :  { %v2191_v32 = vunpack.c.h.s8.bf16 %v1955_v60  ;;  %v2187_v9 = vunpack.c.l.s8.bf16 %v1955_v60 }
 0x399   :  { %2280 = vmatpush2.bf16.msra.mxu0 %v2031_v40  ;;  %v2124_v40 = vunpack.c.l.s8.bf16 %v1924_v38 }
 0x39a   :  { %2323 = vmatpush2.bf16.msra.mxu1 %v2095_v19  ;;  %2281 = vmatprep.subr.bf16.mxu0 %v2028_v50  ;;  %v2188_v19 = vunpack.c.l.s8.bf16 %v1956_v39  ;;  %v1952_v50 = vld [vmem:[#allocation3 + $0x2e8] sm:$0xff] }
 0x39b   :  { %2324 = vmatprep.subr.bf16.mxu1 %v2092_v4  ;;  %v1984_v4 = vld [vmem:[#allocation3 + $0x3e8] sm:$0xff] }
 0x39d   :  { %2282 = vmatpush2.bf16.msra.mxu0 %v2027_v10  ;;  %v2184_v10 = vunpack.c.h.s8.bf16 %v1952_v50 }
 0x39e   :  { %2325 = vmatpush2.bf16.msra.mxu1 %v2091_v0  ;;  %2337 = vmatprep.subr.bf16.mxu0 %v2152_v12  ;;  %v2248_v0 = vunpack.c.h.s8.bf16 %v1984_v4  ;;  %v1951_v12 = vld [vmem:[#allocation3 + $0x2e0] sm:$0xff] }
 0x39f   :  { %2380 = vmatprep.subr.bf16.mxu1 %v2216_v54  ;;  %v1983_v54 = vld [vmem:[#allocation3 + $0x3e0] sm:$0xff]  ;;  %v2183_v57 = vunpack.c.h.s8.bf16 %v1951_v12  ;;  %v2179_v44 = vunpack.c.l.s8.bf16 %v1951_v12  ;;  %v4193_v12 = vpack.c.bf16 %v4141_v42, %v4137_v34 }
 0x3a0   :  { %2284 = vmatmul.mubr.bf16.vlgmr.msra.gmra.mxu0 %v4173_v14  ;;  %v2247_v52 = vunpack.c.h.s8.bf16 %v1983_v54  ;;  %v2243_v18 = vunpack.c.l.s8.bf16 %v1983_v54  ;;  %v4197_v54 = vpack.c.bf16 %v4157_v63, %v4153_v45 }
 0x3a1   :  { %2327 = vmatmul.mubr.bf16.vlgmr.msra.gmra.mxu1 %v4177_v13  ;;  %2338 = vmatpush1.bf16.msra.mxu0 %v2151_v7  ;;  %v2180_v7 = vunpack.c.l.s8.bf16 %v1952_v50 }
 0x3a2   :  { %2381 = vmatpush1.bf16.msra.mxu1 %v2215_v11  ;;  %2339 = vmatprep.subr.bf16.mxu0 %v2148_v15  ;;  %v2244_v11 = vunpack.c.l.s8.bf16 %v1984_v4  ;;  %v1948_v15 = vld [vmem:[#allocation3 + $0x2c8] sm:$0xff] }
 0x3a3   :  { %2382 = vmatprep.subr.bf16.mxu1 %v2212_v16  ;;  %2369 = vmatprep.mubr.bf16.mxu0 %v4181_v22  ;;  %v1980_v16 = vld [vmem:[#allocation3 + $0x3c8] sm:$0xff] }
 0x3a4   :  { %2412 = vmatprep.mubr.bf16.mxu1 %v4185_v6 }
 0x3a5   :  { %2340 = vmatpush1.bf16.msra.mxu0 %v2147_v20  ;;  %v2176_v20 = vunpack.c.h.s8.bf16 %v1948_v15 }
 0x3a6   :  { %2383 = vmatpush1.bf16.msra.mxu1 %v2211_v5  ;;  %2341 = vmatprep.subr.bf16.mxu0 %v2144_v17  ;;  %v2240_v5 = vunpack.c.h.s8.bf16 %v1980_v16  ;;  %v1947_v17 = vld [vmem:[#allocation3 + $0x2c0] sm:$0xff] }
 0x3a7   :  { %2384 = vmatprep.subr.bf16.mxu1 %v2208_v23  ;;  %v1979_v23 = vld [vmem:[#allocation3 + $0x3c0] sm:$0xff]  ;;  %v2175_v21 = vunpack.c.h.s8.bf16 %v1947_v17  ;;  %v2171_v25 = vunpack.c.l.s8.bf16 %v1947_v17 }
 0x3a8   :  { %v2239_v62 = vunpack.c.h.s8.bf16 %v1979_v23  ;;  %v2235_v24 = vunpack.c.l.s8.bf16 %v1979_v23 }
 0x3a9   :  { %2342 = vmatpush1.bf16.msra.mxu0 %v2143_v56  ;;  %v2172_v56 = vunpack.c.l.s8.bf16 %v1948_v15  ;;  %v1870_v15 = vld [vmem:[#allocation3 + $0x58] sm:$0xff] }
 0x3aa   :  { %2385 = vmatpush1.bf16.msra.mxu1 %v2207_v43  ;;  %2343 = vmatprep.subr.bf16.mxu0 %v2140_v48  ;;  %v2236_v43 = vunpack.c.l.s8.bf16 %v1980_v16  ;;  %v1944_v48 = vld [vmem:[#allocation3 + $0x2a8] sm:$0xff]  ;;  %v1902_v16 = vld [vmem:[#allocation3 + $0x158] sm:$0xff]  ;;  %v2018_v45 = vunpack.c.h.s8.bf16 %v1870_v15  ;;  %v2014_v17 = vunpack.c.l.s8.bf16 %v1870_v15  ;;  %v1885_v15 = vld [vmem:[#allocation3 + $0xd0] sm:$0xff] }
 0x3ab   :  { %2386 = vmatprep.subr.bf16.mxu1 %v2204_v49  ;;  %v1976_v49 = vld [vmem:[#allocation3 + $0x3a8] sm:$0xff]  ;;  %v2082_v63 = vunpack.c.h.s8.bf16 %v1902_v16  ;;  %v2078_v23 = vunpack.c.l.s8.bf16 %v1902_v16  ;;  %v1917_v16 = vld [vmem:[#allocation3 + $0x1d0] sm:$0xff] }
 0x3ad   :  { %2344 = vmatpush1.bf16.msra.mxu0 %v2139_v26  ;;  %v2168_v26 = vunpack.c.h.s8.bf16 %v1944_v48 }
 0x3ae   :  { %2387 = vmatpush1.bf16.msra.mxu1 %v2203_v27  ;;  %2345 = vmatprep.subr.bf16.mxu0 %v2136_v28  ;;  %v2232_v27 = vunpack.c.h.s8.bf16 %v1976_v49  ;;  %v1943_v28 = vld [vmem:[#allocation3 + $0x2a0] sm:$0xff] }
 0x3af   :  { %2388 = vmatprep.subr.bf16.mxu1 %v2200_v29  ;;  %v1975_v29 = vld [vmem:[#allocation3 + $0x3a0] sm:$0xff]  ;;  %v2167_v30 = vunpack.c.h.s8.bf16 %v1943_v28  ;;  %v2163_v38 = vunpack.c.l.s8.bf16 %v1943_v28  ;;  %v1862_v28 = vld [vmem:[#allocation3 + $0x18] sm:$0xff] }
 0x3b0   :  { %v2231_v31 = vunpack.c.h.s8.bf16 %v1975_v29  ;;  %v2227_v39 = vunpack.c.l.s8.bf16 %v1975_v29  ;;  %v1894_v29 = vld [vmem:[#allocation3 + $0x118] sm:$0xff] }
 0x3b1   :  { %2346 = vmatpush1.bf16.msra.mxu0 %v2135_v33  ;;  %v2164_v33 = vunpack.c.l.s8.bf16 %v1944_v48 }
 0x3b2   :  { %2389 = vmatpush1.bf16.msra.mxu1 %v2199_v3  ;;  %2347 = vmatprep.subr.bf16.mxu0 %v2132_v35  ;;  %v2228_v3 = vunpack.c.l.s8.bf16 %v1976_v49  ;;  %v1940_v35 = vld [vmem:[#allocation3 + $0x288] sm:$0xff]  ;;  %v1865_v49 = vld [vmem:[#allocation3 + $0x30] sm:$0xff] }
 0x3b3   :  { %2390 = vmatprep.subr.bf16.mxu1 %v2196_v37  ;;  %v1972_v37 = vld [vmem:[#allocation3 + $0x388] sm:$0xff] }
 0x3b5   :  { %2348 = vmatpush1.bf16.msra.mxu0 %v2131_v2  ;;  %v2160_v2 = vunpack.c.h.s8.bf16 %v1940_v35 }
 0x3b6   :  { %2391 = vmatpush1.bf16.msra.mxu1 %v2195_v41  ;;  %2349 = vmatprep.subr.bf16.mxu0 %v2128_v53  ;;  %v2224_v41 = vunpack.c.h.s8.bf16 %v1972_v37  ;;  %v1939_v53 = vld [vmem:[#allocation3 + $0x280] sm:$0xff] }
 0x3b7   :  { %2392 = vmatprep.subr.bf16.mxu1 %v2192_v58  ;;  %v1971_v58 = vld [vmem:[#allocation3 + $0x380] sm:$0xff]  ;;  %v2159_v59 = vunpack.c.h.s8.bf16 %v1939_v53  ;;  %v2155_v50 = vunpack.c.l.s8.bf16 %v1939_v53  ;;  %v1890_v53 = vld [vmem:[#allocation3 + $0xf8] sm:$0xff] }
 0x3b8   :  { %v2223_v60 = vunpack.c.h.s8.bf16 %v1971_v58  ;;  %v2219_v4 = vunpack.c.l.s8.bf16 %v1971_v58  ;;  %v1922_v58 = vld [vmem:[#allocation3 + $0x1f8] sm:$0xff] }
 0x3b9   :  { %2350 = vmatpush1.bf16.msra.mxu0 %v2127_v55  ;;  %v2156_v55 = vunpack.c.l.s8.bf16 %v1940_v35  ;;  %v1861_v35 = vld [vmem:[#allocation3 + $0x10] sm:$0xff] }
 0x3ba   :  { %2393 = vmatpush1.bf16.msra.mxu1 %v2191_v32  ;;  %2351 = vmatprep.subr.bf16.mxu0 %v2124_v40  ;;  %v2220_v32 = vunpack.c.l.s8.bf16 %v1972_v37  ;;  %v1874_v40 = vld [vmem:[#allocation3 + $0x78] sm:$0xff]  ;;  %v1893_v37 = vld [vmem:[#allocation3 + $0x110] sm:$0xff] }
 0x3bb   :  { %2394 = vmatprep.subr.bf16.mxu1 %v2188_v19  ;;  %v1906_v19 = vld [vmem:[#allocation3 + $0x178] sm:$0xff] }
 0x3bd   :  { %2352 = vmatpush1.bf16.msra.mxu0 %v2123_v8  ;;  %v2026_v8 = vunpack.c.h.s8.bf16 %v1874_v40 }
 0x3be   :  { %2395 = vmatpush1.bf16.msra.mxu1 %v2187_v9  ;;  %2353 = vmatprep.subr.bf16.mxu0 %v2184_v10  ;;  %v2090_v9 = vunpack.c.h.s8.bf16 %v1906_v19  ;;  %v1873_v10 = vld [vmem:[#allocation3 + $0x70] sm:$0xff] }
 0x3bf   :  { %2396 = vmatprep.subr.bf16.mxu1 %v2248_v0  ;;  %v1905_v0 = vld [vmem:[#allocation3 + $0x170] sm:$0xff]  ;;  %v2021_v34 = vunpack.c.l.s8.bf16 %v1873_v10 }
 0x3c0   :  { %v2085_v42 = vunpack.c.l.s8.bf16 %v1905_v0 }
 0x3c1   :  { %2354 = vmatpush2.bf16.msra.mxu0 %v2183_v57  ;;  %v2025_v57 = vunpack.c.h.s8.bf16 %v1873_v10  ;;  %v1886_v10 = vld [vmem:[#allocation3 + $0xd8] sm:$0xff] }
 0x3c2   :  { %2397 = vmatpush2.bf16.msra.mxu1 %v2247_v52  ;;  %2355 = vmatprep.subr.bf16.mxu0 %v2180_v7  ;;  %v2089_v52 = vunpack.c.h.s8.bf16 %v1905_v0  ;;  %v2022_v7 = vunpack.c.l.s8.bf16 %v1874_v40  ;;  %v1889_v40 = vld [vmem:[#allocation3 + $0xf0] sm:$0xff]  ;;  %v1918_v0 = vld [vmem:[#allocation3 + $0x1d8] sm:$0xff] }
 0x3c3   :  { %2398 = vmatprep.subr.bf16.mxu1 %v2244_v11  ;;  %v2086_v11 = vunpack.c.l.s8.bf16 %v1906_v19  ;;  %v1921_v19 = vld [vmem:[#allocation3 + $0x1f0] sm:$0xff] }
 0x3c5   :  { %2356 = vmatpush2.bf16.msra.mxu0 %v2179_v44  ;;  %v1869_v44 = vld [vmem:[#allocation3 + $0x50] sm:$0xff] }
 0x3c6   :  { %2399 = vmatpush2.bf16.msra.mxu1 %v2243_v18  ;;  %2357 = vmatprep.subr.bf16.mxu0 %v2176_v20  ;;  %v1901_v18 = vld [vmem:[#allocation3 + $0x150] sm:$0xff]  ;;  %v2017_v20 = vunpack.c.h.s8.bf16 %v1869_v44 }
 0x3c7   :  { %2400 = vmatprep.subr.bf16.mxu1 %v2240_v5  ;;  %v2081_v5 = vunpack.c.h.s8.bf16 %v1901_v18 }
 0x3c9   :  { %2358 = vmatpush2.bf16.msra.mxu0 %v2175_v21  ;;  %v1866_v21 = vld [vmem:[#allocation3 + $0x38] sm:$0xff] }
 0x3ca   :  { %2401 = vmatpush2.bf16.msra.mxu1 %v2239_v62  ;;  %2359 = vmatprep.subr.bf16.mxu0 %v2172_v56  ;;  %v1898_v62 = vld [vmem:[#allocation3 + $0x138] sm:$0xff]  ;;  %v2013_v56 = vunpack.c.l.s8.bf16 %v1869_v44  ;;  %v2010_v48 = vunpack.c.h.s8.bf16 %v1866_v21 }
 0x3cb   :  { %2402 = vmatprep.subr.bf16.mxu1 %v2236_v43  ;;  %v2077_v43 = vunpack.c.l.s8.bf16 %v1901_v18  ;;  %v1882_v44 = vld [vmem:[#allocation3 + $0xb8] sm:$0xff] }
 0x3cc   :  { %v1914_v18 = vld [vmem:[#allocation3 + $0x1b8] sm:$0xff] }
 0x3cd   :  { %2360 = vmatpush2.bf16.msra.mxu0 %v2171_v25  ;;  %v2009_v25 = vunpack.c.h.s8.bf16 %v1865_v49 }
 0x3ce   :  { %2403 = vmatpush2.bf16.msra.mxu1 %v2235_v24  ;;  %2361 = vmatprep.subr.bf16.mxu0 %v2168_v26  ;;  %v2006_v26 = vunpack.c.l.s8.bf16 %v1866_v21  ;;  %v1881_v21 = vld [vmem:[#allocation3 + $0xb0] sm:$0xff] }
 0x3cf   :  { %2404 = vmatprep.subr.bf16.mxu1 %v2232_v27  ;;  %v2070_v27 = vunpack.c.l.s8.bf16 %v1898_v62 }
 0x3d1   :  { %2362 = vmatpush2.bf16.msra.mxu0 %v2167_v30  ;;  %v2005_v30 = vunpack.c.l.s8.bf16 %v1865_v49  ;;  %v1878_v49 = vld [vmem:[#allocation3 + $0x98] sm:$0xff] }
 0x3d2   :  { %2405 = vmatpush2.bf16.msra.mxu1 %v2231_v31  ;;  %2363 = vmatprep.subr.bf16.mxu0 %v2164_v33  ;;  %v2002_v33 = vunpack.c.h.s8.bf16 %v1862_v28 }
 0x3d3   :  { %2406 = vmatprep.subr.bf16.mxu1 %v2228_v3  ;;  %v2066_v3 = vunpack.c.h.s8.bf16 %v1894_v29 }
 0x3d5   :  { %2364 = vmatpush2.bf16.msra.mxu0 %v2163_v38  ;;  %v2001_v38 = vunpack.c.h.s8.bf16 %v1861_v35 }
 0x3d6   :  { %2407 = vmatpush2.bf16.msra.mxu1 %v2227_v39  ;;  %2365 = vmatprep.subr.bf16.mxu0 %v2160_v2  ;;  %v2065_v39 = vunpack.c.h.s8.bf16 %v1893_v37  ;;  %v1998_v2 = vunpack.c.l.s8.bf16 %v1862_v28  ;;  %v1877_v28 = vld [vmem:[#allocation3 + $0x90] sm:$0xff] }
 0x3d7   :  { %2408 = vmatprep.subr.bf16.mxu1 %v2224_v41  ;;  %v2062_v41 = vunpack.c.l.s8.bf16 %v1894_v29  ;;  %v1909_v29 = vld [vmem:[#allocation3 + $0x190] sm:$0xff] }
 0x3d9   :  { %2366 = vmatpush2.bf16.msra.mxu0 %v2159_v59  ;;  %v1997_v59 = vunpack.c.l.s8.bf16 %v1861_v35  ;;  %v1938_v35 = vld [vmem:[#allocation3 + $0x278] sm:$0xff] }
 0x3da   :  { %2409 = vmatpush2.bf16.msra.mxu1 %v2223_v60  ;;  %2367 = vmatprep.subr.bf16.mxu0 %v2156_v55  ;;  %v2061_v60 = vunpack.c.l.s8.bf16 %v1893_v37  ;;  %v2058_v55 = vunpack.c.h.s8.bf16 %v1890_v53  ;;  %v1970_v37 = vld [vmem:[#allocation3 + $0x378] sm:$0xff] }
 0x3db   :  { %2410 = vmatprep.subr.bf16.mxu1 %v2220_v32  ;;  %v2122_v32 = vunpack.c.h.s8.bf16 %v1922_v58 }
 0x3dd   :  { %2368 = vmatpush2.bf16.msra.mxu0 %v2155_v50  ;;  %v2057_v50 = vunpack.c.h.s8.bf16 %v1889_v40 }
 0x3de   :  { %2411 = vmatpush2.bf16.msra.mxu1 %v2219_v4  ;;  %2423 = vmatprep.subr.bf16.mxu0 %v2026_v8  ;;  %v2121_v4 = vunpack.c.h.s8.bf16 %v1921_v19  ;;  %v2054_v8 = vunpack.c.l.s8.bf16 %v1890_v53  ;;  %v1937_v53 = vld [vmem:[#allocation3 + $0x270] sm:$0xff] }
 0x3df   :  { %2466 = vmatprep.subr.bf16.mxu1 %v2090_v9  ;;  %v2118_v9 = vunpack.c.l.s8.bf16 %v1922_v58  ;;  %v1969_v58 = vld [vmem:[#allocation3 + $0x370] sm:$0xff] }
 0x3e0   :  { %2370 = vmatmul.mubr.bf16.vlgmr.msra.gmra.mxu0 %v4193_v12 }
 0x3e1   :  { %2413 = vmatmul.mubr.bf16.vlgmr.msra.gmra.mxu1 %v4197_v54  ;;  %2424 = vmatpush1.bf16.msra.mxu0 %v2025_v57  ;;  %v2053_v57 = vunpack.c.l.s8.bf16 %v1889_v40  ;;  %v1934_v40 = vld [vmem:[#allocation3 + $0x258] sm:$0xff] }
 0x3e2   :  { %2467 = vmatpush1.bf16.msra.mxu1 %v2089_v52  ;;  %2425 = vmatprep.subr.bf16.mxu0 %v2022_v7  ;;  %v2117_v52 = vunpack.c.l.s8.bf16 %v1921_v19  ;;  %v2050_v7 = vunpack.c.h.s8.bf16 %v1886_v10  ;;  %v1966_v19 = vld [vmem:[#allocation3 + $0x358] sm:$0xff] }
 0x3e3   :  { %2468 = vmatprep.subr.bf16.mxu1 %v2086_v11  ;;  %2455 = vmatprep.mubr.bf16.mxu0 %v4163_v51  ;;  %v2074_v51 = vunpack.c.h.s8.bf16 %v1898_v62  ;;  %v2114_v11 = vunpack.c.h.s8.bf16 %v1918_v0  ;;  %v1913_v62 = vld [vmem:[#allocation3 + $0x1b0] sm:$0xff] }
 0x3e4   :  { %2498 = vmatprep.mubr.bf16.mxu1 %v4167_v1  ;;  %v1897_v1 = vld [vmem:[#allocation3 + $0x130] sm:$0xff] }
 0x3e5   :  { %2426 = vmatpush1.bf16.msra.mxu0 %v2021_v34  ;;  %v2073_v24 = vunpack.c.h.s8.bf16 %v1897_v1  ;;  %v2069_v31 = vunpack.c.l.s8.bf16 %v1897_v1  ;;  %v2049_v34 = vunpack.c.h.s8.bf16 %v1885_v15  ;;  %v1910_v1 = vld [vmem:[#allocation3 + $0x198] sm:$0xff] }
 0x3e6   :  { %2469 = vmatpush1.bf16.msra.mxu1 %v2085_v42  ;;  %2427 = vmatprep.subr.bf16.mxu0 %v2018_v45  ;;  %v2113_v42 = vunpack.c.h.s8.bf16 %v1917_v16  ;;  %v2046_v45 = vunpack.c.l.s8.bf16 %v1886_v10  ;;  %v1933_v10 = vld [vmem:[#allocation3 + $0x250] sm:$0xff] }
 0x3e7   :  { %2470 = vmatprep.subr.bf16.mxu1 %v2082_v63  ;;  %v2110_v63 = vunpack.c.l.s8.bf16 %v1918_v0  ;;  %v1965_v0 = vld [vmem:[#allocation3 + $0x350] sm:$0xff] }
 0x3e9   :  { %2428 = vmatpush1.bf16.msra.mxu0 %v2017_v20  ;;  %v2045_v20 = vunpack.c.l.s8.bf16 %v1885_v15  ;;  %v2141_v15 = vunpack.c.l.s8.bf16 %v1933_v10 }
 0x3ea   :  { %2471 = vmatpush1.bf16.msra.mxu1 %v2081_v5  ;;  %2429 = vmatprep.subr.bf16.mxu0 %v2014_v17  ;;  %v2109_v5 = vunpack.c.l.s8.bf16 %v1917_v16  ;;  %v2042_v17 = vunpack.c.h.s8.bf16 %v1882_v44  ;;  %v2205_v16 = vunpack.c.l.s8.bf16 %v1965_v0 }
 0x3eb   :  { %2472 = vmatprep.subr.bf16.mxu1 %v2078_v23  ;;  %v2106_v23 = vunpack.c.h.s8.bf16 %v1914_v18 }
 0x3ed   :  { %2430 = vmatpush1.bf16.msra.mxu0 %v2013_v56  ;;  %v2041_v56 = vunpack.c.h.s8.bf16 %v1881_v21 }
 0x3ee   :  { %2473 = vmatpush1.bf16.msra.mxu1 %v2077_v43  ;;  %2431 = vmatprep.subr.bf16.mxu0 %v2010_v48  ;;  %v2105_v43 = vunpack.c.h.s8.bf16 %v1913_v62  ;;  %v2038_v48 = vunpack.c.l.s8.bf16 %v1882_v44 }
 0x3ef   :  { %2474 = vmatprep.subr.bf16.mxu1 %v2074_v51  ;;  %v2102_v51 = vunpack.c.l.s8.bf16 %v1914_v18 }
 0x3f1   :  { %2432 = vmatpush1.bf16.msra.mxu0 %v2009_v25  ;;  %v2037_v25 = vunpack.c.l.s8.bf16 %v1881_v21 }
 0x3f2   :  { %2475 = vmatpush1.bf16.msra.mxu1 %v2073_v24  ;;  %2433 = vmatprep.subr.bf16.mxu0 %v2006_v26  ;;  %v2101_v24 = vunpack.c.l.s8.bf16 %v1913_v62  ;;  %v2034_v26 = vunpack.c.h.s8.bf16 %v1878_v49 }
 0x3f3   :  { %2476 = vmatprep.subr.bf16.mxu1 %v2070_v27  ;;  %v2098_v27 = vunpack.c.h.s8.bf16 %v1910_v1 }
 0x3f5   :  { %2434 = vmatpush1.bf16.msra.mxu0 %v2005_v30  ;;  %v2033_v30 = vunpack.c.h.s8.bf16 %v1877_v28 }
 0x3f6   :  { %2477 = vmatpush1.bf16.msra.mxu1 %v2069_v31  ;;  %2435 = vmatprep.subr.bf16.mxu0 %v2002_v33  ;;  %v2097_v31 = vunpack.c.h.s8.bf16 %v1909_v29  ;;  %v2030_v33 = vunpack.c.l.s8.bf16 %v1878_v49 }
 0x3f7   :  { %2478 = vmatprep.subr.bf16.mxu1 %v2066_v3  ;;  %v2094_v3 = vunpack.c.l.s8.bf16 %v1910_v1 }
 0x3f9   :  { %2436 = vmatpush1.bf16.msra.mxu0 %v2001_v38  ;;  %v2029_v38 = vunpack.c.l.s8.bf16 %v1877_v28 }
 0x3fa   :  { %2479 = vmatpush1.bf16.msra.mxu1 %v2065_v39  ;;  %2437 = vmatprep.subr.bf16.mxu0 %v1998_v2  ;;  %v2093_v39 = vunpack.c.l.s8.bf16 %v1909_v29  ;;  %v2154_v2 = vunpack.c.h.s8.bf16 %v1938_v35 }
 0x3fb   :  { %2480 = vmatprep.subr.bf16.mxu1 %v2062_v41  ;;  %v2218_v41 = vunpack.c.h.s8.bf16 %v1970_v37 }
 0x3fd   :  { %2438 = vmatpush1.bf16.msra.mxu0 %v1997_v59  ;;  %v2153_v59 = vunpack.c.h.s8.bf16 %v1937_v53 }
 0x3fe   :  { %2481 = vmatpush1.bf16.msra.mxu1 %v2061_v60  ;;  %2439 = vmatprep.subr.bf16.mxu0 %v2058_v55  ;;  %v2217_v60 = vunpack.c.h.s8.bf16 %v1969_v58  ;;  %v2150_v55 = vunpack.c.l.s8.bf16 %v1938_v35 }
 0x3ff   :  { %2482 = vmatprep.subr.bf16.mxu1 %v2122_v32  ;;  %v2214_v32 = vunpack.c.l.s8.bf16 %v1970_v37 }
 0x401   :  { %2440 = vmatpush2.bf16.msra.mxu0 %v2057_v50  ;;  %v2149_v50 = vunpack.c.l.s8.bf16 %v1937_v53 }
 0x402   :  { %2483 = vmatpush2.bf16.msra.mxu1 %v2121_v4  ;;  %2441 = vmatprep.subr.bf16.mxu0 %v2054_v8  ;;  %v2213_v4 = vunpack.c.l.s8.bf16 %v1969_v58  ;;  %v2146_v8 = vunpack.c.h.s8.bf16 %v1934_v40 }
 0x403   :  { %2484 = vmatprep.subr.bf16.mxu1 %v2118_v9  ;;  %v2210_v9 = vunpack.c.h.s8.bf16 %v1966_v19 }
 0x405   :  { %2442 = vmatpush2.bf16.msra.mxu0 %v2053_v57  ;;  %v2145_v57 = vunpack.c.h.s8.bf16 %v1933_v10 }
 0x406   :  { %2485 = vmatpush2.bf16.msra.mxu1 %v2117_v52  ;;  %2443 = vmatprep.subr.bf16.mxu0 %v2050_v7  ;;  %v2206_v52 = vunpack.c.l.s8.bf16 %v1966_v19  ;;  %v1930_v7 = vld [vmem:[#allocation3 + $0x238] sm:$0xff] }
 0x407   :  { %2486 = vmatprep.subr.bf16.mxu1 %v2114_v11  ;;  %v1962_v11 = vld [vmem:[#allocation3 + $0x338] sm:$0xff]  ;;  %v2134_v44 = vunpack.c.l.s8.bf16 %v1930_v7 }
 0x408   :  { %v2198_v18 = vunpack.c.l.s8.bf16 %v1962_v11 }
 0x409   :  { %2444 = vmatpush2.bf16.msra.mxu0 %v2049_v34  ;;  %v2138_v34 = vunpack.c.h.s8.bf16 %v1930_v7 }
 0x40a   :  { %2487 = vmatpush2.bf16.msra.mxu1 %v2113_v42  ;;  %2445 = vmatprep.subr.bf16.mxu0 %v2046_v45  ;;  %v1929_v42 = vld [vmem:[#allocation3 + $0x230] sm:$0xff] }
 0x40b   :  { %2488 = vmatprep.subr.bf16.mxu1 %v2110_v63  ;;  %v2137_v45 = vunpack.c.h.s8.bf16 %v1929_v42 }
 0x40d   :  { %2446 = vmatpush2.bf16.msra.mxu0 %v2045_v20  ;;  %v1926_v20 = vld [vmem:[#allocation3 + $0x218] sm:$0xff] }
 0x40e   :  { %2489 = vmatpush2.bf16.msra.mxu1 %v2109_v5  ;;  %2447 = vmatprep.subr.bf16.mxu0 %v2042_v17  ;;  %v1958_v5 = vld [vmem:[#allocation3 + $0x318] sm:$0xff]  ;;  %v2133_v17 = vunpack.c.l.s8.bf16 %v1929_v42  ;;  %v2130_v21 = vunpack.c.h.s8.bf16 %v1926_v20  ;;  %v2126_v49 = vunpack.c.l.s8.bf16 %v1926_v20 }
 0x40f   :  { %2490 = vmatprep.subr.bf16.mxu1 %v2106_v23  ;;  %v2194_v62 = vunpack.c.h.s8.bf16 %v1958_v5  ;;  %v2190_v1 = vunpack.c.l.s8.bf16 %v1958_v5 }
 0x411   :  { %2448 = vmatpush2.bf16.msra.mxu0 %v2041_v56  ;;  %v1925_v56 = vld [vmem:[#allocation3 + $0x210] sm:$0xff] }
 0x412   :  { %2491 = vmatpush2.bf16.msra.mxu1 %v2105_v43  ;;  %2449 = vmatprep.subr.bf16.mxu0 %v2038_v48  ;;  %v1957_v43 = vld [vmem:[#allocation3 + $0x310] sm:$0xff]  ;;  %v2129_v48 = vunpack.c.h.s8.bf16 %v1925_v56 }
 0x413   :  { %2492 = vmatprep.subr.bf16.mxu1 %v2102_v51  ;;  %v2193_v51 = vunpack.c.h.s8.bf16 %v1957_v43 }
 0x415   :  { %2450 = vmatpush2.bf16.msra.mxu0 %v2037_v25  ;;  %v1954_v25 = vld [vmem:[#allocation3 + $0x2f8] sm:$0xff] }
 0x416   :  { %2493 = vmatpush2.bf16.msra.mxu1 %v2101_v24  ;;  %2451 = vmatprep.subr.bf16.mxu0 %v2034_v26  ;;  %v1986_v24 = vld [vmem:[#allocation3 + $0x3f8] sm:$0xff]  ;;  %v2125_v26 = vunpack.c.l.s8.bf16 %v1925_v56  ;;  %v2186_v28 = vunpack.c.h.s8.bf16 %v1954_v25  ;;  %v2182_v35 = vunpack.c.l.s8.bf16 %v1954_v25  ;;  %v4212_v25 = vld [vmem:[%s4298_s12] sm:$0xf] }
 0x417   :  { %2494 = vmatprep.subr.bf16.mxu1 %v2098_v27  ;;  %v2189_v27 = vunpack.c.l.s8.bf16 %v1957_v43  ;;  %v2250_v29 = vunpack.c.h.s8.bf16 %v1986_v24  ;;  %v2246_v37 = vunpack.c.l.s8.bf16 %v1986_v24 }
 0x419   :  { %2452 = vmatpush2.bf16.msra.mxu0 %v2033_v30  ;;  %v1953_v30 = vld [vmem:[#allocation3 + $0x2f0] sm:$0xff] }
 0x41a   :  { %2495 = vmatpush2.bf16.msra.mxu1 %v2097_v31  ;;  %2453 = vmatprep.subr.bf16.mxu0 %v2030_v33  ;;  %v1985_v31 = vld [vmem:[#allocation3 + $0x3f0] sm:$0xff]  ;;  %v2185_v33 = vunpack.c.h.s8.bf16 %v1953_v30 }
 0x41b   :  { %2496 = vmatprep.subr.bf16.mxu1 %v2094_v3  ;;  %v2249_v3 = vunpack.c.h.s8.bf16 %v1985_v31 }
 0x41d   :  { %2454 = vmatpush2.bf16.msra.mxu0 %v2029_v38  ;;  %v1950_v38 = vld [vmem:[#allocation3 + $0x2d8] sm:$0xff] }
 0x41e   :  { %2497 = vmatpush2.bf16.msra.mxu1 %v2093_v39  ;;  %2509 = vmatprep.subr.bf16.mxu0 %v2154_v2  ;;  %v1982_v39 = vld [vmem:[#allocation3 + $0x3d8] sm:$0xff]  ;;  %v2181_v2 = vunpack.c.l.s8.bf16 %v1953_v30  ;;  %v2178_v53 = vunpack.c.h.s8.bf16 %v1950_v38 }
 0x41f   :  { %2552 = vmatprep.subr.bf16.mxu1 %v2218_v41  ;;  %v2245_v41 = vunpack.c.l.s8.bf16 %v1985_v31  ;;  %v2242_v58 = vunpack.c.h.s8.bf16 %v1982_v39  ;;  %v2238_v19 = vunpack.c.l.s8.bf16 %v1982_v39  ;;  %v2604_v39 = vrot.slane %v4212_v25, %v4057_v47 }
 0x420   :  { %2456 = vmatmul.mubr.bf16.vlgmr.msra.gmra.mxu0 %v4173_v14  ;;  %v2209_v14 = vunpack.c.h.s8.bf16 %v1965_v0 }
 0x421   :  { %2499 = vmatmul.mubr.bf16.vlgmr.msra.gmra.mxu1 %v4177_v13  ;;  %2510 = vmatpush1.bf16.msra.mxu0 %v2153_v59  ;;  %v2142_v13 = vunpack.c.l.s8.bf16 %v1934_v40  ;;  %v1949_v59 = vld [vmem:[#allocation3 + $0x2d0] sm:$0xff]  ;;  %v2174_v40 = vunpack.c.l.s8.bf16 %v1950_v38 }
 0x422   :  { %2553 = vmatpush1.bf16.msra.mxu1 %v2217_v60  ;;  %2511 = vmatprep.subr.bf16.mxu0 %v2150_v55  ;;  %v1981_v60 = vld [vmem:[#allocation3 + $0x3d0] sm:$0xff]  ;;  %v2177_v55 = vunpack.c.h.s8.bf16 %v1949_v59 }
 0x423   :  { %2554 = vmatprep.subr.bf16.mxu1 %v2214_v32  ;;  %2541 = vmatprep.mubr.bf16.mxu0 %v4181_v22  ;;  %v2202_v22 = vunpack.c.h.s8.bf16 %v1962_v11  ;;  %v2241_v32 = vunpack.c.h.s8.bf16 %v1981_v60 }
 0x424   :  { %2584 = vmatprep.mubr.bf16.mxu1 %v4185_v6  ;;  %v1961_v6 = vld [vmem:[#allocation3 + $0x330] sm:$0xff] }
 0x425   :  { %2512 = vmatpush1.bf16.msra.mxu0 %v2149_v50  ;;  %v2201_v63 = vunpack.c.h.s8.bf16 %v1961_v6  ;;  %v2197_v23 = vunpack.c.l.s8.bf16 %v1961_v6  ;;  %v1946_v50 = vld [vmem:[#allocation3 + $0x2b8] sm:$0xff] }
 0x426   :  { %2555 = vmatpush1.bf16.msra.mxu1 %v2213_v4  ;;  %2513 = vmatprep.subr.bf16.mxu0 %v2146_v8  ;;  %v1978_v4 = vld [vmem:[#allocation3 + $0x3b8] sm:$0xff]  ;;  %v2173_v8 = vunpack.c.l.s8.bf16 %v1949_v59  ;;  %v2170_v10 = vunpack.c.h.s8.bf16 %v1946_v50  ;;  %v2166_v7 = vunpack.c.l.s8.bf16 %v1946_v50 }
 0x427   :  { %2556 = vmatprep.subr.bf16.mxu1 %v2210_v9  ;;  %v2237_v9 = vunpack.c.l.s8.bf16 %v1981_v60  ;;  %v2234_v0 = vunpack.c.h.s8.bf16 %v1978_v4  ;;  %v2230_v11 = vunpack.c.l.s8.bf16 %v1978_v4 }
 0x429   :  { %2514 = vmatpush1.bf16.msra.mxu0 %v2145_v57  ;;  %v1945_v57 = vld [vmem:[#allocation3 + $0x2b0] sm:$0xff] }
 0x42a   :  { %2557 = vmatpush1.bf16.msra.mxu1 %v2209_v14  ;;  %2515 = vmatprep.subr.bf16.mxu0 %v2142_v13  ;;  %v1977_v14 = vld [vmem:[#allocation3 + $0x3b0] sm:$0xff]  ;;  %v2169_v13 = vunpack.c.h.s8.bf16 %v1945_v57 }
 0x42b   :  { %2558 = vmatprep.subr.bf16.mxu1 %v2206_v52  ;;  %v2233_v52 = vunpack.c.h.s8.bf16 %v1977_v14 }
 0x42d   :  { %2516 = vmatpush1.bf16.msra.mxu0 %v2141_v15  ;;  %v1942_v15 = vld [vmem:[#allocation3 + $0x298] sm:$0xff] }
 0x42e   :  { %2559 = vmatpush1.bf16.msra.mxu1 %v2205_v16  ;;  %2517 = vmatprep.subr.bf16.mxu0 %v2138_v34  ;;  %v1974_v16 = vld [vmem:[#allocation3 + $0x398] sm:$0xff]  ;;  %v2165_v34 = vunpack.c.l.s8.bf16 %v1945_v57  ;;  %v2162_v42 = vunpack.c.h.s8.bf16 %v1942_v15  ;;  %v2158_v20 = vunpack.c.l.s8.bf16 %v1942_v15  ;;  %v2668_v15 = vld [vmem:[#allocation13 + $0x28] sm:$0xff] }
 0x42f   :  { %2560 = vmatprep.subr.bf16.mxu1 %v2202_v22  ;;  %v2229_v22 = vunpack.c.l.s8.bf16 %v1977_v14  ;;  %v2226_v6 = vunpack.c.h.s8.bf16 %v1974_v16  ;;  %v2222_v5 = vunpack.c.l.s8.bf16 %v1974_v16 }
 0x431   :  { %2518 = vmatpush1.bf16.msra.mxu0 %v2137_v45  ;;  %v1941_v45 = vld [vmem:[#allocation3 + $0x290] sm:$0xff] }
 0x432   :  { %2561 = vmatpush1.bf16.msra.mxu1 %v2201_v63  ;;  %2519 = vmatprep.subr.bf16.mxu0 %v2134_v44  ;;  %v1973_v63 = vld [vmem:[#allocation3 + $0x390] sm:$0xff]  ;;  %v2161_v44 = vunpack.c.h.s8.bf16 %v1941_v45 }
 0x433   :  { %2562 = vmatprep.subr.bf16.mxu1 %v2198_v18  ;;  %v2225_v18 = vunpack.c.h.s8.bf16 %v1973_v63 }
 0x435   :  { %2520 = vmatpush1.bf16.msra.mxu0 %v2133_v17  ;;  %v2157_v17 = vunpack.c.l.s8.bf16 %v1941_v45 }
 0x436   :  { %2563 = vmatpush1.bf16.msra.mxu1 %v2197_v23  ;;  %2521 = vmatprep.subr.bf16.mxu0 %v2130_v21  ;;  %v2221_v23 = vunpack.c.l.s8.bf16 %v1973_v63 }
 0x437   :  { %2564 = vmatprep.subr.bf16.mxu1 %v2194_v62 }
 0x439   :  { %2522 = vmatpush1.bf16.msra.mxu0 %v2129_v48 }
 0x43a   :  { %2565 = vmatpush1.bf16.msra.mxu1 %v2193_v51  ;;  %2523 = vmatprep.subr.bf16.mxu0 %v2126_v49 }
 0x43b   :  { %2566 = vmatprep.subr.bf16.mxu1 %v2190_v1 }
 0x43d   :  { %2524 = vmatpush1.bf16.msra.mxu0 %v2125_v26 }
 0x43e   :  { %2567 = vmatpush1.bf16.msra.mxu1 %v2189_v27  ;;  %2525 = vmatprep.subr.bf16.mxu0 %v2186_v28 }
 0x43f   :  { %2568 = vmatprep.subr.bf16.mxu1 %v2250_v29  ;;  %v2600_v29 = vrot.slane %v4212_v25, %v4044_v61 }
 0x441   :  { %2526 = vmatpush2.bf16.msra.mxu0 %v2185_v33 }
 0x442   :  { %2569 = vmatpush2.bf16.msra.mxu1 %v2249_v3  ;;  %2527 = vmatprep.subr.bf16.mxu0 %v2182_v35 }
 0x443   :  { %2570 = vmatprep.subr.bf16.mxu1 %v2246_v37  ;;  %v2663_v37 = vld [vmem:[#allocation13] sm:$0xff] }
 0x445   :  { %2528 = vmatpush2.bf16.msra.mxu0 %v2181_v2 }
 0x446   :  { %2571 = vmatpush2.bf16.msra.mxu1 %v2245_v41  ;;  %2529 = vmatprep.subr.bf16.mxu0 %v2178_v53 }
 0x447   :  { %2572 = vmatprep.subr.bf16.mxu1 %v2242_v58 }
 0x449   :  { %2530 = vmatpush2.bf16.msra.mxu0 %v2177_v55  ;;  %v2664_v55 = vld [vmem:[#allocation13 + $0x8] sm:$0xff] }
 0x44a   :  { %2573 = vmatpush2.bf16.msra.mxu1 %v2241_v32  ;;  %2531 = vmatprep.subr.bf16.mxu0 %v2174_v40  ;;  %v2671_v40 = vmul.f32 0.5, %v2663_v37  ;;  %v2612_v37 = vrot.slane %v4212_v25, %v4097_v36 }
 0x44b   :  { %2574 = vmatprep.subr.bf16.mxu1 %v2238_v19 }
 0x44d   :  { %2532 = vmatpush2.bf16.msra.mxu0 %v2173_v8 }
 0x44e   :  { %2575 = vmatpush2.bf16.msra.mxu1 %v2237_v9  ;;  %2533 = vmatprep.subr.bf16.mxu0 %v2170_v10  ;;  %v2667_v9 = vld [vmem:[#allocation13 + $0x20] sm:$0xff] }
 0x44f   :  { %2576 = vmatprep.subr.bf16.mxu1 %v2234_v0  ;;  %v2672_v0 = vmul.f32 0.5, %v2664_v55 }
 0x451   :  { %2534 = vmatpush2.bf16.msra.mxu0 %v2169_v13 }
 0x452   :  { %2577 = vmatpush2.bf16.msra.mxu1 %v2233_v52  ;;  %2535 = vmatprep.subr.bf16.mxu0 %v2166_v7 }
 0x453   :  { %2578 = vmatprep.subr.bf16.mxu1 %v2230_v11  ;;  %v2675_v11 = vmul.f32 0.5, %v2667_v9 }
 0x455   :  { %2536 = vmatpush2.bf16.msra.mxu0 %v2165_v34 }
 0x456   :  { %2579 = vmatpush2.bf16.msra.mxu1 %v2229_v22  ;;  %2537 = vmatprep.subr.bf16.mxu0 %v2162_v42 }
 0x457   :  { %2580 = vmatprep.subr.bf16.mxu1 %v2226_v6 }
 0x459   :  { %2538 = vmatpush2.bf16.msra.mxu0 %v2161_v44  ;;  %v2676_v44 = vmul.f32 0.5, %v2668_v15 }
 0x45a   :  { %2581 = vmatpush2.bf16.msra.mxu1 %v2225_v18  ;;  %2539 = vmatprep.subr.bf16.mxu0 %v2158_v20 }
 0x45b   :  { %2582 = vmatprep.subr.bf16.mxu1 %v2222_v5 }
 0x45d   :  { %2540 = vmatpush2.bf16.msra.mxu0 %v2157_v17 }
 0x45e   :  { %2583 = vmatpush2.bf16.msra.mxu1 %v2221_v23 }
 0x460   :  { %2542 = vmatmul.mubr.bf16.vlgmr.msra.gmra.mxu0 %v4193_v12  ;;  %v2285_v21 = vpop.f32.mrf.mxu0  ;;  %v4217_v12 = vld [vmem:[%s4304_s18] sm:$0xf] }
 0x461   :  { %2585 = vmatmul.mubr.bf16.vlgmr.msra.gmra.mxu1 %v4197_v54  ;;  %v2328_v62 = vpop.f32.mrf.mxu1  ;;  %v2630_v30 = vrot.slane %v4217_v12, %v4044_v61  ;;  %v2634_v2 = vrot.slane %v4217_v12, %v4057_v47 }
 0x462   :  { %v2287_v56 = vpop.f32.mrf.mxu0  ;;  %v2329_v24 = vadd.f32 %v2328_v62, %v2285_v21 }
 0x463   :  { %v2330_v43 = vpop.f32.mrf.mxu1 }
 0x464   :  { %v2289_v48 = vpop.f32.mrf.mxu0  ;;  %v2331_v27 = vadd.f32 %v2330_v43, %v2287_v56 }
 0x465   :  { %v2332_v51 = vpop.f32.mrf.mxu1 }
 0x466   :  { %v2291_v49 = vpop.f32.mrf.mxu0  ;;  %v2333_v3 = vadd.f32 %v2332_v51, %v2289_v48 }
 0x467   :  { %v2334_v1 = vpop.f32.mrf.mxu1 }
 0x468   :  { %v2335_v58 = vadd.f32 %v2334_v1, %v2291_v49 }
 0x4a0   :  { %v2371_v54 = vpop.f32.mrf.mxu0 }
 0x4a1   :  { %v2414_v26 = vpop.f32.mrf.mxu1  ;;  %v2372_v28 = vadd.f32 %v2371_v54, %v2329_v24 }
 0x4a2   :  { %v2373_v31 = vpop.f32.mrf.mxu0 }
 0x4a3   :  { %v2416_v33 = vpop.f32.mrf.mxu1  ;;  %v2415_v35 = vadd.f32 %v2414_v26, %v2372_v28  ;;  %v2374_v38 = vadd.f32 %v2373_v31, %v2331_v27  ;;  %v2608_v27 = vrot.slane %v4212_v25, %v4094_v46  ;;  %v2638_v28 = vrot.slane %v4217_v12, %v4094_v46 }
 0x4a4   :  { %v2375_v41 = vpop.f32.mrf.mxu0 }
 0x4a5   :  { %v2418_v53 = vpop.f32.mrf.mxu1  ;;  %v2617_v59 = vmul.f32 %v2600_v29, %v2415_v35  ;;  %v2417_v60 = vadd.f32 %v2416_v33, %v2374_v38  ;;  %v2376_v32 = vadd.f32 %v2375_v41, %v2333_v3  ;;  %v2665_v3 = vld [vmem:[#allocation13 + $0x10] sm:$0xff]  ;;  %v2642_v38 = vrot.slane %v4217_v12, %v4097_v36 }
 0x4a6   :  { %v2377_v19 = vpop.f32.mrf.mxu0  ;;  %v2673_v46 = vmul.f32 0.5, %v2665_v3 }
 0x4a7   :  { %v2647_v50 = vadd.f32 %v2630_v30, %v2617_v59  ;;  %v2618_v4 = vmul.f32 %v2604_v39, %v2417_v60  ;;  %v2419_v8 = vadd.f32 %v2418_v53, %v2376_v32  ;;  %v2378_v10 = vadd.f32 %v2377_v19, %v2335_v58  ;;  %v2420_v57 = vpop.f32.mrf.mxu1  ;;  %v2666_v59 = vld [vmem:[#allocation13 + $0x18] sm:$0xff] }
 0x4a9   :  { %v2655_v14 = vmax.f32 %v2647_v50, 0.0  ;;  %v2648_v13 = vadd.f32 %v2634_v2, %v2618_v4  ;;  %v2621_v52 = vmul.f32 %v2600_v29, %v2419_v8  ;;  %v2421_v7 = vadd.f32 %v2420_v57, %v2378_v10  ;;  %v2669_v50 = vld [vmem:[#allocation13 + $0x30] sm:$0xff]  ;;  %v2670_v57 = vld [vmem:[#allocation13 + $0x38] sm:$0xff] }
 0x4aa   :  { %v2674_v8 = vmul.f32 0.5, %v2666_v59  ;;  %v2677_v12 = vmul.f32 0.5, %v2669_v50 }
 0x4ab   :  { %v4227_v16 = vadd.f32 %v2671_v40, %v2655_v14  ;;  %v2656_v34 = vmax.f32 %v2648_v13, 0.0  ;;  %v2651_v22 = vadd.f32 %v2630_v30, %v2621_v52  ;;  %v2622_v42 = vmul.f32 %v2604_v39, %v2421_v7 }
 0x4ad   :  { %v4229_v6 = vadd.f32 %v2672_v0, %v2656_v34  ;;  %v2659_v45 = vmax.f32 %v2651_v22, 0.0  ;;  %v2652_v63 = vadd.f32 %v2634_v2, %v2622_v42  ;;  %v2678_v22 = vmul.f32 0.5, %v2670_v57 }
 0x4af   :  { %v4231_v18 = vadd.f32 %v2675_v11, %v2659_v45  ;;  %v2660_v20 = vmax.f32 %v2652_v63, 0.0 }
 0x4b1   :  { %v2684_v5 = vadd.f32 %v2676_v44, %v2660_v20 }
 0x4e0   :  { %v2457_v17 = vpop.f32.mrf.mxu0 }
 0x4e1   :  { %v2500_v23 = vpop.f32.mrf.mxu1 }
 0x4e2   :  { %v2459_v21 = vpop.f32.mrf.mxu0  ;;  %v2501_v49 = vadd.f32 %v2500_v23, %v2457_v17 }
 0x4e3   :  { %v2502_v62 = vpop.f32.mrf.mxu1 }
 0x4e4   :  { %v2461_v56 = vpop.f32.mrf.mxu0  ;;  %v2503_v54 = vadd.f32 %v2502_v62, %v2459_v21 }
 0x4e5   :  { %v2504_v43 = vpop.f32.mrf.mxu1 }
 0x4e6   :  { %v2463_v48 = vpop.f32.mrf.mxu0  ;;  %v2505_v31 = vadd.f32 %v2504_v43, %v2461_v56 }
 0x4e7   :  { %v2506_v51 = vpop.f32.mrf.mxu1 }
 0x4e8   :  { %v2507_v41 = vadd.f32 %v2506_v51, %v2463_v48 }
 0x520   :  { %v2543_v1 = vpop.f32.mrf.mxu0 }
 0x521   :  { %v2586_v24 = vpop.f32.mrf.mxu1  ;;  %v2544_v26 = vadd.f32 %v2543_v1, %v2501_v49 }
 0x522   :  { %v2545_v29 = vpop.f32.mrf.mxu0 }
 0x523   :  { %v2588_v30 = vpop.f32.mrf.mxu1  ;;  %v2587_v33 = vadd.f32 %v2586_v24, %v2544_v26  ;;  %v2546_v35 = vadd.f32 %v2545_v29, %v2503_v54 }
 0x524   :  { %v2547_v39 = vpop.f32.mrf.mxu0 }
 0x525   :  { %v2590_v2 = vpop.f32.mrf.mxu1  ;;  %v2619_v53 = vmul.f32 %v2608_v27, %v2587_v33  ;;  %v2589_v58 = vadd.f32 %v2588_v30, %v2546_v35  ;;  %v2548_v60 = vadd.f32 %v2547_v39, %v2505_v31 }
 0x526   :  { %v2549_v55 = vpop.f32.mrf.mxu0 }
 0x527   :  { %v2649_v32 = vadd.f32 %v2638_v28, %v2619_v53  ;;  %v2620_v40 = vmul.f32 %v2612_v37, %v2589_v58  ;;  %v2591_v19 = vadd.f32 %v2590_v2, %v2548_v60  ;;  %v2550_v4 = vadd.f32 %v2549_v55, %v2507_v41  ;;  %v2592_v9 = vpop.f32.mrf.mxu1 }
 0x529   :  { %v2657_v25 = vmax.f32 %v2649_v32, 0.0  ;;  %v2650_v10 = vadd.f32 %v2642_v38, %v2620_v40  ;;  %v2623_v0 = vmul.f32 %v2608_v27, %v2591_v19  ;;  %v2593_v36 = vadd.f32 %v2592_v9, %v2550_v4 }
 0x52b   :  { %v4241_v14 = vadd.f32 %v2673_v46, %v2657_v25  ;;  %v2658_v13 = vmax.f32 %v2650_v10, 0.0  ;;  %v2653_v52 = vadd.f32 %v2638_v28, %v2623_v0  ;;  %v2624_v7 = vmul.f32 %v2612_v37, %v2593_v36 }
 0x52d   :  { %v2682_v11 = vadd.f32 %v2674_v8, %v2658_v13  ;;  %v2661_v15 = vmax.f32 %v2653_v52, 0.0  ;;  %v2654_v34 = vadd.f32 %v2642_v38, %v2624_v7 }
 0x52f   :  { %v4243_v42 = vadd.f32 %v2677_v12, %v2661_v15  ;;  %v2662_v45 = vmax.f32 %v2654_v34, 0.0 }
 0x531   :  { %v2686_v63 = vadd.f32 %v2678_v22, %v2662_v45 }
 0x532   :  { %3758 = dma.done.wait [#allocation6 + $0x2], 8192 }
 0x533   :  { %3759 = vsyncadd [#allocation6 + $0x2], 4294959104  ;;  %v2723_v44 = vpack.c.bf16 %v2684_v5, %v4229_v6  ;;  %v2725_v20 = vpack.c.bf16 %v2686_v63, %v2682_v11  ;;  %v2697_v17 = vld [vmem:[#allocation4 + $0x38] sm:$0xff]  ;;  %v2696_v21 = vld [vmem:[#allocation4 + $0x30] sm:$0xff] }
 0x534   :  { %v2713_v23 = vld [vmem:[#allocation4 + $0xb8] sm:$0xff]  ;;  %v2739_v62 = vunpack.c.l.s8.bf16 %v2697_v17  ;;  %v2741_v56 = vunpack.c.h.s8.bf16 %v2697_v17  ;;  %v2712_v51 = vld [vmem:[#allocation4 + $0xb0] sm:$0xff]  ;;  %v2740_v49 = vunpack.c.h.s8.bf16 %v2696_v21  ;;  %v2695_v24 = vld [vmem:[#allocation4 + $0x28] sm:$0xff]  ;;  %v2738_v26 = vunpack.c.l.s8.bf16 %v2696_v21 }
 0x535   :  { %2822 = vmatprep.mubr.bf16.mxu0 %v2723_v44  ;;  %2865 = vmatprep.mubr.bf16.mxu1 %v2725_v20  ;;  %v2771_v43 = vunpack.c.l.s8.bf16 %v2713_v23  ;;  %v2773_v48 = vunpack.c.h.s8.bf16 %v2713_v23  ;;  %v2772_v1 = vunpack.c.h.s8.bf16 %v2712_v51  ;;  %v2711_v54 = vld [vmem:[#allocation4 + $0xa8] sm:$0xff]  ;;  %v2770_v6 = vunpack.c.l.s8.bf16 %v2712_v51  ;;  %v2694_v28 = vld [vmem:[#allocation4 + $0x20] sm:$0xff]  ;;  %v2693_v35 = vld [vmem:[#allocation4 + $0x18] sm:$0xff] }
 0x536   :  { %2790 = vmatprep.subr.bf16.mxu0 %v2741_v56  ;;  %v2737_v5 = vunpack.c.h.s8.bf16 %v2695_v24  ;;  %v2769_v27 = vunpack.c.h.s8.bf16 %v2711_v54  ;;  %v2710_v29 = vld [vmem:[#allocation4 + $0xa0] sm:$0xff]  ;;  %v2736_v30 = vunpack.c.h.s8.bf16 %v2694_v28  ;;  %v2735_v33 = vunpack.c.l.s8.bf16 %v2695_v24  ;;  %v2709_v37 = vld [vmem:[#allocation4 + $0x98] sm:$0xff]  ;;  %v2692_v53 = vld [vmem:[#allocation4 + $0x10] sm:$0xff] }
 0x537   :  { %2833 = vmatprep.subr.bf16.mxu1 %v2773_v48  ;;  %2791 = vmatpush1.bf16.msra.mxu0 %v2740_v49  ;;  %v2768_v31 = vunpack.c.h.s8.bf16 %v2710_v29  ;;  %v2767_v3 = vunpack.c.l.s8.bf16 %v2711_v54  ;;  %v2734_v38 = vunpack.c.l.s8.bf16 %v2694_v28  ;;  %v2766_v39 = vunpack.c.l.s8.bf16 %v2710_v29  ;;  %v2708_v58 = vld [vmem:[#allocation4 + $0x90] sm:$0xff]  ;;  %v2691_v32 = vld [vmem:[#allocation4 + $0x8] sm:$0xff]  ;;  %v2690_v9 = vld [vmem:[#allocation4] sm:$0xff] }
 0x538   :  { %2834 = vmatpush1.bf16.msra.mxu1 %v2772_v1  ;;  %2792 = vmatprep.subr.bf16.mxu0 %v2739_v62  ;;  %v2733_v2 = vunpack.c.h.s8.bf16 %v2693_v35  ;;  %v2765_v41 = vunpack.c.h.s8.bf16 %v2709_v37  ;;  %v2732_v59 = vunpack.c.h.s8.bf16 %v2692_v53  ;;  %v2764_v60 = vunpack.c.h.s8.bf16 %v2708_v58  ;;  %v2707_v40 = vld [vmem:[#allocation4 + $0x88] sm:$0xff]  ;;  %v2706_v25 = vld [vmem:[#allocation4 + $0x80] sm:$0xff]  ;;  %v2705_v57 = vld [vmem:[#allocation4 + $0x78] sm:$0xff] }
 0x539   :  { %2835 = vmatprep.subr.bf16.mxu1 %v2771_v43  ;;  %v2731_v46 = vunpack.c.l.s8.bf16 %v2693_v35  ;;  %v2763_v55 = vunpack.c.l.s8.bf16 %v2709_v37  ;;  %v2730_v19 = vunpack.c.l.s8.bf16 %v2692_v53  ;;  %v2762_v50 = vunpack.c.l.s8.bf16 %v2708_v58  ;;  %v2721_v13 = vld [vmem:[#allocation4 + $0xf8] sm:$0xff]  ;;  %v2704_v34 = vld [vmem:[#allocation4 + $0x70] sm:$0xff]  ;;  %v2703_v17 = vld [vmem:[#allocation4 + $0x68] sm:$0xff] }
 0x53a   :  { %v2729_v4 = vunpack.c.h.s8.bf16 %v2691_v32  ;;  %v2761_v8 = vunpack.c.h.s8.bf16 %v2707_v40  ;;  %v2728_v10 = vunpack.c.h.s8.bf16 %v2690_v9  ;;  %v2760_v0 = vunpack.c.h.s8.bf16 %v2706_v25  ;;  %v2720_v22 = vld [vmem:[#allocation4 + $0xf0] sm:$0xff]  ;;  %v2719_v23 = vld [vmem:[#allocation4 + $0xe8] sm:$0xff]  ;;  %v2702_v48 = vld [vmem:[#allocation4 + $0x60] sm:$0xff] }
 0x53b   :  { %2793 = vmatpush1.bf16.msra.mxu0 %v2738_v26  ;;  %v2727_v36 = vunpack.c.l.s8.bf16 %v2691_v32  ;;  %v2759_v12 = vunpack.c.l.s8.bf16 %v2707_v40  ;;  %v2726_v52 = vunpack.c.l.s8.bf16 %v2690_v9  ;;  %v2758_v7 = vunpack.c.l.s8.bf16 %v2706_v25  ;;  %v2718_v51 = vld [vmem:[#allocation4 + $0xe0] sm:$0xff]  ;;  %v2701_v26 = vld [vmem:[#allocation4 + $0x58] sm:$0xff]  ;;  %v2930_v9 = vld [vmem:[#allocation4 + $0x130] sm:$0xff] }
 0x53c   :  { %2836 = vmatpush1.bf16.msra.mxu1 %v2770_v6  ;;  %2794 = vmatprep.subr.bf16.mxu0 %v2737_v5  ;;  %v2757_v11 = vunpack.c.h.s8.bf16 %v2705_v57  ;;  %v2789_v15 = vunpack.c.h.s8.bf16 %v2721_v13  ;;  %v2756_v45 = vunpack.c.h.s8.bf16 %v2704_v34  ;;  %v2788_v63 = vunpack.c.h.s8.bf16 %v2720_v22  ;;  %v2717_v6 = vld [vmem:[#allocation4 + $0xd8] sm:$0xff] }
 0x53d   :  { %2837 = vmatprep.subr.bf16.mxu1 %v2769_v27  ;;  %v2755_v44 = vunpack.c.l.s8.bf16 %v2705_v57  ;;  %v2787_v20 = vunpack.c.l.s8.bf16 %v2721_v13  ;;  %v2754_v21 = vunpack.c.l.s8.bf16 %v2704_v34  ;;  %v2786_v62 = vunpack.c.l.s8.bf16 %v2720_v22  ;;  %v2925_v22 = vld [vmem:[#allocation4 + $0x108] sm:$0xff] }
 0x53e   :  { %v2753_v56 = vunpack.c.h.s8.bf16 %v2703_v17  ;;  %v2785_v43 = vunpack.c.h.s8.bf16 %v2719_v23  ;;  %v2752_v49 = vunpack.c.h.s8.bf16 %v2702_v48  ;;  %v2784_v1 = vunpack.c.h.s8.bf16 %v2718_v51 }
 0x53f   :  { %2795 = vmatpush1.bf16.msra.mxu0 %v2736_v30  ;;  %v2751_v24 = vunpack.c.l.s8.bf16 %v2703_v17  ;;  %v2783_v54 = vunpack.c.l.s8.bf16 %v2719_v23  ;;  %v2750_v5 = vunpack.c.l.s8.bf16 %v2702_v48  ;;  %v2782_v27 = vunpack.c.l.s8.bf16 %v2718_v51  ;;  %v2700_v30 = vld [vmem:[#allocation4 + $0x50] sm:$0xff]  ;;  %v2939_v23 = vld [vmem:[#allocation4 + $0x178] sm:$0xff]  ;;  %v2937_v51 = vld [vmem:[#allocation4 + $0x168] sm:$0xff] }
 0x540   :  { %2838 = vmatpush1.bf16.msra.mxu1 %v2768_v31  ;;  %2796 = vmatprep.subr.bf16.mxu0 %v2735_v33  ;;  %v2749_v28 = vunpack.c.h.s8.bf16 %v2701_v26  ;;  %v2781_v29 = vunpack.c.h.s8.bf16 %v2717_v6  ;;  %v2716_v31 = vld [vmem:[#allocation4 + $0xd0] sm:$0xff]  ;;  %v2748_v33 = vunpack.c.h.s8.bf16 %v2700_v30  ;;  %v2747_v35 = vunpack.c.l.s8.bf16 %v2701_v26 }
 0x541   :  { %2839 = vmatprep.subr.bf16.mxu1 %v2767_v3  ;;  %v2780_v3 = vunpack.c.h.s8.bf16 %v2716_v31  ;;  %v2779_v37 = vunpack.c.l.s8.bf16 %v2717_v6  ;;  %v2722_v25 = vpack.c.bf16 %v4231_v18, %v4227_v16  ;;  %v2954_v57 = vunpack.c.l.s8.bf16 %v2930_v9  ;;  %v2927_v18 = vld [vmem:[#allocation4 + $0x118] sm:$0xff] }
 0x542   :  { %v2947_v34 = vunpack.c.l.s8.bf16 %v2927_v18  ;;  %v2943_v17 = vunpack.c.l.s8.bf16 %v2925_v22  ;;  %v2971_v48 = vunpack.c.l.s8.bf16 %v2939_v23  ;;  %v2967_v26 = vunpack.c.l.s8.bf16 %v2937_v51 }
 0x543   :  { %2797 = vmatpush1.bf16.msra.mxu0 %v2734_v38  ;;  %v2699_v38 = vld [vmem:[#allocation4 + $0x48] sm:$0xff] }
 0x544   :  { %2840 = vmatpush1.bf16.msra.mxu1 %v2766_v39  ;;  %2798 = vmatprep.subr.bf16.mxu0 %v2733_v2  ;;  %v2715_v39 = vld [vmem:[#allocation4 + $0xc8] sm:$0xff]  ;;  %v2746_v2 = vunpack.c.l.s8.bf16 %v2700_v30  ;;  %v2745_v53 = vunpack.c.h.s8.bf16 %v2699_v38  ;;  %v2743_v32 = vunpack.c.l.s8.bf16 %v2699_v38 }
 0x545   :  { %2841 = vmatprep.subr.bf16.mxu1 %v2765_v41  ;;  %v2778_v41 = vunpack.c.l.s8.bf16 %v2716_v31  ;;  %v2777_v58 = vunpack.c.h.s8.bf16 %v2715_v39  ;;  %v2775_v40 = vunpack.c.l.s8.bf16 %v2715_v39 }
 0x547   :  { %2799 = vmatpush1.bf16.msra.mxu0 %v2732_v59  ;;  %v2698_v59 = vld [vmem:[#allocation4 + $0x40] sm:$0xff] }
 0x548   :  { %2842 = vmatpush1.bf16.msra.mxu1 %v2764_v60  ;;  %2800 = vmatprep.subr.bf16.mxu0 %v2731_v46  ;;  %v2714_v60 = vld [vmem:[#allocation4 + $0xc0] sm:$0xff]  ;;  %v2744_v46 = vunpack.c.h.s8.bf16 %v2698_v59 }
 0x549   :  { %2843 = vmatprep.subr.bf16.mxu1 %v2763_v55  ;;  %v2776_v55 = vunpack.c.h.s8.bf16 %v2714_v60 }
 0x54b   :  { %2801 = vmatpush1.bf16.msra.mxu0 %v2730_v19  ;;  %v2931_v19 = vld [vmem:[#allocation4 + $0x138] sm:$0xff] }
 0x54c   :  { %2844 = vmatpush1.bf16.msra.mxu1 %v2762_v50  ;;  %2802 = vmatprep.subr.bf16.mxu0 %v2729_v4  ;;  %v2742_v50 = vunpack.c.l.s8.bf16 %v2698_v59  ;;  %v2774_v4 = vunpack.c.l.s8.bf16 %v2714_v60  ;;  %v3070_v60 = vld [vmem:[#allocation4 + $0x1a8] sm:$0xff] }
 0x54d   :  { %2845 = vmatprep.subr.bf16.mxu1 %v2761_v8  ;;  %v2957_v8 = vunpack.c.h.s8.bf16 %v2931_v19 }
 0x54f   :  { %2803 = vmatpush1.bf16.msra.mxu0 %v2728_v10  ;;  %v2724_v10 = vpack.c.bf16 %v4243_v42, %v4241_v14  ;;  %v2949_v42 = vunpack.c.h.s8.bf16 %v2927_v18 }
 0x550   :  { %2846 = vmatpush1.bf16.msra.mxu1 %v2760_v0  ;;  %2804 = vmatprep.subr.bf16.mxu0 %v2727_v36  ;;  %v2956_v0 = vunpack.c.h.s8.bf16 %v2930_v9  ;;  %v2955_v36 = vunpack.c.l.s8.bf16 %v2931_v19  ;;  %v3092_v19 = vunpack.c.l.s8.bf16 %v3070_v60  ;;  %v3067_v9 = vld [vmem:[#allocation4 + $0x190] sm:$0xff] }
 0x551   :  { %2847 = vmatprep.subr.bf16.mxu1 %v2759_v12  ;;  %v2929_v12 = vld [vmem:[#allocation4 + $0x128] sm:$0xff] }
 0x552   :  { %v2953_v13 = vunpack.c.h.s8.bf16 %v2929_v12  ;;  %v2951_v16 = vunpack.c.l.s8.bf16 %v2929_v12 }
 0x553   :  { %2805 = vmatpush1.bf16.msra.mxu0 %v2726_v52  ;;  %v2928_v52 = vld [vmem:[#allocation4 + $0x120] sm:$0xff] }
 0x554   :  { %2848 = vmatpush1.bf16.msra.mxu1 %v2758_v7  ;;  %2806 = vmatprep.subr.bf16.mxu0 %v2757_v11  ;;  %v2952_v7 = vunpack.c.h.s8.bf16 %v2928_v52  ;;  %v2950_v14 = vunpack.c.l.s8.bf16 %v2928_v52  ;;  %v2926_v11 = vld [vmem:[#allocation4 + $0x110] sm:$0xff] }
 0x555   :  { %2849 = vmatprep.subr.bf16.mxu1 %v2789_v15  ;;  %v2948_v15 = vunpack.c.h.s8.bf16 %v2926_v11 }
 0x557   :  { %2807 = vmatpush2.bf16.msra.mxu0 %v2756_v45  ;;  %v2946_v45 = vunpack.c.l.s8.bf16 %v2926_v11 }
 0x558   :  { %2850 = vmatpush2.bf16.msra.mxu1 %v2788_v63  ;;  %2808 = vmatprep.subr.bf16.mxu0 %v2755_v44  ;;  %v2945_v63 = vunpack.c.h.s8.bf16 %v2925_v22  ;;  %v2924_v44 = vld [vmem:[#allocation4 + $0x100] sm:$0xff] }
 0x559   :  { %2851 = vmatprep.subr.bf16.mxu1 %v2787_v20  ;;  %v2944_v20 = vunpack.c.h.s8.bf16 %v2924_v44 }
 0x55b   :  { %2809 = vmatpush2.bf16.msra.mxu0 %v2754_v21  ;;  %v2942_v21 = vunpack.c.l.s8.bf16 %v2924_v44 }
 0x55c   :  { %2852 = vmatpush2.bf16.msra.mxu1 %v2786_v62  ;;  %2810 = vmatprep.subr.bf16.mxu0 %v2753_v56  ;;  %v2973_v62 = vunpack.c.h.s8.bf16 %v2939_v23  ;;  %v2938_v56 = vld [vmem:[#allocation4 + $0x170] sm:$0xff] }
 0x55d   :  { %2853 = vmatprep.subr.bf16.mxu1 %v2785_v43  ;;  %v2972_v43 = vunpack.c.h.s8.bf16 %v2938_v56 }
 0x55f   :  { %2811 = vmatpush2.bf16.msra.mxu0 %v2752_v49  ;;  %v2970_v49 = vunpack.c.l.s8.bf16 %v2938_v56 }
 0x560   :  { %2854 = vmatpush2.bf16.msra.mxu1 %v2784_v1  ;;  %2812 = vmatprep.subr.bf16.mxu0 %v2751_v24  ;;  %v2969_v1 = vunpack.c.h.s8.bf16 %v2937_v51  ;;  %v2936_v24 = vld [vmem:[#allocation4 + $0x160] sm:$0xff] }
 0x561   :  { %2855 = vmatprep.subr.bf16.mxu1 %v2783_v54  ;;  %v2968_v54 = vunpack.c.h.s8.bf16 %v2936_v24  ;;  %v2966_v6 = vunpack.c.l.s8.bf16 %v2936_v24 }
 0x563   :  { %2813 = vmatpush2.bf16.msra.mxu0 %v2750_v5  ;;  %v2935_v5 = vld [vmem:[#allocation4 + $0x158] sm:$0xff] }
 0x564   :  { %2856 = vmatpush2.bf16.msra.mxu1 %v2782_v27  ;;  %2814 = vmatprep.subr.bf16.mxu0 %v2749_v28  ;;  %v2965_v27 = vunpack.c.h.s8.bf16 %v2935_v5  ;;  %v2934_v28 = vld [vmem:[#allocation4 + $0x150] sm:$0xff]  ;;  %v2963_v30 = vunpack.c.l.s8.bf16 %v2935_v5 }
 0x565   :  { %2857 = vmatprep.subr.bf16.mxu1 %v2781_v29  ;;  %v2964_v29 = vunpack.c.h.s8.bf16 %v2934_v28  ;;  %v2962_v31 = vunpack.c.l.s8.bf16 %v2934_v28 }
 0x567   :  { %2815 = vmatpush2.bf16.msra.mxu0 %v2748_v33  ;;  %v2933_v33 = vld [vmem:[#allocation4 + $0x148] sm:$0xff] }
 0x568   :  { %2858 = vmatpush2.bf16.msra.mxu1 %v2780_v3  ;;  %2816 = vmatprep.subr.bf16.mxu0 %v2747_v35  ;;  %v2961_v3 = vunpack.c.h.s8.bf16 %v2933_v33  ;;  %v2932_v35 = vld [vmem:[#allocation4 + $0x140] sm:$0xff]  ;;  %v2959_v38 = vunpack.c.l.s8.bf16 %v2933_v33 }
 0x569   :  { %2859 = vmatprep.subr.bf16.mxu1 %v2779_v37  ;;  %v2960_v37 = vunpack.c.h.s8.bf16 %v2932_v35  ;;  %v2958_v39 = vunpack.c.l.s8.bf16 %v2932_v35 }
 0x56b   :  { %2817 = vmatpush2.bf16.msra.mxu0 %v2746_v2  ;;  %v3072_v2 = vld [vmem:[#allocation4 + $0x1b8] sm:$0xff] }
 0x56c   :  { %2860 = vmatpush2.bf16.msra.mxu1 %v2778_v41  ;;  %2818 = vmatprep.subr.bf16.mxu0 %v2745_v53  ;;  %v3071_v41 = vld [vmem:[#allocation4 + $0x1b0] sm:$0xff]  ;;  %v3098_v53 = vunpack.c.h.s8.bf16 %v3072_v2  ;;  %v3096_v59 = vunpack.c.l.s8.bf16 %v3072_v2  ;;  %v2912_v2 = vld [vmem:[#allocation15] sm:$0xff] }
 0x56d   :  { %2861 = vmatprep.subr.bf16.mxu1 %v2777_v58  ;;  %v3097_v58 = vunpack.c.h.s8.bf16 %v3071_v41 }
 0x56f   :  { %2819 = vmatpush2.bf16.msra.mxu0 %v2744_v46  ;;  %v3095_v46 = vunpack.c.l.s8.bf16 %v3071_v41 }
 0x570   :  { %2862 = vmatpush2.bf16.msra.mxu1 %v2776_v55  ;;  %2820 = vmatprep.subr.bf16.mxu0 %v2743_v32  ;;  %v3094_v55 = vunpack.c.h.s8.bf16 %v3070_v60  ;;  %v3069_v32 = vld [vmem:[#allocation4 + $0x1a0] sm:$0xff] }
 0x571   :  { %2863 = vmatprep.subr.bf16.mxu1 %v2775_v40  ;;  %v3093_v40 = vunpack.c.h.s8.bf16 %v3069_v32 }
 0x573   :  { %2821 = vmatpush2.bf16.msra.mxu0 %v2742_v50  ;;  %v3068_v50 = vld [vmem:[#allocation4 + $0x198] sm:$0xff] }
 0x574   :  { %2864 = vmatpush2.bf16.msra.mxu1 %v2774_v4  ;;  %2974 = vmatprep.subr.bf16.mxu0 %v2957_v8  ;;  %v3091_v4 = vunpack.c.l.s8.bf16 %v3069_v32  ;;  %v3090_v8 = vunpack.c.h.s8.bf16 %v3068_v50 }
 0x575   :  { %3115 = vmatprep.subr.bf16.mxu1 %v3098_v53 }
 0x576   :  { %2823 = vmatmul.mubr.bf16.vlgmr.msra.gmra.mxu0 %v2722_v25  ;;  %v3089_v25 = vunpack.c.h.s8.bf16 %v3067_v9 }
 0x577   :  { %2866 = vmatmul.mubr.bf16.vlgmr.msra.gmra.mxu1 %v2724_v10  ;;  %2975 = vmatpush1.bf16.msra.mxu0 %v2956_v0  ;;  %v3088_v10 = vunpack.c.l.s8.bf16 %v3068_v50  ;;  %v3066_v0 = vld [vmem:[#allocation4 + $0x188] sm:$0xff] }
 0x578   :  { %2976 = vmatprep.subr.bf16.mxu0 %v2955_v36  ;;  %3116 = vmatpush1.bf16.msra.mxu1 %v3097_v58  ;;  %v3087_v36 = vunpack.c.l.s8.bf16 %v3067_v9  ;;  %v3086_v12 = vunpack.c.h.s8.bf16 %v3066_v0  ;;  %v3084_v52 = vunpack.c.l.s8.bf16 %v3066_v0 }
 0x579   :  { %3117 = vmatprep.subr.bf16.mxu1 %v3096_v59 }
 0x57b   :  { %2977 = vmatpush1.bf16.msra.mxu0 %v2954_v57  ;;  %v3065_v57 = vld [vmem:[#allocation4 + $0x180] sm:$0xff] }
 0x57c   :  { %2978 = vmatprep.subr.bf16.mxu0 %v2953_v13  ;;  %3118 = vmatpush1.bf16.msra.mxu1 %v3095_v46  ;;  %v3085_v13 = vunpack.c.h.s8.bf16 %v3065_v57 }
 0x57d   :  { %3119 = vmatprep.subr.bf16.mxu1 %v3094_v55 }
 0x57f   :  { %2979 = vmatpush1.bf16.msra.mxu0 %v2952_v7  ;;  %v3080_v7 = vld [vmem:[#allocation4 + $0x1f8] sm:$0xff] }
 0x580   :  { %2980 = vmatprep.subr.bf16.mxu0 %v2951_v16  ;;  %3120 = vmatpush1.bf16.msra.mxu1 %v3093_v40  ;;  %v3083_v16 = vunpack.c.l.s8.bf16 %v3065_v57  ;;  %v3114_v18 = vunpack.c.h.s8.bf16 %v3080_v7  ;;  %v3112_v11 = vunpack.c.l.s8.bf16 %v3080_v7  ;;  %v3075_v57 = vld [vmem:[#allocation4 + $0x1d0] sm:$0xff] }
 0x581   :  { %3121 = vmatprep.subr.bf16.mxu1 %v3092_v19  ;;  %v2916_v19 = vmul.f32 0.5, %v2912_v2  ;;  %v3103_v7 = vunpack.c.l.s8.bf16 %v3075_v57 }
 0x583   :  { %2981 = vmatpush1.bf16.msra.mxu0 %v2950_v14  ;;  %v3079_v14 = vld [vmem:[#allocation4 + $0x1f0] sm:$0xff] }
 0x584   :  { %2982 = vmatprep.subr.bf16.mxu0 %v2949_v42  ;;  %3122 = vmatpush1.bf16.msra.mxu1 %v3091_v4  ;;  %v3113_v42 = vunpack.c.h.s8.bf16 %v3079_v14 }
 0x585   :  { %3123 = vmatprep.subr.bf16.mxu1 %v3090_v8 }
 0x587   :  { %2983 = vmatpush1.bf16.msra.mxu0 %v2948_v15  ;;  %v3078_v15 = vld [vmem:[#allocation4 + $0x1e8] sm:$0xff] }
 0x588   :  { %2984 = vmatprep.subr.bf16.mxu0 %v2947_v34  ;;  %3124 = vmatpush1.bf16.msra.mxu1 %v3089_v25  ;;  %v3111_v34 = vunpack.c.l.s8.bf16 %v3079_v14  ;;  %v3110_v22 = vunpack.c.h.s8.bf16 %v3078_v15  ;;  %v3108_v44 = vunpack.c.l.s8.bf16 %v3078_v15  ;;  %v3073_v14 = vld [vmem:[#allocation4 + $0x1c0] sm:$0xff] }
 0x589   :  { %3125 = vmatprep.subr.bf16.mxu1 %v3088_v10  ;;  %v3099_v15 = vunpack.c.l.s8.bf16 %v3073_v14 }
 0x58b   :  { %2985 = vmatpush1.bf16.msra.mxu0 %v2946_v45  ;;  %v3077_v45 = vld [vmem:[#allocation4 + $0x1e0] sm:$0xff] }
 0x58c   :  { %2986 = vmatprep.subr.bf16.mxu0 %v2945_v63  ;;  %3126 = vmatpush1.bf16.msra.mxu1 %v3087_v36  ;;  %v3109_v63 = vunpack.c.h.s8.bf16 %v3077_v45  ;;  %v3076_v36 = vld [vmem:[#allocation4 + $0x1d8] sm:$0xff] }
 0x58d   :  { %3127 = vmatprep.subr.bf16.mxu1 %v3086_v12  ;;  %v3106_v12 = vunpack.c.h.s8.bf16 %v3076_v36 }
 0x58f   :  { %2987 = vmatpush1.bf16.msra.mxu0 %v2944_v20  ;;  %v3107_v20 = vunpack.c.l.s8.bf16 %v3077_v45  ;;  %v3033_v45 = vld [vmem:[%s4306_s20] sm:$0x3] }
 0x590   :  { %2988 = vmatprep.subr.bf16.mxu0 %v2943_v17  ;;  %3128 = vmatpush1.bf16.msra.mxu1 %v3085_v13  ;;  %v2876_v17 = vld [vmem:[#allocation19] sm:$0x3]  ;;  %v3105_v13 = vunpack.c.h.s8.bf16 %v3075_v57 }
 0x591   :  { %3129 = vmatprep.subr.bf16.mxu1 %v3084_v52  ;;  %v3104_v52 = vunpack.c.l.s8.bf16 %v3076_v36  ;;  %v3200_v36 = vld [vmem:[#allocation18 + $0x10] sm:$0xff] }
 0x593   :  { %2989 = vmatpush1.bf16.msra.mxu0 %v2942_v21 }
 0x594   :  { %2990 = vmatprep.subr.bf16.mxu0 %v2973_v62  ;;  %3130 = vmatpush1.bf16.msra.mxu1 %v3083_v16  ;;  %v2881_v62 = vrot.slane %v2876_v17, %v4044_v61  ;;  %v3074_v16 = vld [vmem:[#allocation4 + $0x1c8] sm:$0xff] }
 0x595   :  { %3131 = vmatprep.subr.bf16.mxu1 %v3114_v18  ;;  %v3102_v18 = vunpack.c.h.s8.bf16 %v3074_v16 }
 0x597   :  { %2991 = vmatpush2.bf16.msra.mxu0 %v2972_v43  ;;  %v2892_v43 = vld [vmem:[%s4305_s19] sm:$0x3] }
 0x598   :  { %2992 = vmatprep.subr.bf16.mxu0 %v2971_v48  ;;  %3132 = vmatpush2.bf16.msra.mxu1 %v3113_v42  ;;  %v2885_v48 = vrot.slane %v2876_v17, %v4057_v47  ;;  %v2901_v24 = vrot.slane %v2892_v43, %v4057_v47  ;;  %v3101_v42 = vunpack.c.h.s8.bf16 %v3073_v14 }
 0x599   :  { %3133 = vmatprep.subr.bf16.mxu1 %v3112_v11  ;;  %v3100_v11 = vunpack.c.l.s8.bf16 %v3074_v16  ;;  %v3204_v16 = vmul.f32 0.5, %v3200_v36 }
 0x59b   :  { %2993 = vmatpush2.bf16.msra.mxu0 %v2970_v49 }
 0x59c   :  { %2994 = vmatprep.subr.bf16.mxu0 %v2969_v1  ;;  %3134 = vmatpush2.bf16.msra.mxu1 %v3111_v34  ;;  %v3017_v34 = vld [vmem:[#allocation21] sm:$0x3] }
 0x59d   :  { %3135 = vmatprep.subr.bf16.mxu1 %v3110_v22  ;;  %v3022_v22 = vrot.slane %v3017_v34, %v4044_v61 }
 0x59f   :  { %2995 = vmatpush2.bf16.msra.mxu0 %v2968_v54 }
 0x5a0   :  { %2996 = vmatprep.subr.bf16.mxu0 %v2967_v26  ;;  %3136 = vmatpush2.bf16.msra.mxu1 %v3109_v63  ;;  %v2897_v26 = vrot.slane %v2892_v43, %v4044_v61  ;;  %v3026_v63 = vrot.slane %v3017_v34, %v4057_v47 }
 0x5a1   :  { %3137 = vmatprep.subr.bf16.mxu1 %v3108_v44 }
 0x5a3   :  { %2997 = vmatpush2.bf16.msra.mxu0 %v2966_v6 }
 0x5a4   :  { %2998 = vmatprep.subr.bf16.mxu0 %v2965_v27  ;;  %3138 = vmatpush2.bf16.msra.mxu1 %v3107_v20  ;;  %v3042_v20 = vrot.slane %v3033_v45, %v4057_v47 }
 0x5a5   :  { %3139 = vmatprep.subr.bf16.mxu1 %v3106_v12 }
 0x5a7   :  { %2999 = vmatpush2.bf16.msra.mxu0 %v2964_v29 }
 0x5a8   :  { %3000 = vmatprep.subr.bf16.mxu0 %v2963_v30  ;;  %3140 = vmatpush2.bf16.msra.mxu1 %v3105_v13 }
 0x5a9   :  { %3141 = vmatprep.subr.bf16.mxu1 %v3104_v52 }
 0x5ab   :  { %3001 = vmatpush2.bf16.msra.mxu0 %v2962_v31 }
 0x5ac   :  { %3002 = vmatprep.subr.bf16.mxu0 %v2961_v3  ;;  %v2914_v3 = vld [vmem:[#allocation15 + $0x10] sm:$0xff]  ;;  %3142 = vmatpush2.bf16.msra.mxu1 %v3103_v7 }
 0x5ad   :  { %v2918_v58 = vmul.f32 0.5, %v2914_v3  ;;  %3143 = vmatprep.subr.bf16.mxu1 %v3102_v18  ;;  %v3201_v18 = vld [vmem:[#allocation18 + $0x18] sm:$0xff] }
 0x5af   :  { %3003 = vmatpush2.bf16.msra.mxu0 %v2960_v37  ;;  %v2913_v37 = vld [vmem:[#allocation15 + $0x8] sm:$0xff] }
 0x5b0   :  { %3004 = vmatprep.subr.bf16.mxu0 %v2959_v38  ;;  %v2917_v59 = vmul.f32 0.5, %v2913_v37  ;;  %3144 = vmatpush2.bf16.msra.mxu1 %v3101_v42 }
 0x5b1   :  { %3145 = vmatprep.subr.bf16.mxu1 %v3100_v11 }
 0x5b3   :  { %3005 = vmatpush2.bf16.msra.mxu0 %v2958_v39  ;;  %v2915_v39 = vld [vmem:[#allocation15 + $0x18] sm:$0xff] }
 0x5b4   :  { %v2919_v32 = vmul.f32 0.5, %v2915_v39  ;;  %3146 = vmatpush2.bf16.msra.mxu1 %v3099_v15 }
 0x636   :  { %v2824_v23 = vpop.f32.mrf.mxu0 }
 0x637   :  { %v2867_v21 = vpop.f32.mrf.mxu1 }
 0x638   :  { %v2868_v56 = vadd.f32 %v2867_v21, %v2824_v23  ;;  %v2826_v51 = vpop.f32.mrf.mxu0  ;;  %v3038_v23 = vrot.slane %v3033_v45, %v4044_v61  ;;  %v3205_v45 = vmul.f32 0.5, %v3201_v18 }
 0x639   :  { %v2869_v49 = vpop.f32.mrf.mxu1 }
 0x63a   :  { %v2870_v1 = vadd.f32 %v2869_v49, %v2826_v51  ;;  %v2888_v54 = vmul.f32 %v2881_v62, %v2868_v56  ;;  %v2828_v6 = vpop.f32.mrf.mxu0  ;;  %v3055_v49 = vld [vmem:[#allocation16 + $0x10] sm:$0xff] }
 0x63b   :  { %v2871_v5 = vpop.f32.mrf.mxu1 }
 0x63c   :  { %v2889_v27 = vmul.f32 %v2885_v48, %v2870_v1  ;;  %v2872_v28 = vadd.f32 %v2871_v5, %v2828_v6  ;;  %v2830_v29 = vpop.f32.mrf.mxu0  ;;  %v2904_v38 = vadd.f32 %v2897_v26, %v2888_v54  ;;  %v3056_v54 = vld [vmem:[#allocation16 + $0x18] sm:$0xff] }
 0x63d   :  { %v2873_v30 = vpop.f32.mrf.mxu1 }
 0x63e   :  { %v2905_v31 = vadd.f32 %v2901_v24, %v2889_v27  ;;  %v2890_v33 = vmul.f32 %v2881_v62, %v2872_v28  ;;  %v2874_v35 = vadd.f32 %v2873_v30, %v2830_v29  ;;  %v2908_v40 = vmax.f32 %v2904_v38, 0.0 }
 0x63f   :  { %v3059_v28 = vmul.f32 0.5, %v3055_v49 }
 0x640   :  { %v2906_v41 = vadd.f32 %v2897_v26, %v2890_v33  ;;  %v2891_v53 = vmul.f32 %v2885_v48, %v2874_v35  ;;  %v2909_v60 = vmax.f32 %v2905_v31, 0.0  ;;  %v2920_v25 = vadd.f32 %v2916_v19, %v2908_v40  ;;  %v3054_v48 = vld [vmem:[#allocation16 + $0x8] sm:$0xff]  ;;  %v3053_v26 = vld [vmem:[#allocation16] sm:$0xff] }
 0x641   :  { %v3058_v27 = vmul.f32 0.5, %v3054_v48  ;;  %v3060_v33 = vmul.f32 0.5, %v3056_v54  ;;  %v3057_v35 = vmul.f32 0.5, %v3053_v26  ;;  %v3198_v19 = vld [vmem:[#allocation18] sm:$0xff] }
 0x642   :  { %v2910_v46 = vmax.f32 %v2906_v41, 0.0  ;;  %v2907_v55 = vadd.f32 %v2901_v24, %v2891_v53  ;;  %v2921_v8 = vadd.f32 %v2917_v59, %v2909_v60  ;;  %v3158_v59 = vld [vmem:[%s4301_s15] sm:$0x3] }
 0x643   :  { %v3174_v60 = vld [vmem:[%s4307_s21] sm:$0x3] }
 0x644   :  { %v2911_v50 = vmax.f32 %v2907_v55, 0.0  ;;  %v2922_v4 = vadd.f32 %v2918_v58, %v2910_v46  ;;  %v3163_v46 = vrot.slane %v3158_v59, %v4044_v61  ;;  %v3179_v55 = vrot.slane %v3174_v60, %v4044_v61 }
 0x646   :  { %v2923_v9 = vadd.f32 %v2919_v32, %v2911_v50  ;;  %v2940_v0 = vpack.c.bf16 %v2922_v4, %v2920_v25  ;;  %v3167_v32 = vrot.slane %v3158_v59, %v4057_v47  ;;  %v3183_v4 = vrot.slane %v3174_v60, %v4057_v47 }
 0x648   :  { %v2941_v10 = vpack.c.bf16 %v2923_v9, %v2921_v8  ;;  %v3199_v9 = vld [vmem:[#allocation18 + $0x8] sm:$0xff] }
 0x649   :  { %v3203_v52 = vmul.f32 0.5, %v3199_v9 }
 0x64a   :  { %3006 = vmatprep.mubr.bf16.mxu0 %v2941_v10  ;;  %v3202_v10 = vmul.f32 0.5, %v3198_v19 }
 0x64b   :  { %3007 = vmatmul.mubr.bf16.vlgmr.msra.gmra.mxu0 %v2940_v0 }
 0x70b   :  { %v3008_v44 = vpop.f32.mrf.mxu0 }
 0x70c   :  { %v3029_v17 = vmul.f32 %v3022_v22, %v3008_v44 }
 0x70d   :  { %v3010_v21 = vpop.f32.mrf.mxu0 }
 0x70e   :  { %v3030_v62 = vmul.f32 %v3026_v63, %v3010_v21  ;;  %v3045_v1 = vadd.f32 %v3038_v23, %v3029_v17 }
 0x70f   :  { %v3012_v56 = vpop.f32.mrf.mxu0 }
 0x710   :  { %v3046_v43 = vadd.f32 %v3042_v20, %v3030_v62  ;;  %v3031_v51 = vmul.f32 %v3022_v22, %v3012_v56  ;;  %v3049_v3 = vmax.f32 %v3045_v1, 0.0 }
 0x711   :  { %v3014_v24 = vpop.f32.mrf.mxu0 }
 0x712   :  { %v3047_v6 = vadd.f32 %v3038_v23, %v3031_v51  ;;  %v3032_v5 = vmul.f32 %v3026_v63, %v3014_v24  ;;  %v3050_v29 = vmax.f32 %v3046_v43, 0.0  ;;  %v3061_v41 = vadd.f32 %v3057_v35, %v3049_v3 }
 0x714   :  { %v3051_v30 = vmax.f32 %v3047_v6, 0.0  ;;  %v3048_v31 = vadd.f32 %v3042_v20, %v3032_v5  ;;  %v3062_v39 = vadd.f32 %v3058_v27, %v3050_v29 }
 0x716   :  { %v3052_v37 = vmax.f32 %v3048_v31, 0.0  ;;  %v3063_v38 = vadd.f32 %v3059_v28, %v3051_v30 }
 0x718   :  { %v3064_v2 = vadd.f32 %v3060_v33, %v3052_v37  ;;  %v3081_v58 = vpack.c.bf16 %v3063_v38, %v3061_v41 }
 0x71a   :  { %v3082_v53 = vpack.c.bf16 %v3064_v2, %v3062_v39 }
 0x71c   :  { %3147 = vmatprep.mubr.bf16.mxu1 %v3082_v53 }
 0x71d   :  { %3148 = vmatmul.mubr.bf16.vlgmr.msra.gmra.mxu1 %v3081_v58 }
 0x7dd   :  { %v3149_v40 = vpop.f32.mrf.mxu1 }
 0x7de   :  { %v3170_v50 = vmul.f32 %v3163_v46, %v3149_v40 }
 0x7df   :  { %v3151_v8 = vpop.f32.mrf.mxu1 }
 0x7e0   :  { %v3186_v25 = vadd.f32 %v3179_v55, %v3170_v50  ;;  %v3171_v0 = vmul.f32 %v3167_v32, %v3151_v8 }
 0x7e1   :  { %v3153_v12 = vpop.f32.mrf.mxu1 }
 0x7e2   :  { %v3190_v57 = vmax.f32 %v3186_v25, 0.0  ;;  %v3187_v13 = vadd.f32 %v3183_v4, %v3171_v0  ;;  %v3172_v7 = vmul.f32 %v3163_v46, %v3153_v12 }
 0x7e3   :  { %v3155_v61 = vpop.f32.mrf.mxu1 }
 0x7e4   :  { %3194 = vst [vmem:[#allocation24] sm:$0xff] %v3190_v57  ;;  %v3206_v14 = vadd.f32 %v3202_v10, %v3190_v57  ;;  %v3191_v42 = vmax.f32 %v3187_v13, 0.0  ;;  %v3188_v11 = vadd.f32 %v3179_v55, %v3172_v7  ;;  %v3173_v15 = vmul.f32 %v3167_v32, %v3155_v61 }
 0x7e6   :  { %3195 = vst [vmem:[#allocation24 + $0x8] sm:$0xff] %v3191_v42  ;;  %v3207_v47 = vadd.f32 %v3203_v52, %v3191_v42  ;;  %v3192_v34 = vmax.f32 %v3188_v11, 0.0  ;;  %v3189_v22 = vadd.f32 %v3183_v4, %v3173_v15 }
 0x7e8   :  { %3196 = vst [vmem:[#allocation24 + $0x10] sm:$0xff] %v3192_v34  ;;  %v3208_v63 = vadd.f32 %v3204_v16, %v3192_v34  ;;  %v3193_v44 = vmax.f32 %v3189_v22, 0.0 }
 0x7ea   :  { %3197 = vst [vmem:[#allocation24 + $0x18] sm:$0xff] %v3193_v44  ;;  %v3209_v20 = vadd.f32 %v3205_v45, %v3193_v44 }
 0x7eb   :  { %3760 = dma.done.wait [#allocation6 + $0x3], 1024 }
 0x7ec   :  { %3761 = vsyncadd [#allocation6 + $0x3], 4294966272  ;;  %v3223_v17 = vpack.c.bf16 %v3209_v20, %v3207_v47  ;;  %v3221_v23 = vld [vmem:[#allocation5 + $0x38] sm:$0xff]  ;;  %v3220_v48 = vld [vmem:[#allocation5 + $0x30] sm:$0xff]  ;;  %v3222_v39 = vpack.c.bf16 %v3208_v63, %v3206_v14  ;;  %s3789_s15 = smov [#allocation24]  }
 0x7ed   :  { %v3217_v21 = vld [vmem:[#allocation5 + $0x18] sm:$0xff]  ;;  %v3238_v62 = vunpack.c.l.s8.bf16 %v3221_v23  ;;  %v3239_v56 = vunpack.c.h.s8.bf16 %v3221_v23  ;;  %v3237_v49 = vunpack.c.h.s8.bf16 %v3220_v48  ;;  %v3216_v1 = vld [vmem:[#allocation5 + $0x10] sm:$0xff]  ;;  %v3236_v54 = vunpack.c.l.s8.bf16 %v3220_v48  ;;  %v3219_v26 = vld [vmem:[#allocation5 + $0x28] sm:$0xff]  ;;  %s3306_s21 = sshll.u32 %s3789_s15, 4  ;;  %s3307_s21 = int_to_ptr.vmem [resolvable:$true] %s3306_s21 }
 0x7ee   :  { %3272 = vmatprep.mubr.bf16.mxu0 %v3223_v17  ;;  %v3231_v43 = vunpack.c.h.s8.bf16 %v3217_v21  ;;  %v3230_v51 = vunpack.c.l.s8.bf16 %v3217_v21  ;;  %v3229_v24 = vunpack.c.h.s8.bf16 %v3216_v1  ;;  %v3228_v6 = vunpack.c.l.s8.bf16 %v3216_v1  ;;  %v3215_v27 = vld [vmem:[#allocation5 + $0x8] sm:$0xff]  ;;  %v3218_v30 = vld [vmem:[#allocation5 + $0x20] sm:$0xff]  ;;  %s3702_s2 = scalar_lea.vmem %s3307_s21, 512  ;;  %p3707_p1 = scmp.lt.s32.totalorder %s3307_s21, %s3307_s21 }
 0x7ef   :  { %3372 = vmatprep.subr.bf16.mxu0 %v3239_v56  ;;  %v3235_v5 = vunpack.c.h.s8.bf16 %v3219_v26  ;;  %v3227_v28 = vunpack.c.h.s8.bf16 %v3215_v27  ;;  %v3234_v29 = vunpack.c.l.s8.bf16 %v3219_v26  ;;  %v3226_v31 = vunpack.c.l.s8.bf16 %v3215_v27  ;;  %v3214_v3 = vld [vmem:[#allocation5] sm:$0xff]  ;;  %p3703_p0 = scmp.ne.s32.totalorder %s3307_s21, %s3702_s2  ;;  %p3708_p2 = scmp.lt.s32.totalorder %s3702_s2, %s3702_s2 }
 0x7f0   :  { %3373 = vmatpush3.bf16.msra.mxu0 %v3231_v43  ;;  %v3233_v33 = vunpack.c.h.s8.bf16 %v3218_v30  ;;  %v3225_v35 = vunpack.c.h.s8.bf16 %v3214_v3  ;;  %v3232_v37 = vunpack.c.l.s8.bf16 %v3218_v30  ;;  %v3224_v38 = vunpack.c.l.s8.bf16 %v3214_v3 }
 0x7f1   :  { %3374 = vmatprep.subr.bf16.mxu0 %v3238_v62  ;;  %p3709_p3 = por %p3708_p2, %p3707_p1 }
 0x7f3   :  { %p3710_p4 = pnand %p3709_p3, %p3703_p0 }
 0x7f4   :  { %3375 = vmatpush3.bf16.msra.mxu0 %v3230_v51 }
 0x7f5   :  { %3376 = vmatprep.subr.bf16.mxu0 %v3237_v49 }
 0x7f8   :  { %3377 = vmatpush3.bf16.msra.mxu0 %v3229_v24 }
 0x7f9   :  { %3378 = vmatprep.subr.bf16.mxu0 %v3236_v54 }
 0x7fc   :  { %3379 = vmatpush3.bf16.msra.mxu0 %v3228_v6 }
 0x7fd   :  { %3380 = vmatprep.subr.bf16.mxu0 %v3235_v5 }
 0x800   :  { %3381 = vmatpush3.bf16.msra.mxu0 %v3227_v28 }
 0x801   :  { %3382 = vmatprep.subr.bf16.mxu0 %v3234_v29 }
 0x804   :  { %3383 = vmatpush3.bf16.msra.mxu0 %v3226_v31 }
 0x805   :  { %3384 = vmatprep.subr.bf16.mxu0 %v3233_v33 }
 0x808   :  { %3385 = vmatpush3.bf16.msra.mxu0 %v3225_v35 }
 0x809   :  { %3386 = vmatprep.subr.bf16.mxu0 %v3232_v37 }
 0x80c   :  { %3387 = vmatpush3.bf16.msra.mxu0 %v3224_v38 }
 0x80f   :  { %3273 = vmatmul.mubr.bf16.vlgmr.msra.gmra.mxu0 %v3222_v39 }
 0x810   :  { %3713 = shalt.err (!%p3710_p4)
}
 0x811   :  { %3312 = dma.vmem_to_hbm [thread:$0]  %s3307_s21, 512, %s4309_s23, [#allocation9], %s4329_s29, %s4329_s29, %s3775_s7   ;;  %v3366_v53 = vld [vmem:[#allocation22] ss:$0 sm:$0xff] }
 0x812   :  { %s4334_s30 = sld [smem:[#allocation58_spill]]  ;;  %s3790_s27 = smov [#allocation25]  }
 0x813   :  { %s3318_s28 = sshll.u32 %s3790_s27, 4  ;;  %s3319_s28 = int_to_ptr.vmem [resolvable:$true] %s3318_s28 }
 0x814   :  { %s3722_s23 = scalar_lea.vmem %s3319_s28, 256  ;;  %p3727_p6 = scmp.lt.s32.totalorder %s3319_s28, %s3319_s28 }
 0x815   :  { %p3723_p5 = scmp.ne.s32.totalorder %s3319_s28, %s3722_s23  ;;  %p3728_p7 = scmp.lt.s32.totalorder %s3722_s23, %s3722_s23 }
 0x817   :  { %p3729_p8 = por %p3728_p7, %p3727_p6 }
 0x818   :  { %v3367_v59 = vld [vmem:[%s4334_s30] ss:$0 sm:$0xff] }
 0x819   :  { %p3730_p9 = pnand %p3729_p8, %p3723_p5 }
 0x8cf   :  { %v3388_v2 = vpop.f32.mrf.mxu0 }
 0x8d1   :  { %v3389_v41 = vpop.f32.mrf.mxu0 }
 0x8d2   :  { %v3390_v58 = vadd.f32 %v3389_v41, %v3388_v2 }
 0x8d3   :  { %v3391_v60 = vpop.f32.mrf.mxu0 }
 0x8d4   :  { %v3288_v46 = vmul.f32 %v3390_v58, %v3366_v53 }
 0x8d5   :  { %v3392_v55 = vpop.f32.mrf.mxu0 }
 0x8d6   :  { %v3297_v32 = vadd.f32 %v3367_v59, %v3288_v46  ;;  %v3393_v40 = vadd.f32 %v3392_v55, %v3391_v60 }
 0x8d8   :  { %3299 = vst [vmem:[#allocation25] sm:$0xff] %v3297_v32  ;;  %v3289_v19 = vmul.f32 %v3393_v40, %v3366_v53 }
 0x8da   :  { %v3298_v50 = vadd.f32 %v3367_v59, %v3289_v19 }
 0x8dc   :  { %3300 = vst [vmem:[#allocation25 + $0x8] sm:$0xff] %v3298_v50 }
 0x8dd   :  { %3733 = shalt.err (!%p3730_p9)
}
 0x8de   :  { %s3791_s7 = smov 128   ;;  %s3792_s29 = smov 8  }
 0x8df   :  { %s4335_s13 = sld [smem:[#allocation59_spill]] }
 0x8e5   :  { %3324 = dma.vmem_to_hbm [thread:$0]  %s3319_s28, 256, %s4335_s13, [#allocation26], %s3791_s7, %s3791_s7, %s3792_s29  }
 0x8e6   :  { %3762 = dma.done.wait [#allocation9], 512  }
 0x8e7   :  { %3763 = vsyncadd [#allocation9], 4294966784 }
 0x8e8   :  { %3764 = dma.done.wait [#allocation26], 256  }
 0x8e9   :  { %3765 = vsyncadd [#allocation26], 4294967040 }
 0x8ea   :  { %3331 = vsyncpa [#allocation8], 1 }
 0x8eb   :  { %3332 = vsyncpa [#allocation11], 1 }
 0x8ec   :  { %3333 = vsyncpa [#allocation14], 1 }
 0x8ed   :  { %3334 = vsyncpa [#allocation17], 1 }
 0x8ee   :  { %3335 = vsyncpa [#allocation20], 1 }
 0x8ef   :  { %3336 = vsyncpa [#allocation23], 1 }
 0x8f0   :  { %3337 = vsyncpa [#allocation9], 1 }
 0x8f1   :  { %3338 = vsyncpa [#allocation26], 1 }
 0x8f2   :  { %3339 = vsyncmov [#allocation6] }
 0x8f5   :  { %s3340_s16 = vpop.sfrf %3339 }
 0x8f6   :  { %p3368_p10 = scmp.ne.s32.totalorder %s3340_s16, 0 }
 0x8f8   :  { %3344 = shalt.err (%p3368_p10)  }
 0x8f9   :  { %3346 = vsyncmov [#allocation6 + $0x1] }
 0x8fc   :  { %s3347_s17 = vpop.sfrf %3346 }
 0x8fd   :  { %p3369_p11 = scmp.ne.s32.totalorder %s3347_s17, 0 }
 0x8ff   :  { %3351 = shalt.err (%p3369_p11)  }
 0x900   :  { %3353 = vsyncmov [#allocation6 + $0x2] }
 0x903   :  { %s3354_s22 = vpop.sfrf %3353 }
 0x904   :  { %p3370_p12 = scmp.ne.s32.totalorder %s3354_s22, 0 }
 0x906   :  { %3358 = shalt.err (%p3370_p12)  }
 0x907   :  { %3360 = vsyncmov [#allocation6 + $0x3] }
 0x90a   :  { %s3361_s11 = vpop.sfrf %3360 }
 0x90b   :  { %p3371_p13 = scmp.ne.s32.totalorder %s3361_s11, 0 }
 0x90d   :  { %3365 = shalt.err (%p3371_p13)  }

</bundles_post_ra>
